<compile_context>
chip_gen: v7x
topology: tpu7x:2x2x1
jax: 0.10.0
libtpu: 0.0.40
codegen_flags: <defaults>
</compile_context>

<pallas_src>
import numpy as np
import jax
import jax.numpy as jnp
from jax import lax
from jax.experimental import pallas as pl
from jax.experimental.pallas import tpu as pltpu


def cbam_kernel(x_ref, w1t_ref, b1_ref, w2_ref, b2_ref, tsp_ref, bsp_ref, o_ref):
    x = x_ref[...]                                        # (Bt, C, HW) f32
    inv_hw = 1.0 / x.shape[2]

    # ---- channel attention: GAP -> 1x1 -> ReLU -> 1x1 -> sigmoid ---------------
    pooled = jnp.sum(x, axis=2, keepdims=True) * inv_hw   # (Bt, C, 1)
    # hidden[b, r] = relu(sum_c pooled[b, c] * W1[r, c] + b1[r])
    h = jnp.sum(pooled * w1t_ref[...][None], axis=1, keepdims=True) \
        + b1_ref[...][None]                               # (Bt, 1, Cr)
    h = jnp.maximum(h, 0.0)
    # ca[b, c] = sigmoid(sum_r hidden[b, r] * W2[c, r] + b2[c])
    ca = jnp.sum(h * w2_ref[...][None], axis=2, keepdims=True) \
        + b2_ref[...][None]                               # (Bt, C, 1)
    ca = jax.nn.sigmoid(ca)
    x_ca = x * ca                                         # (Bt, C, HW)

    # ---- spatial attention: channel mean/max -> 7x7 conv (as MXU matmuls) ------
    avg_map = jnp.mean(x_ca, axis=1)                      # (Bt, HW)
    max_map = jnp.max(x_ca, axis=1)                       # (Bt, HW)
    sa = (jnp.dot(avg_map, tsp_ref[0],
                  precision=lax.Precision.HIGHEST,
                  preferred_element_type=jnp.float32)
          + jnp.dot(max_map, tsp_ref[1],
                    precision=lax.Precision.HIGHEST,
                    preferred_element_type=jnp.float32)
          + bsp_ref[0])
    sa = jax.nn.sigmoid(sa)                               # (Bt, HW)

    o_ref[...] = (x_ca * sa[:, None, :]).astype(o_ref.dtype)


def _spatial_conv_operator(wsp, H, W):
    """Express the 7x7 'same' conv (2 in-ch -> 1 out-ch) as two dense (HW, HW)
    matrices so the kernel can run it on the MXU:
        sa_flat = avg_flat @ T[0] + max_flat @ T[1] + bias.
    The sparsity pattern is static (numpy); only the weight values are traced."""
    HW = H * W
    K = wsp.shape[-1]
    pad = K // 2
    yy, xx = np.meshgrid(np.arange(H), np.arange(W), indexing="ij")
    out_idx = (yy * W + xx).reshape(-1)                    # (HW,)
    ks, rows, cols, taps = [], [], [], []
    for k in range(wsp.shape[1]):
        for dy in range(K):
            for dx in range(K):
                iy = yy + dy - pad
                ix = xx + dx - pad
                valid = ((iy >= 0) & (iy < H) & (ix >= 0) & (ix < W)).reshape(-1)
                in_idx = (np.clip(iy, 0, H - 1) * W + np.clip(ix, 0, W - 1)).reshape(-1)
                n = int(valid.sum())
                rows.append(in_idx[valid])
                cols.append(out_idx[valid])
                ks.append(np.full(n, k, np.int32))
                taps.append(np.full(n, (k * K + dy) * K + dx, np.int32))
    rows = np.concatenate(rows)
    cols = np.concatenate(cols)
    ks = np.concatenate(ks)
    taps = np.concatenate(taps)
    vals = wsp.reshape(-1).astype(jnp.float32)[taps]
    return jnp.zeros((wsp.shape[1], HW, HW), jnp.float32).at[ks, rows, cols].add(vals)


def cbam_pallas(x, w1, b1, w2, b2, wsp, bsp, *, max_block_bytes=2 * 1024 * 1024):
    """x: (B, C, H, W); weights in PyTorch Conv2d layout."""
    B, C, H, W = x.shape
    HW = H * W
    Cr = w1.shape[0]

    # Lane-dense layout: flatten H*W into the last (lane) dimension.
    xf = x.reshape(B, C, HW).astype(jnp.float32)
    w1t = jnp.transpose(w1.reshape(Cr, C)).astype(jnp.float32)   # (C, Cr)
    b1r = b1.reshape(1, Cr).astype(jnp.float32)
    w2r = w2.reshape(C, Cr).astype(jnp.float32)                  # (C, Cr)
    b2r = b2.reshape(C, 1).astype(jnp.float32)
    tsp = _spatial_conv_operator(wsp, H, W)                      # (2, HW, HW)
    bspr = bsp.reshape(1).astype(jnp.float32)

    # Batch-tile: biggest divisor of B whose input block stays under
    # max_block_bytes.  ~2 MiB keeps in+out double-buffers well inside the 16 MiB
    # default scoped VMEM on v5e; raise max_block_bytes (and vmem_limit_bytes) for
    # v6e, and halve a v6e-tuned value on v7x (64 MiB VMEM / 2 TCs).
    item_bytes = C * HW * 4
    bt_cap = max(1, max_block_bytes // item_bytes)
    Bt = max(d for d in range(1, B + 1) if B % d == 0 and d <= bt_cap)

    grid_spec = pltpu.PrefetchScalarGridSpec(
        num_scalar_prefetch=0,
        grid=(B // Bt,),
        in_specs=[
            pl.BlockSpec((Bt, C, HW), lambda b: (b, 0, 0)),
            pl.BlockSpec((C, Cr), lambda b: (0, 0)),
            pl.BlockSpec((1, Cr), lambda b: (0, 0)),
            pl.BlockSpec((C, Cr), lambda b: (0, 0)),
            pl.BlockSpec((C, 1), lambda b: (0, 0)),
            pl.BlockSpec((2, HW, HW), lambda b: (0, 0, 0)),
            pl.BlockSpec(memory_space=pltpu.MemorySpace.SMEM),
        ],
        out_specs=pl.BlockSpec((Bt, C, HW), lambda b: (b, 0, 0)),
    )

    out = pl.pallas_call(
        cbam_kernel,
        out_shape=jax.ShapeDtypeStruct((B, C, HW), x.dtype),
        grid_spec=grid_spec,
        compiler_params=pltpu.CompilerParams(dimension_semantics=("parallel",)),
    )(xf, w1t, b1r, w2r, b2r, tsp, bspr)
    return out.reshape(B, C, H, W)


def cbam_ref(x, w1, b1, w2, b2, wsp, bsp):
    """Pure-JAX reference matching the PyTorch module semantics."""
    B, C, H, W = x.shape
    Cr = w1.shape[0]
    pooled = jnp.mean(x, axis=(2, 3))                                # (B, C)
    h = jnp.maximum(pooled @ w1.reshape(Cr, C).T + b1, 0.0)          # (B, Cr)
    ca = jax.nn.sigmoid(h @ w2.reshape(C, Cr).T + b2)                # (B, C)
    xc = x * ca[:, :, None, None]
    avg = jnp.mean(xc, axis=1, keepdims=True)
    mx = jnp.max(xc, axis=1, keepdims=True)
    sa_in = jnp.concatenate([avg, mx], axis=1)                       # (B, 2, H, W)
    sa = jax.lax.conv_general_dilated(
        sa_in, wsp, window_strides=(1, 1), padding=[(3, 3), (3, 3)],
        dimension_numbers=("NCHW", "OIHW", "NCHW"))
    sa = jax.nn.sigmoid(sa + bsp[None, :, None, None])
    return xc * sa


if __name__ == "__main__":
    B, C, H, W = 2, 32, 16, 16
    reduction = 16
    Cr = C // reduction

    key = jax.random.PRNGKey(0)
    ks = jax.random.split(key, 7)
    x = jax.random.normal(ks[0], (B, C, H, W), jnp.float32)
    # Conv2d(channels, channels // reduction, 1)
    w1 = jax.random.normal(ks[1], (Cr, C, 1, 1), jnp.float32) * 0.1
    b1 = jax.random.normal(ks[2], (Cr,), jnp.float32) * 0.1
    # Conv2d(channels // reduction, channels, 1)
    w2 = jax.random.normal(ks[3], (C, Cr, 1, 1), jnp.float32) * 0.1
    b2 = jax.random.normal(ks[4], (C,), jnp.float32) * 0.1
    # Conv2d(2, 1, kernel_size=7, padding=3)
    wsp = jax.random.normal(ks[5], (1, 2, 7, 7), jnp.float32) * 0.1
    bsp = jax.random.normal(ks[6], (1,), jnp.float32) * 0.1

    out = cbam_pallas(x, w1, b1, w2, b2, wsp, bsp)
    out = jax.block_until_ready(out)

    ref = cbam_ref(x, w1, b1, w2, b2, wsp, bsp)
    assert out.shape == (B, C, H, W)
    max_err = float(jnp.max(jnp.abs(out - ref)))
    assert jnp.allclose(out, ref, atol=2e-4, rtol=2e-4), f"max err {max_err}"
    print("KERNEL_OK")
</pallas_src>

<mosaic_0001>
module attributes {stable_mosaic.version = 11 : i64} {
  func.func @cbam_kernel(%arg0: i32, %arg1: memref<2x32x256xf32, #tpu.memory_space<vmem>>, %arg2: memref<32x2xf32, #tpu.memory_space<vmem>>, %arg3: memref<1x2xf32, #tpu.memory_space<vmem>>, %arg4: memref<32x2xf32, #tpu.memory_space<vmem>>, %arg5: memref<32x1xf32, #tpu.memory_space<vmem>>, %arg6: memref<2x256x256xf32, #tpu.memory_space<vmem>>, %arg7: memref<1xf32, #tpu.memory_space<smem>>, %arg8: memref<2x32x256xf32, #tpu.memory_space<vmem>>) attributes {dimension_semantics = [#tpu.dimension_semantics<parallel>], iteration_bounds = array<i64: 1>, scalar_prefetch = 0 : i64, scratch_operands = 0 : i64, tpu.core_type = #tpu.core_type<tc>, window_params = [{transform_indices = @transform_0, window_bounds = array<i64: 2, 32, 256>}, {pipeline_mode = #tpu.pipeline_mode<synchronous>, transform_indices = @transform_1, window_bounds = array<i64: 32, 2>}, {pipeline_mode = #tpu.pipeline_mode<synchronous>, transform_indices = @transform_2, window_bounds = array<i64: 1, 2>}, {pipeline_mode = #tpu.pipeline_mode<synchronous>, transform_indices = @transform_3, window_bounds = array<i64: 32, 2>}, {pipeline_mode = #tpu.pipeline_mode<synchronous>, transform_indices = @transform_4, window_bounds = array<i64: 32, 1>}, {pipeline_mode = #tpu.pipeline_mode<synchronous>, transform_indices = @transform_5, window_bounds = array<i64: 2, 256, 256>}, {transform_indices = @transform_6, window_bounds = array<i64: 1>}, {transform_indices = @transform_7, window_bounds = array<i64: 2, 32, 256>}]} {
    %c0 = arith.constant 0 : index
    %c0_0 = arith.constant 0 : index
    %c0_1 = arith.constant 0 : index
    %0 = vector.load %arg1[%c0, %c0_0, %c0_1] : memref<2x32x256xf32, #tpu.memory_space<vmem>>, vector<2x32x256xf32>
    %cst = arith.constant dense<0.000000e+00> : vector<2x32xf32>
    %1 = vector.multi_reduction <add>, %0, %cst [2] : vector<2x32x256xf32> to vector<2x32xf32>
    %2 = vector.shape_cast %1 : vector<2x32xf32> to vector<2x32x1xf32>
    %cst_2 = arith.constant 3.906250e-03 : f32
    %3 = vector.broadcast %cst_2 : f32 to vector<2x32x1xf32>
    %4 = arith.mulf %2, %3 : vector<2x32x1xf32>
    %c0_3 = arith.constant 0 : index
    %c0_4 = arith.constant 0 : index
    %5 = vector.load %arg2[%c0_3, %c0_4] : memref<32x2xf32, #tpu.memory_space<vmem>>, vector<32x2xf32>
    %6 = vector.shape_cast %5 : vector<32x2xf32> to vector<1x32x2xf32>
    %7 = vector.broadcast %4 : vector<2x32x1xf32> to vector<2x32x2xf32>
    %8 = vector.broadcast %6 : vector<1x32x2xf32> to vector<2x32x2xf32>
    %9 = arith.mulf %7, %8 : vector<2x32x2xf32>
    %cst_5 = arith.constant dense<0.000000e+00> : vector<2x2xf32>
    %10 = vector.multi_reduction <add>, %9, %cst_5 [1] : vector<2x32x2xf32> to vector<2x2xf32>
    %11 = vector.shape_cast %10 : vector<2x2xf32> to vector<2x1x2xf32>
    %c0_6 = arith.constant 0 : index
    %c0_7 = arith.constant 0 : index
    %12 = vector.load %arg3[%c0_6, %c0_7] : memref<1x2xf32, #tpu.memory_space<vmem>>, vector<1x2xf32>
    %13 = vector.shape_cast %12 : vector<1x2xf32> to vector<1x1x2xf32>
    %14 = vector.broadcast %13 : vector<1x1x2xf32> to vector<2x1x2xf32>
    %15 = arith.addf %11, %14 : vector<2x1x2xf32>
    %cst_8 = arith.constant 0.000000e+00 : f32
    %16 = vector.broadcast %cst_8 : f32 to vector<2x1x2xf32>
    %17 = arith.maximumf %15, %16 : vector<2x1x2xf32>
    %c0_9 = arith.constant 0 : index
    %c0_10 = arith.constant 0 : index
    %18 = vector.load %arg4[%c0_9, %c0_10] : memref<32x2xf32, #tpu.memory_space<vmem>>, vector<32x2xf32>
    %19 = vector.shape_cast %18 : vector<32x2xf32> to vector<1x32x2xf32>
    %20 = vector.broadcast %17 : vector<2x1x2xf32> to vector<2x32x2xf32>
    %21 = vector.broadcast %19 : vector<1x32x2xf32> to vector<2x32x2xf32>
    %22 = arith.mulf %20, %21 : vector<2x32x2xf32>
    %cst_11 = arith.constant dense<0.000000e+00> : vector<2x32xf32>
    %23 = vector.multi_reduction <add>, %22, %cst_11 [2] : vector<2x32x2xf32> to vector<2x32xf32>
    %24 = vector.shape_cast %23 : vector<2x32xf32> to vector<2x32x1xf32>
    %c0_12 = arith.constant 0 : index
    %c0_13 = arith.constant 0 : index
    %25 = vector.load %arg5[%c0_12, %c0_13] : memref<32x1xf32, #tpu.memory_space<vmem>>, vector<32x1xf32>
    %26 = vector.shape_cast %25 : vector<32x1xf32> to vector<1x32x1xf32>
    %27 = vector.broadcast %26 : vector<1x32x1xf32> to vector<2x32x1xf32>
    %28 = arith.addf %24, %27 : vector<2x32x1xf32>
    %29 = arith.negf %28 : vector<2x32x1xf32>
    %30 = math.exp %29 : vector<2x32x1xf32>
    %cst_14 = arith.constant 1.000000e+00 : f32
    %31 = vector.broadcast %cst_14 : f32 to vector<2x32x1xf32>
    %32 = arith.addf %31, %30 : vector<2x32x1xf32>
    %33 = arith.divf %31, %32 : vector<2x32x1xf32>
    %34 = vector.broadcast %33 : vector<2x32x1xf32> to vector<2x32x256xf32>
    %35 = arith.mulf %0, %34 : vector<2x32x256xf32>
    %cst_15 = arith.constant dense<0.000000e+00> : vector<2x256xf32>
    %36 = vector.multi_reduction <add>, %35, %cst_15 [1] : vector<2x32x256xf32> to vector<2x256xf32>
    %cst_16 = arith.constant 3.200000e+01 : f32
    %37 = vector.broadcast %cst_16 : f32 to vector<2x256xf32>
    %38 = arith.divf %36, %37 : vector<2x256xf32>
    %cst_17 = arith.constant dense<0xFF800000> : vector<2x256xf32>
    %39 = vector.multi_reduction <maximumf>, %35, %cst_17 [1] : vector<2x32x256xf32> to vector<2x256xf32>
    %c0_18 = arith.constant 0 : index
    %c0_19 = arith.constant 0 : index
    %c0_20 = arith.constant 0 : index
    %40 = vector.load %arg6[%c0_18, %c0_19, %c0_20] : memref<2x256x256xf32, #tpu.memory_space<vmem>>, vector<1x256x256xf32>
    %41 = vector.shape_cast %40 : vector<1x256x256xf32> to vector<256x256xf32>
    %cst_21 = arith.constant dense<0.000000e+00> : vector<2x256xf32>
    %42 = tpu.matmul %38, %41, %cst_21 {dimension_numbers = #tpu.dot_dimension_numbers<[1], [0], [0], [1], [0, 0, 1, 1], [], []>, precision = #tpu.contract_precision<fp32>} : vector<2x256xf32>, vector<256x256xf32>, vector<2x256xf32> -> vector<2x256xf32>
    %c1 = arith.constant 1 : index
    %c0_22 = arith.constant 0 : index
    %c0_23 = arith.constant 0 : index
    %43 = vector.load %arg6[%c1, %c0_22, %c0_23] : memref<2x256x256xf32, #tpu.memory_space<vmem>>, vector<1x256x256xf32>
    %44 = vector.shape_cast %43 : vector<1x256x256xf32> to vector<256x256xf32>
    %cst_24 = arith.constant dense<0.000000e+00> : vector<2x256xf32>
    %45 = tpu.matmul %39, %44, %cst_24 {dimension_numbers = #tpu.dot_dimension_numbers<[1], [0], [0], [1], [0, 0, 1, 1], [], []>, precision = #tpu.contract_precision<fp32>} : vector<2x256xf32>, vector<256x256xf32>, vector<2x256xf32> -> vector<2x256xf32>
    %46 = arith.addf %42, %45 : vector<2x256xf32>
    %c0_25 = arith.constant 0 : index
    %47 = memref.load %arg7[%c0_25] : memref<1xf32, #tpu.memory_space<smem>>
    %48 = vector.broadcast %47 : f32 to vector<2x256xf32>
    %49 = arith.addf %46, %48 : vector<2x256xf32>
    %50 = arith.negf %49 : vector<2x256xf32>
    %51 = math.exp %50 : vector<2x256xf32>
    %cst_26 = arith.constant 1.000000e+00 : f32
    %52 = vector.broadcast %cst_26 : f32 to vector<2x256xf32>
    %53 = arith.addf %52, %51 : vector<2x256xf32>
    %54 = arith.divf %52, %53 : vector<2x256xf32>
    %55 = vector.shape_cast %54 : vector<2x256xf32> to vector<2x1x256xf32>
    %56 = vector.broadcast %55 : vector<2x1x256xf32> to vector<2x32x256xf32>
    %57 = arith.mulf %35, %56 : vector<2x32x256xf32>
    %c0_27 = arith.constant 0 : index
    %c0_28 = arith.constant 0 : index
    %c0_29 = arith.constant 0 : index
    %58 = vector.load %arg8[%c0_27, %c0_28, %c0_29] : memref<2x32x256xf32, #tpu.memory_space<vmem>>, vector<2x32x256xf32>
    tpu.vector_store %arg8[%c0_27, %c0_28, %c0_29], %57 {strides = array<i32>} : memref<2x32x256xf32, #tpu.memory_space<vmem>>, vector<2x32x256xf32>,
    return
  }
  func.func @transform_0(%arg0: i32) -> (i32, i32, i32) {
    %c0_i32 = arith.constant 0 : i32
    %c0_i32_0 = arith.constant 0 : i32
    %c0_i32_1 = arith.constant 0 : i32
    return %arg0, %c0_i32, %c0_i32_0 : i32, i32, i32
  }
  func.func @transform_1(%arg0: i32) -> (i32, i32) {
    %c0_i32 = arith.constant 0 : i32
    %c0_i32_0 = arith.constant 0 : i32
    %c0_i32_1 = arith.constant 0 : i32
    return %c0_i32, %c0_i32_0 : i32, i32
  }
  func.func @transform_2(%arg0: i32) -> (i32, i32) {
    %c0_i32 = arith.constant 0 : i32
    %c0_i32_0 = arith.constant 0 : i32
    %c0_i32_1 = arith.constant 0 : i32
    return %c0_i32, %c0_i32_0 : i32, i32
  }
  func.func @transform_3(%arg0: i32) -> (i32, i32) {
    %c0_i32 = arith.constant 0 : i32
    %c0_i32_0 = arith.constant 0 : i32
    %c0_i32_1 = arith.constant 0 : i32
    return %c0_i32, %c0_i32_0 : i32, i32
  }
  func.func @transform_4(%arg0: i32) -> (i32, i32) {
    %c0_i32 = arith.constant 0 : i32
    %c0_i32_0 = arith.constant 0 : i32
    %c0_i32_1 = arith.constant 0 : i32
    return %c0_i32, %c0_i32_0 : i32, i32
  }
  func.func @transform_5(%arg0: i32) -> (i32, i32, i32) {
    %c0_i32 = arith.constant 0 : i32
    %c0_i32_0 = arith.constant 0 : i32
    %c0_i32_1 = arith.constant 0 : i32
    %c0_i32_2 = arith.constant 0 : i32
    return %c0_i32, %c0_i32_0, %c0_i32_1 : i32, i32, i32
  }
  func.func @transform_6(%arg0: i32) -> i32 {
    %c0_i32 = arith.constant 0 : i32
    %c0_i32_0 = arith.constant 0 : i32
    return %c0_i32 : i32
  }
  func.func @transform_7(%arg0: i32) -> (i32, i32, i32) {
    %c0_i32 = arith.constant 0 : i32
    %c0_i32_0 = arith.constant 0 : i32
    %c0_i32_1 = arith.constant 0 : i32
    return %arg0, %c0_i32, %c0_i32_0 : i32, i32, i32
  }
}

</mosaic_0001>

<bundles_post_ra>
// kernel: tpu_custom_call.1
= control target key start
LH: loop header
LB: loop body
LE: loop exit
PB: predicated region body
PF: predicated region fallthrough
CT: control target
= control target key end

     0   :  { %13 = vsyncpa [#allocation4], 0  ;;  %s6424_s0 = inlined_call_operand.hbm [shape: f32[2,32,256], index: 0, kind: input, shape index: {}]   ;;  %s6425_s1 = inlined_call_operand.vmem [shape: f32[32,2], index: 1, kind: input, shape index: {}]   ;;  %s6426_s2 = inlined_call_operand.vmem [shape: f32[1,2], index: 2, kind: input, shape index: {}]   ;;  %s6427_s3 = inlined_call_operand.vmem [shape: f32[32,2], index: 3, kind: input, shape index: {}]   ;;  %s6428_s4 = inlined_call_operand.vmem [shape: f32[32,1], index: 4, kind: input, shape index: {}]   ;;  %s6429_s5 = inlined_call_operand.hbm [shape: f32[2,256,256], index: 5, kind: input, shape index: {}]   ;;  %s6430_s6 = inlined_call_operand.<no memory space> [shape: f32[1], index: 6, kind: input, shape index: {}]   ;;  %s6431_s7 = inlined_call_operand.hbm [shape: f32[2,32,256], index: 7, kind: output, shape index: {}]  }
   0x1   :  { %14 = vsyncpa [#allocation7], 0 }
   0x2   :  { %15 = vsyncpa [#allocation5], 0  ;;  %s4147_s24 = smov [#allocation3]   ;;  %s4075_s28 = scalar_lea.hbm %s6424_s0, 2048 }
   0x3   :  { %s21_s25 = sshll.u32 %s4147_s24, 4  ;;  %p4076_p0 = scmp.ne.s32.totalorder %s6424_s0, %s4075_s28  ;;  %s22_s25 = int_to_ptr.vmem [resolvable:$true] %s21_s25 }
   0x4   :  { %p4079_p1 = scmp.lt.u32.totalorder %s4075_s28, %s6424_s0 }
   0x6   :  { %p4081_p2 = pnand %p4079_p1, %p4076_p0 }
   0x8   :  { %4084 = shalt.err (!%p4081_p2)
}
   0x9   :  { %s4085_s10 = scalar_lea.vmem %s22_s25, 2048  ;;  %p4090_p4 = scmp.lt.s32.totalorder %s22_s25, %s22_s25 }
   0xa   :  { %p4086_p3 = scmp.ne.s32.totalorder %s22_s25, %s4085_s10  ;;  %p4091_p5 = scmp.lt.s32.totalorder %s4085_s10, %s4085_s10 }
   0xc   :  { %p4092_p6 = por %p4091_p5, %p4090_p4 }
   0xe   :  { %p4093_p7 = pnand %p4092_p6, %p4086_p3 }
  0x10   :  { %4096 = shalt.err (!%p4093_p7)
}
  0x11   :  { %s4148_s11 = smov 256   ;;  %s4149_s12 = smov 16  }
  0x12   :  { %27 = dma.hbm_to_vmem [thread:$0]  %s6424_s0, 2048, %s22_s25, [#allocation4], %s4148_s11, %s4148_s11, %s4149_s12  }
  0x13   :  { %s4150_s15 = smov [#allocation6]   ;;  %s4097_s19 = scalar_lea.hbm %s6429_s5, 16384 }
  0x14   :  { %s41_s16 = sshll.u32 %s4150_s15, 4  ;;  %p4098_p8 = scmp.ne.s32.totalorder %s6429_s5, %s4097_s19  ;;  %s42_s16 = int_to_ptr.vmem [resolvable:$true] %s41_s16 }
  0x15   :  { %p4101_p9 = scmp.lt.u32.totalorder %s4097_s19, %s6429_s5 }
  0x17   :  { %p4103_p10 = pnand %p4101_p9, %p4098_p8 }
  0x19   :  { %4106 = shalt.err (!%p4103_p10)
}
  0x1a   :  { %s4107_s24 = scalar_lea.vmem %s42_s16, 16384  ;;  %p4112_p12 = scmp.lt.s32.totalorder %s42_s16, %s42_s16 }
  0x1b   :  { %p4108_p11 = scmp.ne.s32.totalorder %s42_s16, %s4107_s24  ;;  %p4113_p13 = scmp.lt.s32.totalorder %s4107_s24, %s4107_s24 }
  0x1d   :  { %p4114_p0 = por %p4113_p13, %p4112_p12 }
  0x1f   :  { %p4115_p1 = pnand %p4114_p0, %p4108_p11 }
  0x21   :  { %4118 = shalt.err (!%p4115_p1)
}
  0x22   :  { %47 = dma.hbm_to_vmem [thread:$0]  %s6429_s5, 16384, %s42_s16, [#allocation7], %s4148_s11, %s4148_s11, %s4149_s12  }
  0x23   :  { %4141 = dma.done.wait [#allocation4], 2048  }
  0x24   :  { %4142 = vsyncadd [#allocation4], 4294965248 }
  0x25   :  { %4143 = dma.done.wait [#allocation7], 16384  }
  0x26   :  { %4144 = vsyncadd [#allocation7], 4294950912  ;;  %v64_v0 = vld [vmem:[#allocation3 + $0x40] sm:$0xff]  ;;  %v65_v1 = vld [vmem:[#allocation3 + $0x48] sm:$0xff]  ;;  %vm116_vm0 = vcmask 15360   ;;  %vm518_vm1 = vcmask 1041409  }
  0x27   :  { %v56_v2 = vld [vmem:[#allocation3] sm:$0xff]  ;;  %v84_v3 = vadd.f32 %v65_v1, %v64_v0  ;;  %v57_v4 = vld [vmem:[#allocation3 + $0x8] sm:$0xff]  ;;  %v66_v5 = vld [vmem:[#allocation3 + $0x50] sm:$0xff] }
  0x28   :  { %v67_v6 = vld [vmem:[#allocation3 + $0x58] sm:$0xff]  ;;  %v72_v7 = vadd.f32 %v57_v4, %v56_v2  ;;  %v58_v8 = vld [vmem:[#allocation3 + $0x10] sm:$0xff]  ;;  %v68_v12 = vld [vmem:[#allocation3 + $0x60] sm:$0xff] }
  0x29   :  { %v59_v9 = vld [vmem:[#allocation3 + $0x18] sm:$0xff]  ;;  %85 = vadd.xlane.f32.xlu1 %v84_v3  ;;  %v87_v10 = vadd.f32 %v67_v6, %v66_v5  ;;  %v69_v13 = vld [vmem:[#allocation3 + $0x68] sm:$0xff]  ;;  %v60_v14 = vld [vmem:[#allocation3 + $0x20] sm:$0xff] }
  0x2a   :  { %73 = vadd.xlane.f32.xlu0 %v72_v7  ;;  %v75_v11 = vadd.f32 %v59_v9, %v58_v8  ;;  %v61_v15 = vld [vmem:[#allocation3 + $0x28] sm:$0xff]  ;;  %v90_v16 = vadd.f32 %v69_v13, %v68_v12  ;;  %v70_v18 = vld [vmem:[#allocation3 + $0x70] sm:$0xff]  ;;  %v71_v19 = vld [vmem:[#allocation3 + $0x78] sm:$0xff]  ;;  %v152_v8 = vlaneseq }
  0x2b   :  { %v78_v17 = vadd.f32 %v61_v15, %v60_v14  ;;  %v62_v20 = vld [vmem:[#allocation3 + $0x30] sm:$0xff]  ;;  %v63_v21 = vld [vmem:[#allocation3 + $0x38] sm:$0xff]  ;;  %v93_v22 = vadd.f32 %v71_v19, %v70_v18  ;;  %v105_v27 = vld [vmem:[%s6425_s1 + $0x8] sm:$0xff] }
  0x2c   :  { %v81_v23 = vadd.f32 %v63_v21, %v62_v20  ;;  %v104_v31 = vld [vmem:[%s6425_s1] sm:$0xff]  ;;  %v106_v37 = vld [vmem:[%s6425_s1 + $0x10] sm:$0xff]  ;;  %v107_v48 = vld [vmem:[%s6425_s1 + $0x18] sm:$0xff]  ;;  %v4247_v14 = vshrl.u32 %v152_v8, 7 }
  0x2d   :  { %88 = vadd.xlane.f32.xlu1 %v87_v10  ;;  %v143_v13 = vld [vmem:[%s6426_s2] sm:$0x1] }
  0x2e   :  { %76 = vadd.xlane.f32.xlu0 %v75_v11  ;;  %6859 = vst [vmem:[#allocation12_spill] sm:$0xff] %v4247_v14  ;;  %v4250_v19 = vsub.s32 0, %v4247_v14 }
  0x30   :  { %6860 = vst [vmem:[#allocation13_spill] sm:$0xff] %v4250_v19 }
  0x31   :  { %91 = vadd.xlane.f32.xlu1 %v90_v16 }
  0x32   :  { %79 = vadd.xlane.f32.xlu0 %v78_v17 }
  0x35   :  { %94 = vadd.xlane.f32.xlu1 %v93_v22  ;;  %v149_v22 = vld [vmem:[%s6427_s3 + $0x8] sm:$0xff] }
  0x36   :  { %82 = vadd.xlane.f32.xlu0 %v81_v23  ;;  %v148_v23 = vld [vmem:[%s6427_s3] sm:$0xff] }
  0xb6   :  { %v86_v24 = vpop.xlane.xlu1 %85 }
  0xb7   :  { %v74_v25 = vpop.xlane.xlu0 %73  ;;  %v100_v26 = vmul.f32 0.00390625, %v86_v24 }
  0xb8   :  { %v96_v32 = vmul.f32 0.00390625, %v74_v25 }
  0xb9   :  { %v112_v34 = vmul.f32 %v104_v31, %v100_v26 }
  0xba   :  { %v89_v28 = vpop.xlane.xlu1 %88  ;;  %v108_v41 = vmul.f32 %v104_v31, %v96_v32  ;;  %v150_v32 = vld [vmem:[%s6427_s3 + $0x10] sm:$0xff] }
  0xbb   :  { %v101_v29 = vmul.f32 0.00390625, %v89_v28  ;;  %v77_v30 = vpop.xlane.xlu0 %76  ;;  %v130_v43 = vsel %vm116_vm0, %v112_v34, 0.0 }
  0xbc   :  { %v97_v33 = vmul.f32 0.00390625, %v77_v30  ;;  %v117_v53 = vsel %vm116_vm0, %v108_v41, 0.0 }
  0xbd   :  { %v113_v35 = vmul.f32 %v105_v27, %v101_v29 }
  0xbe   :  { %v109_v36 = vmul.f32 %v105_v27, %v97_v33  ;;  %v92_v38 = vpop.xlane.xlu1 %91 }
  0xbf   :  { %v102_v39 = vmul.f32 0.00390625, %v92_v38  ;;  %v80_v40 = vpop.xlane.xlu0 %79  ;;  %v131_v44 = vsel %vm116_vm0, %v113_v35, 0.0 }
  0xc0   :  { %v98_v42 = vmul.f32 0.00390625, %v80_v40  ;;  %v118_v46 = vsel %vm116_vm0, %v109_v36, 0.0  ;;  %v132_v54 = vadd.f32 %v131_v44, %v130_v43  ;;  %v4151_v44 = vmov 0  }
  0xc1   :  { %v114_v45 = vmul.f32 %v106_v37, %v102_v39  ;;  %v119_v57 = vadd.f32 %v118_v46, %v117_v53  ;;  %4018 = vset.pattern.permute.xlu1 %v4151_v44  ;;  %4017 = vset.pattern.permute.xlu0 %v4151_v44  ;;  %v453_v46 = vld [vmem:[#allocation6 + $0x218] sm:$0xff] }
  0xc2   :  { %v110_v47 = vmul.f32 %v106_v37, %v98_v42  ;;  %v95_v49 = vpop.xlane.xlu1 %94  ;;  %v151_v37 = vld [vmem:[%s6427_s3 + $0x18] sm:$0xff] }
  0xc3   :  { %v133_v50 = vsel %vm116_vm0, %v114_v45, 0.0  ;;  %v103_v51 = vmul.f32 0.00390625, %v95_v49  ;;  %v83_v52 = vpop.xlane.xlu0 %82  ;;  %v451_v45 = vld [vmem:[#allocation6 + $0x208] sm:$0xff]  ;;  %v527_v49 = vand.u32 4294901760, %v453_v46  ;;  %v388_v53 = vld [vmem:[#allocation6 + $0x18] sm:$0xff] }
  0xc4   :  { %v120_v55 = vsel %vm116_vm0, %v110_v47, 0.0  ;;  %v99_v56 = vmul.f32 0.00390625, %v83_v52  ;;  %v134_v59 = vadd.f32 %v133_v50, %v132_v54  ;;  %v450_v47 = vld [vmem:[#allocation6 + $0x200] sm:$0xff]  ;;  %v452_v50 = vld [vmem:[#allocation6 + $0x210] sm:$0xff]  ;;  %v386_v52 = vld [vmem:[#allocation6 + $0x8] sm:$0xff] }
  0xc5   :  { %v115_v58 = vmul.f32 %v107_v48, %v103_v51  ;;  %v121_v61 = vadd.f32 %v120_v55, %v119_v57  ;;  %v525_v51 = vand.u32 4294901760, %v450_v47  ;;  %v529_v54 = vand.u32 4294901760, %v452_v50  ;;  %v385_v57 = vld [vmem:[#allocation6] sm:$0xff] }
  0xc6   :  { %v111_v60 = vmul.f32 %v107_v48, %v99_v56  ;;  %v523_v48 = vand.u32 4294901760, %v451_v45  ;;  %v1815_v55 = vand.u32 4294901760, %v386_v52  ;;  %v1819_v56 = vand.u32 4294901760, %v388_v53 }
  0xc7   :  { %v135_v62 = vsel %vm116_vm0, %v115_v58, 0.0  ;;  %v387_v58 = vld [vmem:[#allocation6 + $0x10] sm:$0xff] }
  0xc8   :  { %v136_v63 = vadd.f32 %v135_v62, %v134_v59  ;;  %v122_v0 = vsel %vm116_vm0, %v111_v60, 0.0  ;;  %v455_v59 = vld [vmem:[#allocation6 + $0x228] sm:$0xff]  ;;  %v4274_v60 = vpack.c.bf16 %v527_v49, %v523_v48  ;;  %v4278_v62 = vsub.f32 %v453_v46, %v527_v49  ;;  %v396_v46 = vld [vmem:[#allocation6 + $0x58] sm:$0xff] }
  0xc9   :  { %v123_v1 = vadd.f32 %v122_v0, %v121_v61  ;;  %v4276_v61 = vsub.f32 %v451_v45, %v523_v48  ;;  %v457_v0 = vld [vmem:[#allocation6 + $0x238] sm:$0xff]  ;;  %v4291_v8 = vsub.f32 %v388_v53, %v1819_v56  ;;  %v395_v48 = vld [vmem:[#allocation6 + $0x50] sm:$0xff]  ;;  %v463_v53 = vld [vmem:[#allocation6 + $0x268] sm:$0xff] }
  0xca   :  { %v137_v2 = vrot.slane %v136_v63, 4  ;;  %6861 = vst [vmem:[#allocation14_spill] sm:$0xff] %v4274_v60  ;;  %6863 = vst [vmem:[#allocation16_spill] sm:$0xff] %v4278_v62  ;;  %3221 = vmatprep.subr.bf16.mxu1 %v4274_v60 }
  0xcb   :  { %v124_v3 = vrot.slane %v123_v1, 4  ;;  %6862 = vst [vmem:[#allocation15_spill] sm:$0xff] %v4276_v61  ;;  %6869 = vst [vmem:[#allocation22_spill] sm:$0xff] %v4291_v8 }
  0xcc   :  { %v138_v4 = vadd.f32 %v137_v2, %v136_v63  ;;  %v4280_v63 = vsub.f32 %v450_v47, %v525_v51  ;;  %v456_v2 = vld [vmem:[#allocation6 + $0x230] sm:$0xff]  ;;  %v393_v47 = vld [vmem:[#allocation6 + $0x40] sm:$0xff] }
  0xcd   :  { %v125_v5 = vadd.f32 %v124_v3, %v123_v1  ;;  %v454_v1 = vld [vmem:[#allocation6 + $0x220] sm:$0xff]  ;;  %v4282_v3 = vpack.c.bf16 %v529_v54, %v525_v51 }
  0xce   :  { %v139_v6 = vrot.slane %v138_v4, 2  ;;  %6864 = vst [vmem:[#allocation17_spill] sm:$0xff] %v4280_v63 }
  0xcf   :  { %v126_v7 = vrot.slane %v125_v5, 2  ;;  %6865 = vst [vmem:[#allocation18_spill] sm:$0xff] %v4282_v3  ;;  %3223 = vmatpush1.bf16.msra.mxu1 %v4282_v3 }
  0xd0   :  { %v140_v9 = vadd.f32 %v139_v6, %v138_v4  ;;  %v4284_v4 = vsub.f32 %v452_v50, %v529_v54  ;;  %v4288_v6 = vsub.f32 %v386_v52, %v1815_v55  ;;  %v465_v54 = vld [vmem:[#allocation6 + $0x278] sm:$0xff] }
  0xd1   :  { %v127_v10 = vadd.f32 %v126_v7, %v125_v5  ;;  %v4286_v5 = vpack.c.bf16 %v1819_v56, %v1815_v55  ;;  %v390_v7 = vld [vmem:[#allocation6 + $0x28] sm:$0xff] }
  0xd2   :  { %v141_v11 = vrot.slane %v140_v9, 1  ;;  %6866 = vst [vmem:[#allocation19_spill] sm:$0xff] %v4284_v4  ;;  %6868 = vst [vmem:[#allocation21_spill] sm:$0xff] %v4288_v6 }
  0xd3   :  { %v128_v12 = vrot.slane %v127_v10, 1  ;;  %6867 = vst [vmem:[#allocation20_spill] sm:$0xff] %v4286_v5  ;;  %3605 = vmatprep.subr.bf16.mxu0 %v4286_v5  ;;  %v405_v5 = vld [vmem:[#allocation6 + $0xa0] sm:$0xff] }
  0xd4   :  { %v142_v15 = vadd.f32 %v141_v11, %v140_v9  ;;  %v1817_v9 = vand.u32 4294901760, %v385_v57  ;;  %v531_v11 = vand.u32 4294901760, %v455_v59 }
  0xd5   :  { %v129_v16 = vadd.f32 %v128_v12, %v127_v10  ;;  %v1821_v10 = vand.u32 4294901760, %v387_v58  ;;  %v392_v12 = vld [vmem:[#allocation6 + $0x38] sm:$0xff] }
  0xd6   :  { %v145_v17 = vadd.f32 %v143_v13, %v142_v15  ;;  %v533_v15 = vand.u32 4294901760, %v454_v1 }
  0xd7   :  { %v144_v18 = vadd.f32 %v143_v13, %v129_v16  ;;  %v535_v13 = vand.u32 4294901760, %v457_v0  ;;  %v537_v16 = vand.u32 4294901760, %v456_v2 }
  0xd8   :  { %v147_v20 = vmax.f32 %v145_v17, 0.0  ;;  %v1823_v17 = vand.u32 4294901760, %v390_v7 }
  0xd9   :  { %v146_v21 = vmax.f32 %v144_v18, 0.0  ;;  %v389_v18 = vld [vmem:[#allocation6 + $0x20] sm:$0xff] }
  0xda   :  { %v159_v25 = vrot.slane %v147_v20, %v4250_v19  ;;  %v391_v20 = vld [vmem:[#allocation6 + $0x30] sm:$0xff] }
  0xdb   :  { %v155_v24 = vrot.slane %v146_v21, %v4250_v19  ;;  %v4295_v21 = vpack.c.bf16 %v1821_v10, %v1817_v9 }
  0xdc   :  { %v165_v30 = vmul.f32 %v159_v25, %v149_v22  ;;  %v164_v31 = vmul.f32 %v159_v25, %v148_v23  ;;  %v166_v35 = vmul.f32 %v159_v25, %v150_v32  ;;  %v167_v40 = vmul.f32 %v159_v25, %v151_v37  ;;  %v459_v25 = vld [vmem:[#allocation6 + $0x248] sm:$0xff] }
  0xdd   :  { %v161_v26 = vmul.f32 %v155_v24, %v149_v22  ;;  %v160_v27 = vmul.f32 %v155_v24, %v148_v23  ;;  %v162_v36 = vmul.f32 %v155_v24, %v150_v32  ;;  %v163_v41 = vmul.f32 %v155_v24, %v151_v37  ;;  %6870 = vst [vmem:[#allocation23_spill] sm:$0xff] %v4295_v21  ;;  %v460_v32 = vld [vmem:[#allocation6 + $0x250] sm:$0xff] }
  0xde   :  { %v183_v33 = vsel %vm116_vm0, %v165_v30, 0.0  ;;  %v180_v34 = vsel %vm116_vm0, %v164_v31, 0.0  ;;  %v186_v38 = vsel %vm116_vm0, %v166_v35, 0.0  ;;  %v189_v42 = vsel %vm116_vm0, %v167_v40, 0.0  ;;  %3607 = vmatpush1.bf16.msra.mxu0 %v4295_v21  ;;  %v406_v21 = vld [vmem:[#allocation6 + $0xa8] sm:$0xff] }
  0xdf   :  { %v171_v28 = vsel %vm116_vm0, %v161_v26, 0.0  ;;  %v168_v29 = vsel %vm116_vm0, %v160_v27, 0.0  ;;  %v174_v39 = vsel %vm116_vm0, %v162_v36, 0.0  ;;  %v177_v43 = vsel %vm116_vm0, %v163_v41, 0.0  ;;  %v461_v26 = vld [vmem:[#allocation6 + $0x258] sm:$0xff]  ;;  %v458_v27 = vld [vmem:[#allocation6 + $0x240] sm:$0xff] }
  0xe0   :  { %172 = vadd.xlane.f32.xlu1 %v171_v28  ;;  %169 = vadd.xlane.f32.xlu0 %v168_v29  ;;  %v4297_v22 = vsub.f32 %v385_v57, %v1817_v9  ;;  %v4299_v23 = vsub.f32 %v387_v58, %v1821_v10  ;;  %v4301_v24 = vsub.f32 %v455_v59, %v531_v11  ;;  %v1825_v36 = vand.u32 4294901760, %v389_v18  ;;  %v394_v41 = vld [vmem:[#allocation6 + $0x48] sm:$0xff] }
  0xe1   :  { %v4303_v28 = vpack.c.bf16 %v535_v13, %v531_v11  ;;  %v4305_v29 = vsub.f32 %v457_v0, %v535_v13  ;;  %v4307_v30 = vpack.c.bf16 %v537_v16, %v533_v15  ;;  %v4309_v31 = vsub.f32 %v454_v1, %v533_v15 }
  0xe2   :  { %6871 = vst [vmem:[#allocation24_spill] sm:$0xff] %v4297_v22  ;;  %6872 = vst [vmem:[#allocation25_spill] sm:$0xff] %v4299_v23  ;;  %v4314_v35 = vsub.f32 %v390_v7, %v1823_v17  ;;  %v1829_v37 = vand.u32 4294901760, %v391_v20  ;;  %v541_v40 = vand.u32 4294901760, %v458_v27  ;;  %v4322_v44 = vsub.f32 %v389_v18, %v1825_v36 }
  0xe3   :  { %6873 = vst [vmem:[#allocation26_spill] sm:$0xff] %v4301_v24  ;;  %6874 = vst [vmem:[#allocation27_spill] sm:$0xff] %v4303_v28  ;;  %3225 = vmatprep.subr.bf16.mxu1 %v4303_v28  ;;  %v545_v45 = vand.u32 4294901760, %v460_v32  ;;  %v1831_v59 = vand.u32 4294901760, %v394_v41  ;;  %v1835_v0 = vand.u32 4294901760, %v396_v46  ;;  %v1833_v1 = vand.u32 4294901760, %v393_v47 }
  0xe4   :  { %184 = vadd.xlane.f32.xlu1 %v183_v33  ;;  %181 = vadd.xlane.f32.xlu0 %v180_v34  ;;  %6875 = vst [vmem:[#allocation28_spill] sm:$0xff] %v4305_v29  ;;  %6876 = vst [vmem:[#allocation29_spill] sm:$0xff] %v4307_v30  ;;  %v4312_v33 = vsub.f32 %v456_v2, %v537_v16  ;;  %v1827_v34 = vand.u32 4294901760, %v392_v12  ;;  %v4324_v49 = vpack.c.bf16 %v1829_v37, %v1825_v36  ;;  %v408_v28 = vld [vmem:[#allocation6 + $0xb8] sm:$0xff]  ;;  %v4725_v29 = vld [vmem:[#allocation6 + $0x190] sm:$0xff] }
  0xe5   :  { %6877 = vst [vmem:[#allocation30_spill] sm:$0xff] %v4309_v31  ;;  %6879 = vst [vmem:[#allocation32_spill] sm:$0xff] %v4314_v35  ;;  %3227 = vmatpush1.bf16.msra.mxu1 %v4307_v30  ;;  %v4326_v50 = vsub.f32 %v391_v20, %v1829_v37  ;;  %v4335_v56 = vpack.c.bf16 %v545_v45, %v541_v40  ;;  %v4337_v57 = vsub.f32 %v458_v27, %v541_v40  ;;  %v433_v31 = vld [vmem:[#allocation6 + $0x180] sm:$0xff] }
  0xe6   :  { %6878 = vst [vmem:[#allocation31_spill] sm:$0xff] %v4312_v33  ;;  %6882 = vst [vmem:[#allocation35_spill] sm:$0xff] %v4322_v44  ;;  %v4339_v58 = vsub.f32 %v460_v32, %v545_v45  ;;  %v1837_v2 = vand.u32 4294901760, %v395_v48  ;;  %v547_v7 = vand.u32 4294901760, %v463_v53  ;;  %v551_v9 = vand.u32 4294901760, %v465_v54  ;;  %v436_v33 = vld [vmem:[#allocation6 + $0x198] sm:$0xff] }
  0xe7   :  { %6883 = vst [vmem:[#allocation36_spill] sm:$0xff] %v4324_v49  ;;  %6884 = vst [vmem:[#allocation37_spill] sm:$0xff] %v4326_v50  ;;  %v4344_v10 = vpack.c.bf16 %v1835_v0, %v1831_v59  ;;  %v4346_v11 = vsub.f32 %v394_v41, %v1831_v59  ;;  %v4352_v15 = vsub.f32 %v393_v47, %v1833_v1 }
  0xe8   :  { %187 = vadd.xlane.f32.xlu1 %v186_v38  ;;  %175 = vadd.xlane.f32.xlu0 %v174_v39  ;;  %v539_v38 = vand.u32 4294901760, %v459_v25  ;;  %v543_v39 = vand.u32 4294901760, %v461_v26  ;;  %6888 = vst [vmem:[#allocation41_spill] sm:$0xff] %v4335_v56  ;;  %6889 = vst [vmem:[#allocation42_spill] sm:$0xff] %v4337_v57  ;;  %v4350_v13 = vpack.c.bf16 %v1837_v2, %v1833_v1  ;;  %v195_v1 = vld [vmem:[%s6428_s4 + $0x18] sm:$0xff] }
  0xe9   :  { %6890 = vst [vmem:[#allocation43_spill] sm:$0xff] %v4339_v58  ;;  %6891 = vst [vmem:[#allocation44_spill] sm:$0xff] %v4344_v10  ;;  %v4354_v16 = vsub.f32 %v395_v48, %v1837_v2  ;;  %v4358_v18 = vsub.f32 %v463_v53, %v547_v7  ;;  %v4361_v20 = vsub.f32 %v465_v54, %v551_v9 }
  0xea   :  { %v4328_v51 = vpack.c.bf16 %v543_v39, %v539_v38  ;;  %v4330_v52 = vsub.f32 %v459_v25, %v539_v38  ;;  %v4333_v55 = vsub.f32 %v461_v26, %v543_v39  ;;  %6892 = vst [vmem:[#allocation45_spill] sm:$0xff] %v4346_v11  ;;  %6894 = vst [vmem:[#allocation47_spill] sm:$0xff] %v4350_v13  ;;  %v193_v25 = vld [vmem:[%s6428_s4 + $0x8] sm:$0xff]  ;;  %v192_v26 = vld [vmem:[%s6428_s4] sm:$0xff] }
  0xeb   :  { %6895 = vst [vmem:[#allocation48_spill] sm:$0xff] %v4352_v15  ;;  %6896 = vst [vmem:[#allocation49_spill] sm:$0xff] %v4354_v16  ;;  %v4665_v15 = vld [vmem:[#allocation6 + $0x398] sm:$0xff] }
  0xec   :  { %190 = vadd.xlane.f32.xlu1 %v189_v42  ;;  %178 = vadd.xlane.f32.xlu0 %v177_v43  ;;  %v4318_v42 = vpack.c.bf16 %v1827_v34, %v1823_v17  ;;  %v4320_v43 = vsub.f32 %v392_v12, %v1827_v34  ;;  %6885 = vst [vmem:[#allocation38_spill] sm:$0xff] %v4328_v51  ;;  %6886 = vst [vmem:[#allocation39_spill] sm:$0xff] %v4330_v52  ;;  %v623_v57 = vand.u32 4294901760, %v4665_v15 }
  0xed   :  { %6887 = vst [vmem:[#allocation40_spill] sm:$0xff] %v4333_v55  ;;  %3229 = vmatprep.subr.bf16.mxu1 %v4328_v51  ;;  %v4348_v12 = vsub.f32 %v396_v46, %v1835_v0  ;;  %v4356_v17 = vpack.c.bf16 %v551_v9, %v547_v7  ;;  %6898 = vst [vmem:[#allocation51_spill] sm:$0xff] %v4358_v18  ;;  %v194_v46 = vld [vmem:[%s6428_s4 + $0x10] sm:$0xff]  ;;  %v4703_v55 = vld [vmem:[#allocation6 + $0x188] sm:$0xff] }
  0xee   :  { %6880 = vst [vmem:[#allocation33_spill] sm:$0xff] %v4318_v42  ;;  %6881 = vst [vmem:[#allocation34_spill] sm:$0xff] %v4320_v43  ;;  %3609 = vmatprep.subr.bf16.mxu0 %v4318_v42  ;;  %3231 = vmatpush1.bf16.msra.mxu1 %v4335_v56 }
  0xef   :  { %3611 = vmatpush1.bf16.msra.mxu0 %v4324_v49  ;;  %6893 = vst [vmem:[#allocation46_spill] sm:$0xff] %v4348_v12  ;;  %6897 = vst [vmem:[#allocation50_spill] sm:$0xff] %v4356_v17  ;;  %3233 = vmatprep.subr.bf16.mxu1 %v4356_v17  ;;  %v402_v17 = vld [vmem:[#allocation6 + $0x88] sm:$0xff] }
  0xf0   :  { %3613 = vmatprep.subr.bf16.mxu0 %v4344_v10  ;;  %6899 = vst [vmem:[#allocation52_spill] sm:$0xff] %v4361_v20  ;;  %v404_v10 = vld [vmem:[#allocation6 + $0x98] sm:$0xff]  ;;  %v4649_v20 = vld [vmem:[#allocation6 + $0x160] sm:$0xff] }
  0xf3   :  { %3615 = vmatpush1.bf16.msra.mxu0 %v4350_v13  ;;  %v468_v13 = vld [vmem:[#allocation6 + $0x290] sm:$0xff] }
 0x16d   :  { %v173_v27 = vpop.xlane.xlu1 %172  ;;  %v170_v32 = vpop.xlane.xlu0 %169 }
 0x16e   :  { %v197_v34 = vadd.f32 %v193_v25, %v173_v27  ;;  %v196_v36 = vadd.f32 %v192_v26, %v170_v32 }
 0x170   :  { %v3211_v37 = vmul.f32 -1.442695, %v197_v34  ;;  %v3210_v38 = vmul.f32 -1.442695, %v196_v36 }
 0x171   :  { %v185_v39 = vpop.xlane.xlu1 %184  ;;  %v182_v40 = vpop.xlane.xlu0 %181 }
 0x172   :  { %4019 = vpow2.f32 %v3211_v37  ;;  %v201_v41 = vadd.f32 %v193_v25, %v185_v39  ;;  %v200_v45 = vadd.f32 %v192_v26, %v182_v40 }
 0x173   :  { %4021 = vpow2.f32 %v3210_v38 }
 0x174   :  { %v3215_v47 = vmul.f32 -1.442695, %v201_v41  ;;  %v3214_v48 = vmul.f32 -1.442695, %v200_v45 }
 0x175   :  { %v188_v53 = vpop.xlane.xlu1 %187  ;;  %v176_v54 = vpop.xlane.xlu0 %175 }
 0x176   :  { %4023 = vpow2.f32 %v3215_v47  ;;  %v202_v59 = vadd.f32 %v194_v46, %v188_v53  ;;  %v198_v0 = vadd.f32 %v194_v46, %v176_v54 }
 0x177   :  { %4025 = vpow2.f32 %v3214_v48 }
 0x178   :  { %v3216_v2 = vmul.f32 -1.442695, %v202_v59  ;;  %v3212_v7 = vmul.f32 -1.442695, %v198_v0  ;;  %v462_v0 = vld [vmem:[#allocation6 + $0x260] sm:$0xff] }
 0x179   :  { %v191_v9 = vpop.xlane.xlu1 %190  ;;  %v179_v25 = vpop.xlane.xlu0 %178 }
 0x17a   :  { %4027 = vpow2.f32 %v3216_v2  ;;  %v203_v26 = vadd.f32 %v195_v1, %v191_v9  ;;  %v199_v27 = vadd.f32 %v195_v1, %v179_v25  ;;  %v464_v1 = vld [vmem:[#allocation6 + $0x270] sm:$0xff]  ;;  %v549_v9 = vand.u32 4294901760, %v462_v0 }
 0x17b   :  { %4029 = vpow2.f32 %v3212_v7  ;;  %v553_v25 = vand.u32 4294901760, %v464_v1 }
 0x17c   :  { %v4020_v32 = vpop.eup %4019  ;;  %v3217_v34 = vmul.f32 -1.442695, %v203_v26  ;;  %v3213_v38 = vmul.f32 -1.442695, %v199_v27  ;;  %v398_v26 = vld [vmem:[#allocation6 + $0x68] sm:$0xff]  ;;  %v400_v27 = vld [vmem:[#allocation6 + $0x78] sm:$0xff] }
 0x17d   :  { %v4022_v36 = vpop.eup %4021  ;;  %v229_v37 = vadd.f32 1.0, %v4020_v32  ;;  %v4384_v14 = vsub.f32 %v464_v1, %v553_v25  ;;  %v403_v1 = vld [vmem:[#allocation6 + $0x90] sm:$0xff] }
 0x17e   :  { %v228_v39 = vadd.f32 1.0, %v4022_v36  ;;  %4031 = vpow2.f32 %v3217_v34  ;;  %v1839_v34 = vand.u32 4294901760, %v398_v26  ;;  %v1843_v36 = vand.u32 4294901760, %v400_v27 }
 0x17f   :  { %4033 = vrcp.f32 %v229_v37  ;;  %v397_v37 = vld [vmem:[#allocation6 + $0x60] sm:$0xff]  ;;  %6903 = vst [vmem:[#allocation56_spill] sm:$0xff] %v4384_v14 }
 0x180   :  { %v4024_v40 = vpop.eup %4023  ;;  %4035 = vrcp.f32 %v228_v39 }
 0x181   :  { %v4026_v41 = vpop.eup %4025  ;;  %4037 = vpow2.f32 %v3213_v38  ;;  %v233_v47 = vadd.f32 1.0, %v4024_v40  ;;  %v399_v38 = vld [vmem:[#allocation6 + $0x70] sm:$0xff]  ;;  %v4377_v40 = vpack.c.bf16 %v553_v25, %v549_v9 }
 0x182   :  { %v232_v45 = vadd.f32 1.0, %v4026_v41  ;;  %v1841_v41 = vand.u32 4294901760, %v397_v37 }
 0x183   :  { %6900 = vst [vmem:[#allocation53_spill] sm:$0xff] %v4377_v40  ;;  %3235 = vmatpush1.bf16.msra.mxu1 %v4377_v40 }
 0x184   :  { %v4028_v46 = vpop.eup %4027  ;;  %4039 = vrcp.f32 %v232_v45  ;;  %v1845_v45 = vand.u32 4294901760, %v399_v38  ;;  %v4393_v49 = vsub.f32 %v397_v37, %v1841_v41  ;;  %v1851_v37 = vand.u32 4294901760, %v404_v10 }
 0x185   :  { %v4030_v48 = vpop.eup %4029  ;;  %v234_v53 = vadd.f32 1.0, %v4028_v46  ;;  %4041 = vrcp.f32 %v233_v47  ;;  %v467_v46 = vld [vmem:[#allocation6 + $0x288] sm:$0xff]  ;;  %v469_v47 = vld [vmem:[#allocation6 + $0x298] sm:$0xff] }
 0x186   :  { %v230_v54 = vadd.f32 1.0, %v4030_v48  ;;  %v559_v19 = vand.u32 4294901760, %v469_v47  ;;  %6907 = vst [vmem:[#allocation60_spill] sm:$0xff] %v4393_v49  ;;  %v4395_v40 = vsub.f32 %v399_v38, %v1845_v45  ;;  %v4614_v49 = vld [vmem:[#allocation6 + $0x378] sm:$0xff] }
 0x187   :  { %4043 = vrcp.f32 %v234_v53  ;;  %v4379_v53 = vpack.c.bf16 %v1843_v36, %v1839_v34 }
 0x188   :  { %v4032_v59 = vpop.eup %4031  ;;  %4045 = vrcp.f32 %v230_v54  ;;  %v466_v54 = vld [vmem:[#allocation6 + $0x280] sm:$0xff]  ;;  %6908 = vst [vmem:[#allocation61_spill] sm:$0xff] %v4395_v40  ;;  %v4612_v40 = vld [vmem:[#allocation6 + $0x368] sm:$0xff] }
 0x189   :  { %v4034_v2 = vpop.eup %4033  ;;  %v235_v7 = vadd.f32 1.0, %v4032_v59  ;;  %6901 = vst [vmem:[#allocation54_spill] sm:$0xff] %v4379_v53  ;;  %v555_v59 = vand.u32 4294901760, %v467_v46  ;;  %3617 = vmatprep.subr.bf16.mxu0 %v4379_v53  ;;  %v1847_v53 = vand.u32 4294901760, %v402_v17  ;;  %v6993_v58 = vand.u32 4294901760, %v4612_v40 }
 0x18a   :  { %v4036_v32 = vpop.eup %4035  ;;  %259 = vperm.xlu1 %4018, %v4034_v2   ;;  %v4382_v2 = vsub.f32 %v462_v0, %v549_v9  ;;  %v401_v0 = vld [vmem:[#allocation6 + $0x80] sm:$0xff] }
 0x18b   :  { %v4038_v39 = vpop.eup %4037  ;;  %4047 = vrcp.f32 %v235_v7  ;;  %254 = vperm.xlu0 %4017, %v4036_v32   ;;  %v4386_v7 = vsub.f32 %v398_v26, %v1839_v34  ;;  %v4388_v32 = vsub.f32 %v400_v27, %v1843_v36  ;;  %v4397_v9 = vpack.c.bf16 %v559_v19, %v555_v59  ;;  %v471_v34 = vld [vmem:[#allocation6 + $0x2a8] sm:$0xff]  ;;  %v473_v36 = vld [vmem:[#allocation6 + $0x2b8] sm:$0xff] }
 0x18c   :  { %v231_v48 = vadd.f32 1.0, %v4038_v39  ;;  %6902 = vst [vmem:[#allocation55_spill] sm:$0xff] %v4382_v2  ;;  %v4391_v39 = vpack.c.bf16 %v1845_v45, %v1841_v41  ;;  %v4399_v25 = vsub.f32 %v467_v46, %v555_v59  ;;  %v4401_v26 = vsub.f32 %v469_v47, %v559_v19  ;;  %v470_v46 = vld [vmem:[#allocation6 + $0x2a0] sm:$0xff]  ;;  %v472_v59 = vld [vmem:[#allocation6 + $0x2b0] sm:$0xff]  ;;  %v4647_v2 = vld [vmem:[#allocation6 + $0x178] sm:$0xff] }
 0x18d   :  { %6904 = vst [vmem:[#allocation57_spill] sm:$0xff] %v4386_v7  ;;  %6905 = vst [vmem:[#allocation58_spill] sm:$0xff] %v4388_v32  ;;  %v557_v27 = vand.u32 4294901760, %v466_v54  ;;  %v1849_v41 = vand.u32 4294901760, %v401_v0  ;;  %3237 = vmatprep.subr.bf16.mxu1 %v4397_v9  ;;  %v563_v45 = vand.u32 4294901760, %v471_v34  ;;  %v567_v51 = vand.u32 4294901760, %v473_v36 }
 0x18e   :  { %v4040_v56 = vpop.eup %4039  ;;  %4049 = vrcp.f32 %v231_v48  ;;  %6906 = vst [vmem:[#allocation59_spill] sm:$0xff] %v4391_v39  ;;  %6909 = vst [vmem:[#allocation62_spill] sm:$0xff] %v4397_v9  ;;  %3619 = vmatpush1.bf16.msra.mxu0 %v4391_v39  ;;  %v561_v48 = vand.u32 4294901760, %v468_v13  ;;  %v4411_v30 = vpack.c.bf16 %v1851_v37, %v1847_v53  ;;  %v4413_v39 = vsub.f32 %v402_v17, %v1847_v53  ;;  %v4629_v32 = vld [vmem:[#allocation6 + $0x370] sm:$0xff]  ;;  %v4631_v7 = vld [vmem:[#allocation6 + $0x168] sm:$0xff] }
 0x18f   :  { %274 = vperm.xlu1 %4018, %v4040_v56   ;;  %6910 = vst [vmem:[#allocation63_spill] sm:$0xff] %v4399_v25  ;;  %6911 = vst [vmem:[#allocation64_spill] sm:$0xff] %v4401_v26  ;;  %v4405_v38 = vsub.f32 %v466_v54, %v557_v27  ;;  %v1853_v56 = vand.u32 4294901760, %v403_v1  ;;  %v4042_v19 = vpop.eup %4041  ;;  %v4415_v54 = vsub.f32 %v404_v10, %v1851_v37  ;;  %v565_v37 = vand.u32 4294901760, %v470_v46 }
 0x190   :  { %v4407_v47 = vpack.c.bf16 %v561_v48, %v557_v27  ;;  %v4409_v42 = vsub.f32 %v468_v13, %v561_v48  ;;  %6915 = vst [vmem:[#allocation68_spill] sm:$0xff] %v4411_v30  ;;  %6916 = vst [vmem:[#allocation69_spill] sm:$0xff] %v4413_v39  ;;  %v4419_v60 = vsub.f32 %v401_v0, %v1849_v41  ;;  %v407_v27 = vld [vmem:[#allocation6 + $0xb0] sm:$0xff]  ;;  %v475_v13 = vld [vmem:[#allocation6 + $0x2c8] sm:$0xff]  ;;  %3621 = vmatprep.subr.bf16.mxu0 %v4411_v30 }
 0x191   :  { %6912 = vst [vmem:[#allocation65_spill] sm:$0xff] %v4405_v38  ;;  %v4044_v9 = vpop.eup %4043  ;;  %6917 = vst [vmem:[#allocation70_spill] sm:$0xff] %v4415_v54  ;;  %v4417_v3 = vpack.c.bf16 %v1853_v56, %v1849_v41  ;;  %v4421_v38 = vsub.f32 %v403_v1, %v1853_v56  ;;  %v477_v48 = vld [vmem:[#allocation6 + $0x2d8] sm:$0xff]  ;;  %v4425_v17 = vpack.c.bf16 %v567_v51, %v563_v45  ;;  %v569_v0 = vand.u32 4294901760, %v472_v59  ;;  %v409_v39 = vld [vmem:[#allocation6 + $0xc0] sm:$0xff] }
 0x192   :  { %6913 = vst [vmem:[#allocation66_spill] sm:$0xff] %v4407_v47  ;;  %6914 = vst [vmem:[#allocation67_spill] sm:$0xff] %v4409_v42  ;;  %v4046_v42 = vpop.eup %4045  ;;  %3239 = vmatpush1.bf16.msra.mxu1 %v4407_v47  ;;  %v4427_v53 = vsub.f32 %v471_v34, %v563_v45  ;;  %v4429_v10 = vsub.f32 %v473_v36, %v567_v51  ;;  %v1855_v1 = vand.u32 4294901760, %v406_v21  ;;  %v1859_v41 = vand.u32 4294901760, %v408_v28  ;;  %v474_v34 = vld [vmem:[#allocation6 + $0x2c0] sm:$0xff]  ;;  %v476_v45 = vld [vmem:[#allocation6 + $0x2d0] sm:$0xff] }
 0x193   :  { %279 = vperm.xlu1 %4018, %v4042_v19   ;;  %6918 = vst [vmem:[#allocation71_spill] sm:$0xff] %v4417_v3  ;;  %6919 = vst [vmem:[#allocation72_spill] sm:$0xff] %v4419_v60  ;;  %3623 = vmatpush1.bf16.msra.mxu0 %v4417_v3  ;;  %v1857_v56 = vand.u32 4294901760, %v405_v5  ;;  %v4435_v47 = vsub.f32 %v470_v46, %v565_v37  ;;  %v1861_v30 = vand.u32 4294901760, %v407_v27  ;;  %v575_v60 = vand.u32 4294901760, %v477_v48  ;;  %v412_v54 = vld [vmem:[#allocation6 + $0xd8] sm:$0xff] }
 0x194   :  { %6920 = vst [vmem:[#allocation73_spill] sm:$0xff] %v4421_v38  ;;  %6921 = vst [vmem:[#allocation74_spill] sm:$0xff] %v4425_v17  ;;  %3241 = vmatprep.subr.bf16.mxu1 %v4425_v17  ;;  %v571_v38 = vand.u32 4294901760, %v475_v13  ;;  %v4437_v51 = vpack.c.bf16 %v569_v0, %v565_v37  ;;  %v4439_v36 = vsub.f32 %v472_v59, %v569_v0  ;;  %v479_v37 = vld [vmem:[#allocation6 + $0x2e8] sm:$0xff]  ;;  %v481_v59 = vld [vmem:[#allocation6 + $0x2f8] sm:$0xff] }
 0x195   :  { %6922 = vst [vmem:[#allocation75_spill] sm:$0xff] %v4427_v53  ;;  %6923 = vst [vmem:[#allocation76_spill] sm:$0xff] %v4429_v10  ;;  %v4431_v19 = vpop.eup %4047  ;;  %v4441_v10 = vpack.c.bf16 %v1859_v41, %v1855_v1  ;;  %v4443_v3 = vsub.f32 %v406_v21, %v1855_v1  ;;  %v410_v53 = vld [vmem:[#allocation6 + $0xc8] sm:$0xff]  ;;  %v4445_v46 = vsub.f32 %v408_v28, %v1859_v41  ;;  %v573_v28 = vand.u32 4294901760, %v474_v34 }
 0x196   :  { %6924 = vst [vmem:[#allocation77_spill] sm:$0xff] %v4435_v47  ;;  %6925 = vst [vmem:[#allocation78_spill] sm:$0xff] %v4437_v51  ;;  %v4447_v47 = vpack.c.bf16 %v1861_v30, %v1857_v56  ;;  %v4449_v26 = vsub.f32 %v405_v5, %v1857_v56  ;;  %v4451_v25 = vsub.f32 %v407_v27, %v1861_v30  ;;  %3243 = vmatpush1.bf16.msra.mxu1 %v4437_v51 }
 0x197   :  { %264 = vperm.xlu1 %4018, %v4046_v42   ;;  %6926 = vst [vmem:[#allocation79_spill] sm:$0xff] %v4439_v36  ;;  %6927 = vst [vmem:[#allocation80_spill] sm:$0xff] %v4441_v10  ;;  %v411_v42 = vld [vmem:[#allocation6 + $0xd0] sm:$0xff]  ;;  %3625 = vmatprep.subr.bf16.mxu0 %v4441_v10  ;;  %v4455_v21 = vpack.c.bf16 %v575_v60, %v571_v38  ;;  %v4457_v0 = vsub.f32 %v475_v13, %v571_v38  ;;  %v577_v5 = vand.u32 4294901760, %v476_v45  ;;  %v485_v36 = vld [vmem:[#allocation6 + $0x318] sm:$0xff] }
 0x198   :  { %6928 = vst [vmem:[#allocation81_spill] sm:$0xff] %v4443_v3  ;;  %v4050_v17 = vpop.eup %4049  ;;  %6929 = vst [vmem:[#allocation82_spill] sm:$0xff] %v4445_v46  ;;  %v4459_v1 = vsub.f32 %v477_v48, %v575_v60  ;;  %3627 = vmatpush1.bf16.msra.mxu0 %v4447_v47  ;;  %v1863_v41 = vand.u32 4294901760, %v410_v53  ;;  %v1867_v30 = vand.u32 4294901760, %v412_v54  ;;  %v1865_v27 = vand.u32 4294901760, %v409_v39  ;;  %v480_v38 = vld [vmem:[#allocation6 + $0x2f0] sm:$0xff] }
 0x199   :  { %6930 = vst [vmem:[#allocation83_spill] sm:$0xff] %v4447_v47  ;;  %6931 = vst [vmem:[#allocation84_spill] sm:$0xff] %v4449_v26  ;;  %3245 = vmatprep.subr.bf16.mxu1 %v4455_v21  ;;  %v4463_v56 = vsub.f32 %v474_v34, %v573_v28  ;;  %v1869_v51 = vand.u32 4294901760, %v411_v42  ;;  %v579_v10 = vand.u32 4294901760, %v479_v37  ;;  %v478_v26 = vld [vmem:[#allocation6 + $0x2e0] sm:$0xff]  ;;  %v4465_v13 = vpack.c.bf16 %v577_v5, %v573_v28  ;;  %v415_v3 = vld [vmem:[#allocation6 + $0xf0] sm:$0xff] }
 0x19a   :  { %6932 = vst [vmem:[#allocation85_spill] sm:$0xff] %v4451_v25  ;;  %6933 = vst [vmem:[#allocation86_spill] sm:$0xff] %v4455_v21  ;;  %v583_v25 = vand.u32 4294901760, %v481_v59  ;;  %v4467_v60 = vsub.f32 %v476_v45, %v577_v5  ;;  %v4469_v48 = vpack.c.bf16 %v1867_v30, %v1863_v41  ;;  %v4471_v47 = vsub.f32 %v410_v53, %v1863_v41  ;;  %v483_v28 = vld [vmem:[#allocation6 + $0x308] sm:$0xff] }
 0x19b   :  { %6934 = vst [vmem:[#allocation87_spill] sm:$0xff] %v4457_v0  ;;  %6935 = vst [vmem:[#allocation88_spill] sm:$0xff] %v4459_v1  ;;  %284 = vperm.xlu1 %4018, %v4044_v9   ;;  %v414_v1 = vld [vmem:[#allocation6 + $0xe8] sm:$0xff]  ;;  %v416_v0 = vld [vmem:[#allocation6 + $0xf8] sm:$0xff]  ;;  %v4473_v46 = vsub.f32 %v412_v54, %v1867_v30  ;;  %v4475_v34 = vpack.c.bf16 %v1869_v51, %v1865_v27  ;;  %v4477_v21 = vsub.f32 %v409_v39, %v1865_v27 }
 0x19c   :  { %6936 = vst [vmem:[#allocation89_spill] sm:$0xff] %v4463_v56  ;;  %6937 = vst [vmem:[#allocation90_spill] sm:$0xff] %v4465_v13  ;;  %v413_v9 = vld [vmem:[#allocation6 + $0xe0] sm:$0xff]  ;;  %v4479_v56 = vsub.f32 %v411_v42, %v1869_v51  ;;  %3247 = vmatpush1.bf16.msra.mxu1 %v4465_v13  ;;  %3629 = vmatprep.subr.bf16.mxu0 %v4469_v48  ;;  %v4483_v53 = vpack.c.bf16 %v583_v25, %v579_v10  ;;  %v581_v54 = vand.u32 4294901760, %v478_v26 }
 0x19d   :  { %6938 = vst [vmem:[#allocation91_spill] sm:$0xff] %v4467_v60  ;;  %6939 = vst [vmem:[#allocation92_spill] sm:$0xff] %v4469_v48  ;;  %v4485_v45 = vsub.f32 %v479_v37, %v579_v10  ;;  %v4487_v5 = vsub.f32 %v481_v59, %v583_v25  ;;  %3631 = vmatpush1.bf16.msra.mxu0 %v4475_v34  ;;  %v585_v39 = vand.u32 4294901760, %v480_v38  ;;  %v1871_v51 = vand.u32 4294901760, %v414_v1  ;;  %v4495_v10 = vld [vmem:[#allocation6 + $0x310] sm:$0xff]  ;;  %v4497_v25 = vld [vmem:[#allocation6 + $0x108] sm:$0xff] }
 0x19e   :  { %6940 = vst [vmem:[#allocation93_spill] sm:$0xff] %v4471_v47  ;;  %6941 = vst [vmem:[#allocation94_spill] sm:$0xff] %v4473_v46  ;;  %v1875_v42 = vand.u32 4294901760, %v416_v0  ;;  %v1873_v41 = vand.u32 4294901760, %v413_v9  ;;  %3249 = vmatprep.subr.bf16.mxu1 %v4483_v53  ;;  %v4491_v30 = vsub.f32 %v478_v26, %v581_v54  ;;  %v1877_v27 = vand.u32 4294901760, %v415_v3  ;;  %v4509_v26 = vld [vmem:[#allocation6 + $0x100] sm:$0xff] }
 0x19f   :  { %6942 = vst [vmem:[#allocation95_spill] sm:$0xff] %v4475_v34  ;;  %6943 = vst [vmem:[#allocation96_spill] sm:$0xff] %v4477_v21  ;;  %269 = vperm.xlu1 %4018, %v4050_v17   ;;  %v587_v48 = vand.u32 4294901760, %v483_v28  ;;  %v591_v13 = vand.u32 4294901760, %v485_v36  ;;  %v4499_v17 = vpack.c.bf16 %v585_v39, %v581_v54  ;;  %v4501_v37 = vsub.f32 %v480_v38, %v585_v39  ;;  %v4521_v38 = vld [vmem:[#allocation6 + $0x328] sm:$0xff]  ;;  %v4523_v39 = vld [vmem:[#allocation6 + $0x338] sm:$0xff] }
 0x1a0   :  { %6944 = vst [vmem:[#allocation97_spill] sm:$0xff] %v4479_v56  ;;  %6945 = vst [vmem:[#allocation98_spill] sm:$0xff] %v4483_v53  ;;  %v4493_v56 = vld [vmem:[#allocation6 + $0x300] sm:$0xff]  ;;  %v4503_v59 = vpack.c.bf16 %v1875_v42, %v1871_v51  ;;  %v4505_v34 = vsub.f32 %v414_v1, %v1871_v51  ;;  %v4507_v53 = vld [vmem:[#allocation6 + $0x118] sm:$0xff]  ;;  %v4517_v21 = vsub.f32 %v413_v9, %v1873_v41  ;;  %v7000_v50 = vand.u32 4294901760, %v4495_v10 }
 0x1a1   :  { %6946 = vst [vmem:[#allocation99_spill] sm:$0xff] %v4485_v45  ;;  %6947 = vst [vmem:[#allocation100_spill] sm:$0xff] %v4487_v5  ;;  %v4513_v5 = vsub.f32 %v416_v0, %v1875_v42  ;;  %v4515_v45 = vpack.c.bf16 %v1877_v27, %v1873_v41  ;;  %v4519_v54 = vsub.f32 %v415_v3, %v1877_v27  ;;  %v4525_v1 = vld [vmem:[#allocation6 + $0x320] sm:$0xff]  ;;  %3251 = vmatpush1.bf16.msra.mxu1 %v4499_v17  ;;  %v4536_v3 = vld [vmem:[#allocation6 + $0x330] sm:$0xff] }
 0x1a2   :  { %6948 = vst [vmem:[#allocation101_spill] sm:$0xff] %v4491_v30  ;;  %6949 = vst [vmem:[#allocation102_spill] sm:$0xff] %v4499_v17  ;;  %v4511_v30 = vld [vmem:[#allocation6 + $0x110] sm:$0xff]  ;;  %v4529_v51 = vpack.c.bf16 %v591_v13, %v587_v48  ;;  %v4531_v0 = vsub.f32 %v483_v28, %v587_v48  ;;  %v4533_v42 = vsub.f32 %v485_v36, %v591_v13  ;;  %v4538_v41 = vld [vmem:[#allocation6 + $0x128] sm:$0xff]  ;;  %3633 = vmatprep.subr.bf16.mxu0 %v4503_v59 }
 0x1a3   :  { %6950 = vst [vmem:[#allocation103_spill] sm:$0xff] %v4501_v37  ;;  %6951 = vst [vmem:[#allocation104_spill] sm:$0xff] %v4503_v59  ;;  %289 = vperm.xlu1 %4018, %v4431_v19   ;;  %v4540_v27 = vld [vmem:[#allocation6 + $0x138] sm:$0xff]  ;;  %v4547_v36 = vld [vmem:[#allocation6 + $0x120] sm:$0xff]  ;;  %3635 = vmatpush1.bf16.msra.mxu0 %v4515_v45  ;;  %v6960_v48 = vand.u32 4294901760, %v4493_v56  ;;  %v6964_v28 = vand.u32 4294901760, %v4507_v53 }
 0x1a4   :  { %6952 = vst [vmem:[#allocation105_spill] sm:$0xff] %v4505_v34  ;;  %6953 = vst [vmem:[#allocation106_spill] sm:$0xff] %v4513_v5  ;;  %v4549_v13 = vld [vmem:[#allocation6 + $0x130] sm:$0xff]  ;;  %3253 = vmatprep.subr.bf16.mxu1 %v4529_v51  ;;  %v4557_v59 = vld [vmem:[#allocation6 + $0x348] sm:$0xff]  ;;  %v6966_v34 = vand.u32 4294901760, %v4509_v26  ;;  %v6969_v37 = vand.u32 4294901760, %v4521_v38 }
 0x1a5   :  { %6954 = vst [vmem:[#allocation107_spill] sm:$0xff] %v4515_v45  ;;  %6955 = vst [vmem:[#allocation108_spill] sm:$0xff] %v4517_v21  ;;  %v6963_v45 = vand.u32 4294901760, %v4497_v25  ;;  %v4575_v9 = vld [vmem:[#allocation6 + $0x340] sm:$0xff]  ;;  %v4577_v21 = vld [vmem:[#allocation6 + $0x350] sm:$0xff]  ;;  %v6998_v52 = vand.u32 4294901760, %v4493_v56 }
 0x1a6   :  { %6956 = vst [vmem:[#allocation109_spill] sm:$0xff] %v4519_v54  ;;  %6957 = vst [vmem:[#allocation110_spill] sm:$0xff] %v4529_v51  ;;  %v4559_v54 = vld [vmem:[#allocation6 + $0x358] sm:$0xff]  ;;  %v4579_v5 = vld [vmem:[#allocation6 + $0x148] sm:$0xff]  ;;  %v6984_v18 = vand.u32 4294901760, %v4575_v9  ;;  %v7004_v43 = vand.u32 4294901760, %v4507_v53 }
 0x1a7   :  { %6958 = vst [vmem:[#allocation111_spill] sm:$0xff] %v4531_v0  ;;  %6959 = vst [vmem:[#allocation112_spill] sm:$0xff] %v4533_v42  ;;  %v6961_v42 = vand.u32 4294901760, %v4495_v10  ;;  %v4571_v51 = vpack.c.bf16 %v6964_v28, %v6963_v45  ;;  %v6970_v45 = vand.u32 4294901760, %v4523_v39  ;;  %v4595_v46 = vld [vmem:[#allocation6 + $0x158] sm:$0xff]  ;;  %v4597_v47 = vld [vmem:[#allocation6 + $0x140] sm:$0xff] }
 0x1a8   :  { %v4610_v17 = vld [vmem:[#allocation6 + $0x150] sm:$0xff]  ;;  %v4663_v19 = vld [vmem:[#allocation6 + $0x388] sm:$0xff]  ;;  %v6988_v12 = vand.u32 4294901760, %v4595_v46  ;;  %v6990_v16 = vand.u32 4294901760, %v4597_v47  ;;  %v4723_v35 = vsub.f32 %v4507_v53, %v7004_v43  ;;  %v7012_v43 = vand.u32 4294901760, %v4523_v39 }
 0x1a9   :  { %v4565_v0 = vpack.c.bf16 %v6961_v42, %v6960_v48  ;;  %6965 = vst [vmem:[#allocation114_spill] sm:$0xff] %v4571_v51  ;;  %v6967_v42 = vand.u32 4294901760, %v4511_v30  ;;  %v4591_v28 = vpack.c.bf16 %v6970_v45, %v6969_v37  ;;  %3637 = vmatprep.subr.bf16.mxu0 %v4571_v51  ;;  %v6975_v51 = vand.u32 4294901760, %v4538_v41  ;;  %v4661_v37 = vld [vmem:[#allocation6 + $0x170] sm:$0xff] }
 0x1aa   :  { %7005 = vst [vmem:[#allocation129_spill] sm:$0xff] %v4723_v35  ;;  %v4745_v53 = vsub.f32 %v4523_v39, %v7012_v43  ;;  %v503_v35 = vld [vmem:[#allocation6 + $0x3a8] sm:$0xff]  ;;  %v7022_v24 = vand.u32 4294901760, %v4538_v41  ;;  %v7024_v23 = vand.u32 4294901760, %v4540_v27 }
 0x1ab   :  { %6962 = vst [vmem:[#allocation113_spill] sm:$0xff] %v4565_v0  ;;  %v4585_v48 = vpack.c.bf16 %v6967_v42, %v6966_v34  ;;  %6971 = vst [vmem:[#allocation116_spill] sm:$0xff] %v4591_v28  ;;  %3255 = vmatpush1.bf16.msra.mxu1 %v4565_v0  ;;  %v6972_v34 = vand.u32 4294901760, %v4525_v1  ;;  %v6973_v42 = vand.u32 4294901760, %v4536_v3  ;;  %v4627_v0 = vld [vmem:[#allocation6 + $0x360] sm:$0xff] }
 0x1ac   :  { %3257 = vmatprep.subr.bf16.mxu1 %v4591_v28  ;;  %v6979_v28 = vand.u32 4294901760, %v4549_v13  ;;  %7013 = vst [vmem:[#allocation133_spill] sm:$0xff] %v4745_v53  ;;  %v627_v53 = vand.u32 4294901760, %v503_v35  ;;  %v4785_v22 = vsub.f32 %v4540_v27, %v7024_v23  ;;  %v7032_v23 = vand.u32 4294901760, %v4559_v54 }
 0x1ad   :  { %6968 = vst [vmem:[#allocation115_spill] sm:$0xff] %v4585_v48  ;;  %v4605_v60 = vpack.c.bf16 %v6973_v42, %v6972_v34  ;;  %3639 = vmatpush1.bf16.msra.mxu0 %v4585_v48  ;;  %v6976_v34 = vand.u32 4294901760, %v4540_v27  ;;  %v6978_v48 = vand.u32 4294901760, %v4547_v36 }
 0x1ae   :  { %7025 = vst [vmem:[#allocation140_spill] sm:$0xff] %v4785_v22  ;;  %v4806_v27 = vsub.f32 %v4559_v54, %v7032_v23 }
 0x1af   :  { %6974 = vst [vmem:[#allocation117_spill] sm:$0xff] %v4605_v60  ;;  %v4622_v42 = vpack.c.bf16 %v6976_v34, %v6975_v51  ;;  %v4637_v14 = vpack.c.bf16 %v6979_v28, %v6978_v48  ;;  %v6981_v51 = vand.u32 4294901760, %v4557_v59  ;;  %v6982_v34 = vand.u32 4294901760, %v4559_v54  ;;  %3259 = vmatpush1.bf16.msra.mxu1 %v4605_v60 }
 0x1b0   :  { %v6985_v48 = vand.u32 4294901760, %v4577_v21  ;;  %v6991_v60 = vand.u32 4294901760, %v4610_v17  ;;  %7033 = vst [vmem:[#allocation144_spill] sm:$0xff] %v4806_v27  ;;  %v7040_v54 = vand.u32 4294901760, %v4595_v46 }
 0x1b1   :  { %6977 = vst [vmem:[#allocation118_spill] sm:$0xff] %v4622_v42  ;;  %6980 = vst [vmem:[#allocation119_spill] sm:$0xff] %v4637_v14  ;;  %v4643_v45 = vpack.c.bf16 %v6982_v34, %v6981_v51  ;;  %3641 = vmatprep.subr.bf16.mxu0 %v4622_v42  ;;  %v6987_v42 = vand.u32 4294901760, %v4579_v5  ;;  %v1907_v51 = vand.u32 4294901760, %v4647_v2  ;;  %v1905_v34 = vand.u32 4294901760, %v4649_v20 }
 0x1b2   :  { %v4656_v28 = vpack.c.bf16 %v6985_v48, %v6984_v18  ;;  %v6571_v48 = vand.u32 4294901760, %v4627_v0  ;;  %3643 = vmatpush1.bf16.msra.mxu0 %v4637_v14  ;;  %v4683_v11 = vpack.c.bf16 %v6991_v60, %v6990_v16  ;;  %v6996_v14 = vand.u32 4294901760, %v4629_v32 }
 0x1b3   :  { %6983 = vst [vmem:[#allocation120_spill] sm:$0xff] %v4643_v45  ;;  %v4672_v18 = vpack.c.bf16 %v6988_v12, %v6987_v42  ;;  %3261 = vmatprep.subr.bf16.mxu1 %v4643_v45  ;;  %v6994_v12 = vand.u32 4294901760, %v4614_v49  ;;  %v1909_v16 = vand.u32 4294901760, %v4661_v37  ;;  %v619_v60 = vand.u32 4294901760, %v4663_v19 }
 0x1b4   :  { %6986 = vst [vmem:[#allocation121_spill] sm:$0xff] %v4656_v28  ;;  %6992 = vst [vmem:[#allocation123_spill] sm:$0xff] %v4683_v11  ;;  %v4698_v45 = vpack.c.bf16 %v6996_v14, %v6571_v48  ;;  %v4713_v14 = vsub.f32 %v4495_v10, %v7000_v50  ;;  %v7002_v48 = vand.u32 4294901760, %v4497_v25  ;;  %v7008_v50 = vand.u32 4294901760, %v4511_v30  ;;  %3263 = vmatpush1.bf16.msra.mxu1 %v4656_v28 }
 0x1b5   :  { %6989 = vst [vmem:[#allocation122_spill] sm:$0xff] %v4672_v18  ;;  %v4689_v42 = vpack.c.bf16 %v6994_v12, %v6993_v58  ;;  %3645 = vmatprep.subr.bf16.mxu0 %v4672_v18  ;;  %v498_v58 = vld [vmem:[#allocation6 + $0x380] sm:$0xff]  ;;  %v500_v12 = vld [vmem:[#allocation6 + $0x390] sm:$0xff]  ;;  %v4708_v18 = vsub.f32 %v4493_v56, %v6998_v52  ;;  %v7006_v52 = vand.u32 4294901760, %v4509_v26  ;;  %v1911_v28 = vand.u32 4294901760, %v4703_v55 }
 0x1b6   :  { %6997 = vst [vmem:[#allocation125_spill] sm:$0xff] %v4698_v45  ;;  %7001 = vst [vmem:[#allocation127_spill] sm:$0xff] %v4713_v14  ;;  %v4718_v44 = vsub.f32 %v4497_v25, %v7002_v48  ;;  %v4735_v10 = vsub.f32 %v4511_v30, %v7008_v50  ;;  %v7010_v25 = vand.u32 4294901760, %v4521_v38  ;;  %3647 = vmatpush1.bf16.msra.mxu0 %v4683_v11  ;;  %v7014_v30 = vand.u32 4294901760, %v4631_v7 }
 0x1b7   :  { %6995 = vst [vmem:[#allocation124_spill] sm:$0xff] %v4689_v42  ;;  %6999 = vst [vmem:[#allocation126_spill] sm:$0xff] %v4708_v18  ;;  %v4730_v56 = vsub.f32 %v4509_v26, %v7006_v52  ;;  %v4748_v26 = vld [vmem:[#allocation6 + $0x3b8] sm:$0xff]  ;;  %v4750_v52 = vld [vmem:[#allocation6 + $0x3a0] sm:$0xff]  ;;  %3265 = vmatprep.subr.bf16.mxu1 %v4689_v42  ;;  %v4758_v50 = vpack.c.bf16 %v1909_v16, %v1905_v34  ;;  %v621_v39 = vand.u32 4294901760, %v498_v58  ;;  %v625_v43 = vand.u32 4294901760, %v500_v12 }
 0x1b8   :  { %7003 = vst [vmem:[#allocation128_spill] sm:$0xff] %v4718_v44  ;;  %7009 = vst [vmem:[#allocation131_spill] sm:$0xff] %v4735_v10  ;;  %v4740_v48 = vsub.f32 %v4521_v38, %v7010_v25  ;;  %v4756_v38 = vpack.c.bf16 %v1907_v51, %v7014_v30  ;;  %v4760_v25 = vpack.c.bf16 %v623_v57, %v619_v60  ;;  %v1915_v10 = vand.u32 4294901760, %v436_v33 }
 0x1b9   :  { %7007 = vst [vmem:[#allocation130_spill] sm:$0xff] %v4730_v56  ;;  %7016 = vst [vmem:[#allocation135_spill] sm:$0xff] %v4758_v50  ;;  %v1913_v56 = vand.u32 4294901760, %v433_v31  ;;  %v1917_v11 = vand.u32 4294901760, %v4725_v29  ;;  %v631_v42 = vand.u32 4294901760, %v4748_v26  ;;  %v629_v30 = vand.u32 4294901760, %v4750_v52  ;;  %3267 = vmatpush1.bf16.msra.mxu1 %v4698_v45 }
 0x1ba   :  { %7011 = vst [vmem:[#allocation132_spill] sm:$0xff] %v4740_v48  ;;  %7015 = vst [vmem:[#allocation134_spill] sm:$0xff] %v4756_v38  ;;  %3649 = vmatprep.subr.bf16.mxu0 %v4756_v38  ;;  %v7018_v48 = vand.u32 4294901760, %v4525_v1  ;;  %v7020_v14 = vand.u32 4294901760, %v4536_v3  ;;  %v4780_v38 = vsub.f32 %v4538_v41, %v7022_v24  ;;  %v7030_v24 = vand.u32 4294901760, %v4557_v59  ;;  %3269 = vmatprep.subr.bf16.mxu1 %v4760_v25  ;;  %v441_v45 = vld [vmem:[#allocation6 + $0x1c0] sm:$0xff] }
 0x1bb   :  { %7017 = vst [vmem:[#allocation136_spill] sm:$0xff] %v4760_v25  ;;  %3651 = vmatpush1.bf16.msra.mxu0 %v4758_v50  ;;  %v4827_v23 = vsub.f32 %v4595_v46, %v7040_v54  ;;  %v7048_v46 = vand.u32 4294901760, %v4614_v49  ;;  %v7050_v50 = vand.u32 4294901760, %v4627_v0  ;;  %v444_v25 = vld [vmem:[#allocation6 + $0x1d8] sm:$0xff] }
 0x1bc   :  { %v4770_v44 = vsub.f32 %v4525_v1, %v7018_v48  ;;  %v4775_v18 = vsub.f32 %v4536_v3, %v7020_v14  ;;  %7023 = vst [vmem:[#allocation139_spill] sm:$0xff] %v4780_v38  ;;  %v7026_v1 = vand.u32 4294901760, %v4547_v36  ;;  %v7028_v3 = vand.u32 4294901760, %v4549_v13 }
 0x1bd   :  { %v4801_v41 = vsub.f32 %v4557_v59, %v7030_v24  ;;  %v7038_v59 = vand.u32 4294901760, %v4579_v5  ;;  %7041 = vst [vmem:[#allocation148_spill] sm:$0xff] %v4827_v23  ;;  %v4848_v54 = vsub.f32 %v4614_v49, %v7048_v46  ;;  %v4869_v49 = vsub.f32 %v4649_v20, %v1905_v34  ;;  %v438_v20 = vld [vmem:[#allocation6 + $0x1a8] sm:$0xff] }
 0x1be   :  { %7019 = vst [vmem:[#allocation137_spill] sm:$0xff] %v4770_v44  ;;  %7021 = vst [vmem:[#allocation138_spill] sm:$0xff] %v4775_v18  ;;  %v4791_v48 = vsub.f32 %v4547_v36, %v7026_v1  ;;  %v4796_v14 = vsub.f32 %v4549_v13, %v7028_v3  ;;  %v7034_v36 = vand.u32 4294901760, %v4575_v9  ;;  %v7036_v13 = vand.u32 4294901760, %v4577_v21 }
 0x1bf   :  { %7031 = vst [vmem:[#allocation143_spill] sm:$0xff] %v4801_v41  ;;  %v4822_v24 = vsub.f32 %v4579_v5, %v7038_v59  ;;  %v7046_v5 = vand.u32 4294901760, %v4612_v40  ;;  %7049 = vst [vmem:[#allocation152_spill] sm:$0xff] %v4848_v54  ;;  %v4872_v46 = vsub.f32 %v4661_v37, %v1909_v16  ;;  %v4889_v37 = vsub.f32 %v4703_v55, %v1911_v28  ;;  %v439_v16 = vld [vmem:[#allocation6 + $0x1b0] sm:$0xff]  ;;  %v446_v54 = vld [vmem:[#allocation6 + $0x1e8] sm:$0xff] }
 0x1c0   :  { %7027 = vst [vmem:[#allocation141_spill] sm:$0xff] %v4791_v48  ;;  %7029 = vst [vmem:[#allocation142_spill] sm:$0xff] %v4796_v14  ;;  %v4812_v1 = vsub.f32 %v4575_v9, %v7034_v36  ;;  %v4817_v3 = vsub.f32 %v4577_v21, %v7036_v13  ;;  %v7042_v9 = vand.u32 4294901760, %v4597_v47  ;;  %v7044_v21 = vand.u32 4294901760, %v4610_v17 }
 0x1c1   :  { %7039 = vst [vmem:[#allocation147_spill] sm:$0xff] %v4822_v24  ;;  %v4843_v59 = vsub.f32 %v4612_v40, %v7046_v5  ;;  %v4866_v5 = vsub.f32 %v4647_v2, %v1907_v51  ;;  %v4886_v2 = vpack.c.bf16 %v1915_v10, %v1911_v28  ;;  %v440_v51 = vld [vmem:[#allocation6 + $0x1b8] sm:$0xff]  ;;  %v4891_v34 = vsub.f32 %v436_v33, %v1915_v10  ;;  %v507_v33 = vld [vmem:[#allocation6 + $0x3c8] sm:$0xff]  ;;  %v445_v24 = vld [vmem:[#allocation6 + $0x1e0] sm:$0xff] }
 0x1c2   :  { %7035 = vst [vmem:[#allocation145_spill] sm:$0xff] %v4812_v1  ;;  %7037 = vst [vmem:[#allocation146_spill] sm:$0xff] %v4817_v3  ;;  %v4833_v36 = vsub.f32 %v4597_v47, %v7042_v9  ;;  %v4838_v13 = vsub.f32 %v4610_v17, %v7044_v21  ;;  %v4853_v47 = vsub.f32 %v4627_v0, %v7050_v50  ;;  %v7052_v9 = vand.u32 4294901760, %v4629_v32  ;;  %v504_v50 = vld [vmem:[#allocation6 + $0x3b0] sm:$0xff] }
 0x1c3   :  { %7047 = vst [vmem:[#allocation151_spill] sm:$0xff] %v4843_v59  ;;  %v7054_v21 = vand.u32 4294901760, %v4631_v7  ;;  %7056 = vst [vmem:[#allocation156_spill] sm:$0xff] %v4866_v5  ;;  %v4875_v0 = vsub.f32 %v4663_v19, %v619_v60  ;;  %v4893_v19 = vpack.c.bf16 %v1917_v11, %v1913_v56  ;;  %3653 = vmatprep.subr.bf16.mxu0 %v4886_v2  ;;  %v633_v55 = vand.u32 4294901760, %v504_v50  ;;  %v448_v59 = vld [vmem:[#allocation6 + $0x1f8] sm:$0xff] }
 0x1c4   :  { %7043 = vst [vmem:[#allocation149_spill] sm:$0xff] %v4833_v36  ;;  %7045 = vst [vmem:[#allocation150_spill] sm:$0xff] %v4838_v13  ;;  %v4858_v17 = vsub.f32 %v4629_v32, %v7052_v9  ;;  %v4878_v32 = vsub.f32 %v4665_v15, %v623_v57  ;;  %v4880_v9 = vpack.c.bf16 %v625_v43, %v621_v39  ;;  %v437_v15 = vld [vmem:[#allocation6 + $0x1a0] sm:$0xff]  ;;  %v1923_v10 = vand.u32 4294901760, %v440_v51 }
 0x1c5   :  { %7051 = vst [vmem:[#allocation153_spill] sm:$0xff] %v4853_v47  ;;  %v4863_v40 = vsub.f32 %v4631_v7, %v7054_v21  ;;  %v4882_v7 = vsub.f32 %v498_v58, %v621_v39  ;;  %v4884_v21 = vsub.f32 %v500_v12, %v625_v43  ;;  %7058 = vst [vmem:[#allocation158_spill] sm:$0xff] %v4886_v2  ;;  %3655 = vmatpush1.bf16.msra.mxu0 %v4893_v19  ;;  %v509_v39 = vld [vmem:[#allocation6 + $0x3d8] sm:$0xff]  ;;  %v506_v43 = vld [vmem:[#allocation6 + $0x3c0] sm:$0xff] }
 0x1c6   :  { %7053 = vst [vmem:[#allocation154_spill] sm:$0xff] %v4858_v17  ;;  %7057 = vst [vmem:[#allocation157_spill] sm:$0xff] %v4880_v9  ;;  %v4895_v57 = vsub.f32 %v433_v31, %v1913_v56  ;;  %3271 = vmatpush1.bf16.msra.mxu1 %v4880_v9  ;;  %v4900_v60 = vsub.f32 %v4725_v29, %v1917_v11  ;;  %v4902_v58 = vpack.c.bf16 %v631_v42, %v627_v53  ;;  %v508_v2 = vld [vmem:[#allocation6 + $0x3d0] sm:$0xff] }
 0x1c7   :  { %7055 = vst [vmem:[#allocation155_spill] sm:$0xff] %v4863_v40  ;;  %7059 = vst [vmem:[#allocation159_spill] sm:$0xff] %v4893_v19  ;;  %v4904_v12 = vsub.f32 %v503_v35, %v627_v53  ;;  %v4908_v31 = vsub.f32 %v4748_v26, %v631_v42  ;;  %v4911_v28 = vsub.f32 %v4750_v52, %v629_v30  ;;  %v1919_v56 = vand.u32 4294901760, %v438_v20  ;;  %v442_v19 = vld [vmem:[#allocation6 + $0x1c8] sm:$0xff]  ;;  %v512_v47 = vld [vmem:[#allocation6 + $0x3f0] sm:$0xff] }
 0x1c8   :  { %7060 = vst [vmem:[#allocation160_spill] sm:$0xff] %v4902_v58  ;;  %3273 = vmatprep.subr.bf16.mxu1 %v4902_v58  ;;  %v4914_v29 = vpack.c.bf16 %v633_v55, %v629_v30  ;;  %v4916_v11 = vsub.f32 %v504_v50, %v633_v55  ;;  %v1921_v35 = vand.u32 4294901760, %v437_v15  ;;  %v1925_v53 = vand.u32 4294901760, %v439_v16  ;;  %v511_v40 = vld [vmem:[#allocation6 + $0x3e8] sm:$0xff] }
 0x1c9   :  { %v4918_v9 = vpack.c.bf16 %v1923_v10, %v1919_v56  ;;  %v4920_v42 = vsub.f32 %v438_v20, %v1919_v56  ;;  %v4922_v26 = vsub.f32 %v440_v51, %v1923_v10  ;;  %v635_v52 = vand.u32 4294901760, %v507_v33  ;;  %v443_v10 = vld [vmem:[#allocation6 + $0x1d0] sm:$0xff] }
 0x1ca   :  { %7061 = vst [vmem:[#allocation161_spill] sm:$0xff] %v4914_v29  ;;  %3275 = vmatpush1.bf16.msra.mxu1 %v4914_v29  ;;  %v4925_v30 = vpack.c.bf16 %v1925_v53, %v1921_v35  ;;  %v4927_v50 = vsub.f32 %v437_v15, %v1921_v35  ;;  %v4929_v55 = vsub.f32 %v439_v16, %v1925_v53  ;;  %v639_v58 = vand.u32 4294901760, %v509_v39  ;;  %v513_v16 = vld [vmem:[#allocation6 + $0x3f8] sm:$0xff]  ;;  %v510_v53 = vld [vmem:[#allocation6 + $0x3e0] sm:$0xff] }
 0x1cb   :  { %7062 = vst [vmem:[#allocation162_spill] sm:$0xff] %v4918_v9  ;;  %7063 = vst [vmem:[#allocation163_spill] sm:$0xff] %v4922_v26  ;;  %3657 = vmatprep.subr.bf16.mxu0 %v4918_v9  ;;  %v4932_v5 = vsub.f32 %v507_v33, %v635_v52  ;;  %v637_v20 = vand.u32 4294901760, %v506_v43  ;;  %v641_v56 = vand.u32 4294901760, %v508_v2  ;;  %v1927_v51 = vand.u32 4294901760, %v442_v19 }
 0x1cc   :  { %7064 = vst [vmem:[#allocation164_spill] sm:$0xff] %v4925_v30  ;;  %7065 = vst [vmem:[#allocation165_spill] sm:$0xff] %v4927_v50  ;;  %3659 = vmatpush1.bf16.msra.mxu0 %v4925_v30  ;;  %v4935_v17 = vpack.c.bf16 %v639_v58, %v635_v52  ;;  %v4937_v29 = vsub.f32 %v509_v39, %v639_v58  ;;  %v1931_v15 = vand.u32 4294901760, %v444_v25  ;;  %v1929_v35 = vand.u32 4294901760, %v441_v45 }
 0x1cd   :  { %7066 = vst [vmem:[#allocation166_spill] sm:$0xff] %v4929_v55  ;;  %7067 = vst [vmem:[#allocation167_spill] sm:$0xff] %v4932_v5  ;;  %v4939_v13 = vpack.c.bf16 %v641_v56, %v637_v20  ;;  %v4941_v33 = vsub.f32 %v506_v43, %v637_v20  ;;  %v4943_v9 = vsub.f32 %v508_v2, %v641_v56  ;;  %v1933_v39 = vand.u32 4294901760, %v443_v10  ;;  %v7150_v55 = vld [vmem:[#allocation69_spill] sm:$0xff] }
 0x1ce   :  { %7068 = vst [vmem:[#allocation168_spill] sm:$0xff] %v4935_v17  ;;  %7069 = vst [vmem:[#allocation169_spill] sm:$0xff] %v4937_v29  ;;  %v4945_v36 = vsub.f32 %v442_v19, %v1927_v51  ;;  %3277 = vmatprep.subr.bf16.mxu1 %v4935_v17  ;;  %v4948_v52 = vpack.c.bf16 %v1931_v15, %v1927_v51  ;;  %v4950_v58 = vsub.f32 %v444_v25, %v1931_v15  ;;  %v447_v25 = vld [vmem:[#allocation6 + $0x1f0] sm:$0xff]  ;;  %v7141_v29 = vld [vmem:[#allocation64_spill] sm:$0xff] }
 0x1cf   :  { %7070 = vst [vmem:[#allocation170_spill] sm:$0xff] %v4939_v13  ;;  %7071 = vst [vmem:[#allocation171_spill] sm:$0xff] %v4941_v33  ;;  %v4952_v30 = vsub.f32 %v441_v45, %v1929_v35  ;;  %3279 = vmatpush1.bf16.msra.mxu1 %v4939_v13  ;;  %v643_v23 = vand.u32 4294901760, %v511_v40  ;;  %v647_v43 = vand.u32 4294901760, %v513_v16  ;;  %v645_v20 = vand.u32 4294901760, %v510_v53 }
 0x1d0   :  { %7072 = vst [vmem:[#allocation172_spill] sm:$0xff] %v4943_v9  ;;  %7073 = vst [vmem:[#allocation173_spill] sm:$0xff] %v4945_v36  ;;  %v649_v2 = vand.u32 4294901760, %v512_v47  ;;  %3661 = vmatprep.subr.bf16.mxu0 %v4948_v52  ;;  %v4956_v19 = vpack.c.bf16 %v1933_v39, %v1929_v35  ;;  %v4958_v56 = vsub.f32 %v443_v10, %v1933_v39  ;;  %v1935_v17 = vand.u32 4294901760, %v446_v54  ;;  %v7140_v9 = vld [vmem:[#allocation63_spill] sm:$0xff] }
 0x1d1   :  { %7074 = vst [vmem:[#allocation174_spill] sm:$0xff] %v4948_v52  ;;  %7075 = vst [vmem:[#allocation175_spill] sm:$0xff] %v4950_v58  ;;  %v1939_v51 = vand.u32 4294901760, %v448_v59  ;;  %v4960_v15 = vpack.c.bf16 %v647_v43, %v643_v23  ;;  %v4962_v45 = vsub.f32 %v511_v40, %v643_v23  ;;  %v4969_v58 = vsub.f32 %v510_v53, %v645_v20 }
 0x1d2   :  { %7076 = vst [vmem:[#allocation176_spill] sm:$0xff] %v4952_v30  ;;  %7077 = vst [vmem:[#allocation177_spill] sm:$0xff] %v4956_v19  ;;  %v4964_v30 = vsub.f32 %v513_v16, %v647_v43  ;;  %v4966_v13 = vpack.c.bf16 %v649_v2, %v645_v20  ;;  %3663 = vmatpush1.bf16.msra.mxu0 %v4956_v19  ;;  %v4971_v35 = vsub.f32 %v512_v47, %v649_v2  ;;  %v7091_v19 = vld [vmem:[#allocation24_spill] sm:$0xff] }
 0x1d3   :  { %7078 = vst [vmem:[#allocation178_spill] sm:$0xff] %v4958_v56  ;;  %7079 = vst [vmem:[#allocation179_spill] sm:$0xff] %v4960_v15  ;;  %v4973_v10 = vpack.c.bf16 %v1939_v51, %v1935_v17  ;;  %v4975_v39 = vsub.f32 %v446_v54, %v1935_v17  ;;  %3281 = vmatprep.subr.bf16.mxu1 %v4960_v15  ;;  %v4978_v52 = vsub.f32 %v448_v59, %v1939_v51  ;;  %v7092_v15 = vld [vmem:[#allocation25_spill] sm:$0xff] }
 0x1d4   :  { %7080 = vst [vmem:[#allocation180_spill] sm:$0xff] %v4962_v45  ;;  %7081 = vst [vmem:[#allocation181_spill] sm:$0xff] %v4964_v30  ;;  %v1937_v23 = vand.u32 4294901760, %v445_v24  ;;  %v1941_v40 = vand.u32 4294901760, %v447_v25  ;;  %3283 = vmatpush1.bf16.msra.mxu1 %v4966_v13  ;;  %v6635_v16 = vand.u32 4294901760, %v4276_v61  ;;  %v6640_v53 = vand.u32 4294901760, %v4278_v62 }
 0x1d5   :  { %7082 = vst [vmem:[#allocation182_spill] sm:$0xff] %v4966_v13  ;;  %7083 = vst [vmem:[#allocation183_spill] sm:$0xff] %v4969_v58  ;;  %3665 = vmatprep.subr.bf16.mxu0 %v4973_v10  ;;  %v6645_v17 = vand.u32 4294901760, %v4288_v6  ;;  %v7114_v58 = vld [vmem:[#allocation43_spill] sm:$0xff] }
 0x1d6   :  { %7084 = vst [vmem:[#allocation184_spill] sm:$0xff] %v4971_v35  ;;  %7085 = vst [vmem:[#allocation185_spill] sm:$0xff] %v4973_v10  ;;  %v4984_v47 = vpack.c.bf16 %v1941_v40, %v1937_v23  ;;  %v4986_v43 = vsub.f32 %v445_v24, %v1937_v23  ;;  %v4988_v54 = vsub.f32 %v447_v25, %v1941_v40  ;;  %v6655_v24 = vand.u32 4294901760, %v4291_v8 }
 0x1d7   :  { %7086 = vst [vmem:[#allocation186_spill] sm:$0xff] %v4975_v39  ;;  %7087 = vst [vmem:[#allocation187_spill] sm:$0xff] %v4978_v52  ;;  %v671_v59 = vsub.f32 %v4276_v61, %v6635_v16  ;;  %v683_v20 = vsub.f32 %v4278_v62, %v6640_v53  ;;  %v1963_v2 = vsub.f32 %v4288_v6, %v6645_v17  ;;  %v6658_v53 = vand.u32 4294901760, %v4280_v63  ;;  %v7095_v61 = vld [vmem:[#allocation30_spill] sm:$0xff]  ;;  %v7099_v6 = vld [vmem:[#allocation35_spill] sm:$0xff] }
 0x1d8   :  { %7088 = vst [vmem:[#allocation188_spill] sm:$0xff] %v4984_v47  ;;  %7089 = vst [vmem:[#allocation189_spill] sm:$0xff] %v4986_v43  ;;  %3667 = vmatpush1.bf16.msra.mxu0 %v4984_v47  ;;  %v1975_v40 = vsub.f32 %v4291_v8, %v6655_v24  ;;  %v6661_v47 = vand.u32 4294901760, %v4284_v4  ;;  %v7100_v17 = vld [vmem:[#allocation37_spill] sm:$0xff]  ;;  %v7107_v52 = vld [vmem:[#allocation40_spill] sm:$0xff] }
 0x1d9   :  { %7090 = vst [vmem:[#allocation190_spill] sm:$0xff] %v4988_v54  ;;  %v672_v51 = vand.u32 4294901760, %v671_v59  ;;  %v684_v25 = vand.u32 4294901760, %v683_v20  ;;  %v1964_v23 = vand.u32 4294901760, %v1963_v2  ;;  %v7093_v59 = vld [vmem:[#allocation26_spill] sm:$0xff]  ;;  %v7094_v2 = vld [vmem:[#allocation28_spill] sm:$0xff] }
 0x1da   :  { %v1976_v10 = vand.u32 4294901760, %v1975_v40  ;;  %v7098_v40 = vld [vmem:[#allocation34_spill] sm:$0xff]  ;;  %v7101_v54 = vand.u32 4294901760, %v7091_v19  ;;  %v7105_v20 = vand.u32 4294901760, %v7095_v61 }
 0x1db   :  { %v3284_v16 = vpack.c.bf16 %v684_v25, %v672_v51  ;;  %v7097_v25 = vld [vmem:[#allocation32_spill] sm:$0xff] }
 0x1dc   :  { %v3668_v13 = vpack.c.bf16 %v1976_v10, %v1964_v23  ;;  %v7096_v10 = vld [vmem:[#allocation31_spill] sm:$0xff]  ;;  %v1969_v8 = vsub.f32 %v7091_v19, %v7101_v54  ;;  %v7104_v23 = vand.u32 4294901760, %v7094_v2  ;;  %v701_v62 = vsub.f32 %v7095_v61, %v7105_v20  ;;  %v7118_v61 = vld [vmem:[#allocation46_spill] sm:$0xff] }
 0x1dd   :  { %3285 = vmatprep.subr.bf16.mxu1 %v3284_v16  ;;  %v677_v16 = vsub.f32 %v4280_v63, %v6658_v53  ;;  %v7102_v53 = vand.u32 4294901760, %v7092_v15  ;;  %v7111_v20 = vand.u32 4294901760, %v7099_v6  ;;  %v7112_v54 = vand.u32 4294901760, %v7100_v17 }
 0x1de   :  { %3669 = vmatprep.subr.bf16.mxu0 %v3668_v13  ;;  %v689_v13 = vsub.f32 %v4284_v4, %v6661_v47  ;;  %v7103_v47 = vand.u32 4294901760, %v7093_v59  ;;  %v707_v24 = vsub.f32 %v7094_v2, %v7104_v23  ;;  %v7106_v4 = vld [vmem:[#allocation39_spill] sm:$0xff]  ;;  %v7110_v23 = vand.u32 4294901760, %v7098_v40 }
 0x1df   :  { %v1981_v63 = vsub.f32 %v7092_v15, %v7102_v53  ;;  %v678_v19 = vand.u32 4294901760, %v677_v16  ;;  %v7108_v53 = vand.u32 4294901760, %v7096_v10  ;;  %v1993_v43 = vsub.f32 %v7099_v6, %v7111_v20 }
 0x1e0   :  { %v695_v51 = vsub.f32 %v7093_v59, %v7103_v47  ;;  %v690_v39 = vand.u32 4294901760, %v689_v13  ;;  %v7109_v47 = vand.u32 4294901760, %v7097_v25  ;;  %v1999_v2 = vsub.f32 %v7098_v40, %v7110_v23  ;;  %v7113_v13 = vld [vmem:[#allocation42_spill] sm:$0xff] }
 0x1e1   :  { %v713_v15 = vsub.f32 %v7096_v10, %v7108_v53  ;;  %v2005_v16 = vsub.f32 %v7100_v17, %v7112_v54  ;;  %v1970_v35 = vand.u32 4294901760, %v1969_v8  ;;  %v1982_v53 = vand.u32 4294901760, %v1981_v63  ;;  %v7117_v54 = vld [vmem:[#allocation45_spill] sm:$0xff] }
 0x1e2   :  { %v1987_v59 = vsub.f32 %v7097_v25, %v7109_v47  ;;  %v696_v10 = vand.u32 4294901760, %v695_v51  ;;  %v708_v47 = vand.u32 4294901760, %v707_v24  ;;  %v702_v25 = vand.u32 4294901760, %v701_v62 }
 0x1e3   :  { %v7115_v45 = vand.u32 4294901760, %v7106_v4  ;;  %v7116_v40 = vand.u32 4294901760, %v7107_v52  ;;  %v714_v6 = vand.u32 4294901760, %v713_v15  ;;  %v2000_v63 = vand.u32 4294901760, %v1999_v2 }
 0x1e4   :  { %v1988_v56 = vand.u32 4294901760, %v1987_v59  ;;  %v1994_v51 = vand.u32 4294901760, %v1993_v43  ;;  %v2006_v36 = vand.u32 4294901760, %v2005_v16  ;;  %v7119_v24 = vand.u32 4294901760, %v7113_v13 }
 0x1e5   :  { %v719_v23 = vsub.f32 %v7106_v4, %v7115_v45  ;;  %v731_v20 = vsub.f32 %v7107_v52, %v7116_v40  ;;  %v5070_v30 = vpack.c.bf16 %v690_v39, %v678_v19  ;;  %v7120_v45 = vand.u32 4294901760, %v7114_v58  ;;  %v7122_v52 = vld [vmem:[#allocation48_spill] sm:$0xff]  ;;  %v7125_v39 = vld [vmem:[#allocation49_spill] sm:$0xff] }
 0x1e6   :  { %v5068_v62 = vsub.f32 %v7113_v13, %v7119_v24  ;;  %v5075_v15 = vpack.c.bf16 %v1982_v53, %v1970_v35  ;;  %v5078_v2 = vpack.c.bf16 %v708_v47, %v696_v10  ;;  %v7123_v43 = vand.u32 4294901760, %v7117_v54  ;;  %v7129_v47 = vld [vmem:[#allocation51_spill] sm:$0xff] }
 0x1e7   :  { %v737_v40 = vsub.f32 %v7114_v58, %v7120_v45  ;;  %v720_v59 = vand.u32 4294901760, %v719_v23  ;;  %v732_v17 = vand.u32 4294901760, %v731_v20  ;;  %v7124_v24 = vand.u32 4294901760, %v7118_v61  ;;  %v7130_v45 = vld [vmem:[#allocation52_spill] sm:$0xff]  ;;  %v7137_v20 = vld [vmem:[#allocation58_spill] sm:$0xff] }
 0x1e8   :  { %7121 = vst [vmem:[#allocation191_spill] sm:$0xff] %v5075_v15  ;;  %v2011_v16 = vsub.f32 %v7117_v54, %v7123_v43  ;;  %v5087_v4 = vpack.c.bf16 %v714_v6, %v702_v25  ;;  %v5089_v35 = vpack.c.bf16 %v2000_v63, %v1988_v56  ;;  %v5091_v53 = vpack.c.bf16 %v2006_v36, %v1994_v51  ;;  %v7131_v43 = vld [vmem:[#allocation55_spill] sm:$0xff]  ;;  %v7134_v25 = vld [vmem:[#allocation56_spill] sm:$0xff]  ;;  %v7135_v63 = vld [vmem:[#allocation57_spill] sm:$0xff] }
 0x1e9   :  { %v2023_v19 = vsub.f32 %v7118_v61, %v7124_v24  ;;  %v726_v23 = vand.u32 4294901760, %v5068_v62  ;;  %v738_v10 = vand.u32 4294901760, %v737_v40  ;;  %v5097_v58 = vpack.c.bf16 %v732_v17, %v720_v59  ;;  %v7138_v61 = vld [vmem:[#allocation60_spill] sm:$0xff]  ;;  %v7139_v17 = vld [vmem:[#allocation61_spill] sm:$0xff]  ;;  %v7164_v15 = vld [vmem:[#allocation75_spill] sm:$0xff] }
 0x1ea   :  { %7126 = vst [vmem:[#allocation192_spill] sm:$0xff] %v5087_v4  ;;  %7127 = vst [vmem:[#allocation193_spill] sm:$0xff] %v5089_v35  ;;  %v7133_v24 = vand.u32 4294901760, %v7122_v52  ;;  %v2012_v51 = vand.u32 4294901760, %v2011_v16  ;;  %v7136_v62 = vand.u32 4294901760, %v7125_v39  ;;  %v7142_v56 = vand.u32 4294901760, %v7129_v47 }
 0x1eb   :  { %7128 = vst [vmem:[#allocation194_spill] sm:$0xff] %v5091_v53  ;;  %7132 = vst [vmem:[#allocation195_spill] sm:$0xff] %v5097_v58  ;;  %v2024_v13 = vand.u32 4294901760, %v2023_v19  ;;  %v7143_v16 = vand.u32 4294901760, %v7130_v45  ;;  %v7146_v59 = vand.u32 4294901760, %v7134_v25  ;;  %v5160_v4 = vpack.c.bf16 %v738_v10, %v726_v23 }
 0x1ec   :  { %v2017_v6 = vsub.f32 %v7122_v52, %v7133_v24  ;;  %v2029_v40 = vsub.f32 %v7125_v39, %v7136_v62  ;;  %v743_v36 = vsub.f32 %v7129_v47, %v7142_v56  ;;  %v7144_v62 = vand.u32 4294901760, %v7131_v43  ;;  %v7145_v39 = vld [vmem:[#allocation65_spill] sm:$0xff]  ;;  %v7148_v56 = vld [vmem:[#allocation67_spill] sm:$0xff] }
 0x1ed   :  { %v755_v19 = vsub.f32 %v7130_v45, %v7143_v16  ;;  %v761_v33 = vsub.f32 %v7134_v25, %v7146_v59  ;;  %v7147_v24 = vand.u32 4294901760, %v7135_v63  ;;  %v7149_v16 = vand.u32 4294901760, %v7137_v20 }
 0x1ee   :  { %v749_v8 = vsub.f32 %v7131_v43, %v7144_v62  ;;  %v2018_v52 = vand.u32 4294901760, %v2017_v6  ;;  %v2030_v5 = vand.u32 4294901760, %v2029_v40  ;;  %v7151_v43 = vld [vmem:[#allocation70_spill] sm:$0xff]  ;;  %v7152_v6 = vand.u32 4294901760, %v7138_v61 }
 0x1ef   :  { %v2035_v53 = vsub.f32 %v7135_v63, %v7147_v24  ;;  %v2047_v45 = vsub.f32 %v7137_v20, %v7149_v16  ;;  %v7153_v59 = vand.u32 4294901760, %v7139_v17  ;;  %v7154_v24 = vand.u32 4294901760, %v7140_v9 }
 0x1f0   :  { %v2041_v50 = vsub.f32 %v7138_v61, %v7152_v6  ;;  %v7155_v47 = vand.u32 4294901760, %v7141_v29  ;;  %v744_v20 = vand.u32 4294901760, %v743_v36  ;;  %v756_v62 = vand.u32 4294901760, %v755_v19  ;;  %v7161_v19 = vld [vmem:[#allocation73_spill] sm:$0xff] }
 0x1f1   :  { %v2053_v25 = vsub.f32 %v7139_v17, %v7153_v59  ;;  %v767_v40 = vsub.f32 %v7140_v9, %v7154_v24  ;;  %v750_v63 = vand.u32 4294901760, %v749_v8  ;;  %v7156_v54 = vand.u32 4294901760, %v7145_v39  ;;  %v7158_v17 = vld [vmem:[#allocation72_spill] sm:$0xff] }
 0x1f2   :  { %v779_v16 = vsub.f32 %v7141_v29, %v7155_v47  ;;  %v762_v6 = vand.u32 4294901760, %v761_v33  ;;  %v2036_v61 = vand.u32 4294901760, %v2035_v53  ;;  %v7157_v26 = vand.u32 4294901760, %v7148_v56 }
 0x1f3   :  { %v773_v58 = vsub.f32 %v7145_v39, %v7156_v54  ;;  %v2048_v24 = vand.u32 4294901760, %v2047_v45  ;;  %v7159_v9 = vand.u32 4294901760, %v7150_v55  ;;  %v7160_v36 = vand.u32 4294901760, %v7151_v43 }
 0x1f4   :  { %v785_v59 = vsub.f32 %v7148_v56, %v7157_v26  ;;  %v2042_v54 = vand.u32 4294901760, %v2041_v50  ;;  %v2054_v33 = vand.u32 4294901760, %v2053_v25  ;;  %v768_v53 = vand.u32 4294901760, %v767_v40 }
 0x1f5   :  { %v2059_v47 = vsub.f32 %v7150_v55, %v7159_v9  ;;  %v2071_v8 = vsub.f32 %v7151_v43, %v7160_v36  ;;  %v780_v39 = vand.u32 4294901760, %v779_v16  ;;  %v5162_v26 = vpack.c.bf16 %v2024_v13, %v2012_v51  ;;  %v7165_v43 = vld [vmem:[#allocation76_spill] sm:$0xff]  ;;  %v7172_v51 = vld [vmem:[#allocation77_spill] sm:$0xff] }
 0x1f6   :  { %v5164_v35 = vpack.c.bf16 %v2030_v5, %v2018_v52  ;;  %v774_v45 = vand.u32 4294901760, %v773_v58  ;;  %v786_v56 = vand.u32 4294901760, %v785_v59  ;;  %v7163_v9 = vand.u32 4294901760, %v7158_v17  ;;  %v7173_v59 = vld [vmem:[#allocation79_spill] sm:$0xff] }
 0x1f7   :  { %v5171_v50 = vpack.c.bf16 %v756_v62, %v744_v20  ;;  %v2060_v25 = vand.u32 4294901760, %v2059_v47  ;;  %v2072_v40 = vand.u32 4294901760, %v2071_v8  ;;  %v7167_v23 = vand.u32 4294901760, %v7161_v19  ;;  %v7174_v20 = vld [vmem:[#allocation81_spill] sm:$0xff]  ;;  %v7175_v47 = vld [vmem:[#allocation82_spill] sm:$0xff] }
 0x1f8   :  { %7162 = vst [vmem:[#allocation196_spill] sm:$0xff] %v5164_v35  ;;  %v2065_v55 = vsub.f32 %v7158_v17, %v7163_v9  ;;  %v5176_v5 = vpack.c.bf16 %v762_v6, %v750_v63  ;;  %v5178_v52 = vpack.c.bf16 %v2048_v24, %v2036_v61  ;;  %v5180_v58 = vpack.c.bf16 %v2054_v33, %v2042_v54  ;;  %v7180_v33 = vld [vmem:[#allocation84_spill] sm:$0xff]  ;;  %v7182_v9 = vld [vmem:[#allocation87_spill] sm:$0xff] }
 0x1f9   :  { %7166 = vst [vmem:[#allocation197_spill] sm:$0xff] %v5171_v50  ;;  %v2077_v13 = vsub.f32 %v7161_v19, %v7167_v23  ;;  %v5182_v10 = vpack.c.bf16 %v780_v39, %v768_v53  ;;  %v5188_v29 = vpack.c.bf16 %v786_v56, %v774_v45  ;;  %v7177_v63 = vand.u32 4294901760, %v7164_v15  ;;  %v7181_v23 = vld [vmem:[#allocation85_spill] sm:$0xff]  ;;  %v7183_v56 = vld [vmem:[#allocation88_spill] sm:$0xff]  ;;  %v7185_v19 = vld [vmem:[#allocation91_spill] sm:$0xff] }
 0x1fa   :  { %7168 = vst [vmem:[#allocation198_spill] sm:$0xff] %v5176_v5  ;;  %7169 = vst [vmem:[#allocation199_spill] sm:$0xff] %v5178_v52  ;;  %v2066_v36 = vand.u32 4294901760, %v2065_v55  ;;  %v7178_v6 = vand.u32 4294901760, %v7165_v43  ;;  %v5196_v24 = vpack.c.bf16 %v2072_v40, %v2060_v25  ;;  %v7184_v55 = vld [vmem:[#allocation89_spill] sm:$0xff]  ;;  %v7187_v25 = vand.u32 4294901760, %v7173_v59 }
 0x1fb   :  { %7170 = vst [vmem:[#allocation200_spill] sm:$0xff] %v5180_v58  ;;  %7171 = vst [vmem:[#allocation201_spill] sm:$0xff] %v5182_v10  ;;  %v791_v61 = vsub.f32 %v7164_v15, %v7177_v63  ;;  %v2078_v54 = vand.u32 4294901760, %v2077_v13  ;;  %v7186_v63 = vand.u32 4294901760, %v7172_v51  ;;  %v7188_v13 = vand.u32 4294901760, %v7174_v20  ;;  %v7190_v53 = vld [vmem:[#allocation93_spill] sm:$0xff] }
 0x1fc   :  { %7176 = vst [vmem:[#allocation202_spill] sm:$0xff] %v5188_v29  ;;  %v803_v39 = vsub.f32 %v7165_v43, %v7178_v6  ;;  %7179 = vst [vmem:[#allocation203_spill] sm:$0xff] %v5196_v24  ;;  %v809_v40 = vsub.f32 %v7173_v59, %v7187_v25  ;;  %v7189_v8 = vand.u32 4294901760, %v7175_v47  ;;  %v7191_v43 = vld [vmem:[#allocation94_spill] sm:$0xff]  ;;  %v7193_v25 = vand.u32 4294901760, %v7181_v23  ;;  %v7194_v29 = vld [vmem:[#allocation96_spill] sm:$0xff] }
 0x1fd   :  { %v797_v15 = vsub.f32 %v7172_v51, %v7186_v63  ;;  %v2083_v6 = vsub.f32 %v7174_v20, %v7188_v13  ;;  %v792_v62 = vand.u32 4294901760, %v791_v61  ;;  %v7192_v63 = vand.u32 4294901760, %v7180_v33  ;;  %v7195_v20 = vld [vmem:[#allocation97_spill] sm:$0xff]  ;;  %v7203_v5 = vld [vmem:[#allocation100_spill] sm:$0xff] }
 0x1fe   :  { %v2095_v45 = vsub.f32 %v7175_v47, %v7189_v8  ;;  %v804_v16 = vand.u32 4294901760, %v803_v39  ;;  %v2101_v59 = vsub.f32 %v7181_v23, %v7193_v25  ;;  %v7196_v8 = vand.u32 4294901760, %v7182_v9 }
 0x1ff   :  { %v2089_v51 = vsub.f32 %v7180_v33, %v7192_v63  ;;  %v7197_v39 = vand.u32 4294901760, %v7183_v56  ;;  %v7198_v17 = vand.u32 4294901760, %v7184_v55  ;;  %v7199_v33 = vand.u32 4294901760, %v7185_v19 }
 0x200   :  { %v815_v61 = vsub.f32 %v7182_v9, %v7196_v8  ;;  %v798_v23 = vand.u32 4294901760, %v797_v15  ;;  %v810_v13 = vand.u32 4294901760, %v809_v40  ;;  %v2084_v47 = vand.u32 4294901760, %v2083_v6 }
 0x201   :  { %v827_v24 = vsub.f32 %v7183_v56, %v7197_v39  ;;  %v821_v63 = vsub.f32 %v7184_v55, %v7198_v17  ;;  %v833_v25 = vsub.f32 %v7185_v19, %v7199_v33  ;;  %v2096_v58 = vand.u32 4294901760, %v2095_v45  ;;  %v7202_v56 = vld [vmem:[#allocation99_spill] sm:$0xff] }
 0x202   :  { %v7200_v10 = vand.u32 4294901760, %v7190_v53  ;;  %v7201_v9 = vand.u32 4294901760, %v7191_v43  ;;  %v2090_v55 = vand.u32 4294901760, %v2089_v51  ;;  %v2102_v35 = vand.u32 4294901760, %v2101_v59  ;;  %v7208_v51 = vld [vmem:[#allocation101_spill] sm:$0xff] }
 0x203   :  { %v7204_v33 = vand.u32 4294901760, %v7194_v29  ;;  %v7205_v45 = vand.u32 4294901760, %v7195_v20  ;;  %v816_v6 = vand.u32 4294901760, %v815_v61  ;;  %v834_v19 = vand.u32 4294901760, %v833_v25  ;;  %v7223_v25 = vld [vmem:[#allocation112_spill] sm:$0xff] }
 0x204   :  { %v2107_v8 = vsub.f32 %v7190_v53, %v7200_v10  ;;  %v2119_v39 = vsub.f32 %v7191_v43, %v7201_v9  ;;  %v828_v10 = vand.u32 4294901760, %v827_v24  ;;  %v822_v53 = vand.u32 4294901760, %v821_v63  ;;  %v7215_v63 = vld [vmem:[#allocation103_spill] sm:$0xff] }
 0x205   :  { %v2113_v15 = vsub.f32 %v7194_v29, %v7204_v33  ;;  %v2125_v40 = vsub.f32 %v7195_v20, %v7205_v45  ;;  %v5252_v50 = vpack.c.bf16 %v2078_v54, %v2066_v36  ;;  %v5254_v9 = vpack.c.bf16 %v804_v16, %v792_v62 }
 0x206   :  { %v5256_v52 = vpack.c.bf16 %v810_v13, %v798_v23  ;;  %v6732_v59 = vand.u32 4294901760, %v7208_v51  ;;  %v2108_v17 = vand.u32 4294901760, %v2107_v8  ;;  %v2120_v43 = vand.u32 4294901760, %v2119_v39  ;;  %v7216_v8 = vld [vmem:[#allocation105_spill] sm:$0xff] }
 0x207   :  { %7206 = vst [vmem:[#allocation204_spill] sm:$0xff] %v5252_v50  ;;  %v7209_v33 = vand.u32 4294901760, %v7202_v56  ;;  %v7210_v45 = vand.u32 4294901760, %v7203_v5  ;;  %v5265_v61 = vpack.c.bf16 %v2096_v58, %v2084_v47  ;;  %v5267_v36 = vpack.c.bf16 %v2102_v35, %v2090_v55  ;;  %v7218_v47 = vld [vmem:[#allocation108_spill] sm:$0xff]  ;;  %v7219_v55 = vld [vmem:[#allocation109_spill] sm:$0xff] }
 0x208   :  { %7207 = vst [vmem:[#allocation205_spill] sm:$0xff] %v5256_v52  ;;  %v2114_v16 = vand.u32 4294901760, %v2113_v15  ;;  %v2126_v62 = vand.u32 4294901760, %v2125_v40  ;;  %v5269_v23 = vpack.c.bf16 %v828_v10, %v816_v6  ;;  %v5271_v13 = vpack.c.bf16 %v834_v19, %v822_v53  ;;  %v7221_v19 = vld [vmem:[#allocation111_spill] sm:$0xff] }
 0x209   :  { %v839_v29 = vsub.f32 %v7202_v56, %v7209_v33  ;;  %v851_v24 = vsub.f32 %v7203_v5, %v7210_v45  ;;  %7211 = vst [vmem:[#allocation206_spill] sm:$0xff] %v5265_v61  ;;  %7212 = vst [vmem:[#allocation207_spill] sm:$0xff] %v5267_v36  ;;  %v260_v54 = vpop.permute.xlu1 %259  ;;  %v845_v33 = vsub.f32 %v7208_v51, %v6732_v59  ;;  %v7217_v45 = vld [vmem:[#allocation106_spill] sm:$0xff]  ;;  %v7226_v58 = vand.u32 4294901760, %v7215_v63 }
 0x20a   :  { %7213 = vst [vmem:[#allocation208_spill] sm:$0xff] %v5269_v23  ;;  %7214 = vst [vmem:[#allocation209_spill] sm:$0xff] %v5271_v13  ;;  %v5281_v40 = vpack.c.bf16 %v2120_v43, %v2108_v17  ;;  %v5284_v20 = vpack.c.bf16 %v2126_v62, %v2114_v16  ;;  %v7224_v5 = vld [vmem:[#allocation126_spill] sm:$0xff]  ;;  %v7225_v13 = vld [vmem:[#allocation127_spill] sm:$0xff]  ;;  %v7227_v15 = vand.u32 4294901760, %v7216_v8  ;;  %v7230_v39 = vand.u32 4294901760, %v7217_v45  ;;  %v255_v52 = vpop.permute.xlu0 %254 }
 0x20b   :  { %v840_v6 = vand.u32 4294901760, %v839_v29  ;;  %v852_v10 = vand.u32 4294901760, %v851_v24  ;;  %v857_v35 = vsub.f32 %v7215_v63, %v7226_v58  ;;  %v7228_v29 = vld [vmem:[#allocation128_spill] sm:$0xff]  ;;  %v7229_v24 = vld [vmem:[#allocation129_spill] sm:$0xff]  ;;  %v846_v62 = vand.u32 4294901760, %v845_v33 }
 0x20c   :  { %7220 = vst [vmem:[#allocation210_spill] sm:$0xff] %v5281_v40  ;;  %7222 = vst [vmem:[#allocation211_spill] sm:$0xff] %v5284_v20  ;;  %v2131_v43 = vsub.f32 %v7216_v8, %v7227_v15  ;;  %v2143_v56 = vsub.f32 %v7217_v45, %v7230_v39  ;;  %v7231_v59 = vand.u32 4294901760, %v7218_v47  ;;  %v7232_v58 = vand.u32 4294901760, %v7219_v55  ;;  %v7235_v8 = vld [vmem:[#allocation132_spill] sm:$0xff]  ;;  %v7236_v20 = vld [vmem:[#allocation133_spill] sm:$0xff] }
 0x20d   :  { %v5308_v15 = vpack.c.bf16 %v852_v10, %v840_v6  ;;  %v7234_v17 = vand.u32 4294901760, %v7221_v19  ;;  %v7237_v39 = vand.u32 4294901760, %v7223_v25  ;;  %v7240_v10 = vld [vmem:[#allocation130_spill] sm:$0xff]  ;;  %v7242_v40 = vand.u32 4294901760, %v7229_v24 }
 0x20e   :  { %v5297_v16 = vpop.permute.xlu1 %274  ;;  %v2137_v51 = vsub.f32 %v7218_v47, %v7231_v59  ;;  %v2149_v63 = vsub.f32 %v7219_v55, %v7232_v58  ;;  %v7238_v59 = vand.u32 4294901760, %v7224_v5  ;;  %v7239_v58 = vand.u32 4294901760, %v7225_v13 }
 0x20f   :  { %7233 = vst [vmem:[#allocation212_spill] sm:$0xff] %v5308_v15  ;;  %v863_v53 = vsub.f32 %v7221_v19, %v7234_v17  ;;  %v875_v45 = vsub.f32 %v7223_v25, %v7237_v39  ;;  %v858_v15 = vand.u32 4294901760, %v857_v35  ;;  %v7241_v17 = vand.u32 4294901760, %v7228_v29  ;;  %v7243_v39 = vld [vmem:[#allocation131_spill] sm:$0xff] }
 0x210   :  { %v869_v47 = vsub.f32 %v7224_v5, %v7238_v59  ;;  %v881_v6 = vsub.f32 %v7225_v13, %v7239_v58  ;;  %v2167_v19 = vsub.f32 %v7229_v24, %v7242_v40  ;;  %v2132_v23 = vand.u32 4294901760, %v2131_v43 }
 0x211   :  { %v2155_v33 = vsub.f32 %v7228_v29, %v7241_v17  ;;  %v2144_v59 = vand.u32 4294901760, %v2143_v56  ;;  %v2138_v5 = vand.u32 4294901760, %v2137_v51  ;;  %v2150_v61 = vand.u32 4294901760, %v2149_v63 }
 0x212   :  { %v280_v36 = vpop.permute.xlu1 %279  ;;  %v864_v58 = vand.u32 4294901760, %v863_v53  ;;  %v7244_v55 = vand.u32 4294901760, %v7235_v8  ;;  %v7245_v13 = vand.u32 4294901760, %v7236_v20  ;;  %v876_v40 = vand.u32 4294901760, %v875_v45  ;;  %v4060_v45 = vld [vmem:[#allocation3 + $0x18] sm:$0xff] }
 0x213   :  { %v870_v24 = vand.u32 4294901760, %v869_v47  ;;  %v882_v25 = vand.u32 4294901760, %v881_v6  ;;  %v7246_v43 = vand.u32 4294901760, %v7240_v10  ;;  %v2156_v51 = vand.u32 4294901760, %v2155_v33  ;;  %v4061_v6 = vld [vmem:[#allocation3] sm:$0xff] }
 0x214   :  { %v887_v35 = vsub.f32 %v7235_v8, %v7244_v55  ;;  %v899_v17 = vsub.f32 %v7236_v20, %v7245_v13  ;;  %v2168_v63 = vand.u32 4294901760, %v2167_v19  ;;  %v7248_v53 = vand.u32 4294901760, %v7243_v39  ;;  %v4059_v13 = vld [vmem:[#allocation3 + $0x10] sm:$0xff] }
 0x215   :  { %v5342_v56 = vsub.f32 %v7240_v10, %v7246_v43  ;;  %v5350_v20 = vmul.f32 %v4059_v13, %v260_v54  ;;  %v5352_v47 = vmul.f32 %v4060_v45, %v260_v54  ;;  %v5354_v29 = vmul.f32 %v4061_v6, %v255_v52  ;;  %v4062_v43 = vld [vmem:[#allocation3 + $0x8] sm:$0xff] }
 0x216   :  { %v5347_v55 = vsub.f32 %v7243_v39, %v7248_v53  ;;  %v5356_v10 = vmul.f32 %v4062_v43, %v255_v52  ;;  %v265_v19 = vpop.permute.xlu1 %264  ;;  %v5358_v33 = vpack.c.bf16 %v858_v15, %v846_v62  ;;  %v888_v50 = vand.u32 4294901760, %v887_v35  ;;  %v4065_v43 = vld [vmem:[#allocation3 + $0x40] sm:$0xff] }
 0x217   :  { %7247 = vst [vmem:[#allocation213_spill] sm:$0xff] %v5342_v56  ;;  %7250 = vst [vmem:[#allocation215_spill] sm:$0xff] %v5350_v20  ;;  %v900_v53 = vand.u32 4294901760, %v899_v17  ;;  %v7254_v39 = vand.u32 4294901760, %v4770_v44  ;;  %v5365_v13 = vpack.c.bf16 %v2144_v59, %v2132_v23  ;;  %v5367_v54 = vpack.c.bf16 %v2150_v61, %v2138_v5  ;;  %v4063_v61 = vld [vmem:[#allocation3 + $0x20] sm:$0xff] }
 0x218   :  { %7249 = vst [vmem:[#allocation214_spill] sm:$0xff] %v5347_v55  ;;  %7251 = vst [vmem:[#allocation216_spill] sm:$0xff] %v5352_v47  ;;  %v5369_v45 = vpack.c.bf16 %v876_v40, %v864_v58  ;;  %v5371_v6 = vpack.c.bf16 %v882_v25, %v870_v24  ;;  %v5373_v52 = vpack.c.bf16 %v2168_v63, %v2156_v51  ;;  %v7258_v35 = vand.u32 4294901760, %v4775_v18  ;;  %v4064_v24 = vld [vmem:[#allocation3 + $0x28] sm:$0xff] }
 0x219   :  { %7252 = vst [vmem:[#allocation217_spill] sm:$0xff] %v5354_v29  ;;  %7253 = vst [vmem:[#allocation218_spill] sm:$0xff] %v5356_v10  ;;  %v5363_v8 = vsub.f32 %v4770_v44, %v7254_v39  ;;  %v308_v23 = vadd.f32 %v5350_v20, %v5354_v29  ;;  %v317_v5 = vadd.f32 %v5352_v47, %v5356_v10 }
 0x21a   :  { %7256 = vst [vmem:[#allocation220_spill] sm:$0xff] %v5371_v6  ;;  %7257 = vst [vmem:[#allocation221_spill] sm:$0xff] %v5373_v52  ;;  %v5380_v17 = vsub.f32 %v4775_v18, %v7258_v35  ;;  %v5386_v25 = vmul.f32 %v4063_v61, %v265_v19  ;;  %v5388_v39 = vmul.f32 %v4064_v24, %v265_v19  ;;  %v285_v59 = vpop.permute.xlu1 %284  ;;  %v4066_v61 = vld [vmem:[#allocation3 + $0x50] sm:$0xff]  ;;  %v4067_v19 = vld [vmem:[#allocation3 + $0x58] sm:$0xff] }
 0x21b   :  { %7255 = vst [vmem:[#allocation219_spill] sm:$0xff] %v5363_v8  ;;  %v349_v58 = vmax.f32 %v5354_v29, %v5350_v20  ;;  %v358_v40 = vmax.f32 %v5356_v10, %v5352_v47  ;;  %v5394_v51 = vpack.c.bf16 %v900_v53, %v888_v50  ;;  %v5398_v35 = vmul.f32 %v4065_v43, %v5297_v16  ;;  %v4068_v20 = vld [vmem:[#allocation3 + $0x48] sm:$0xff]  ;;  %v4069_v47 = vld [vmem:[#allocation3 + $0x60] sm:$0xff]  ;;  %v4071_v50 = vld [vmem:[#allocation3 + $0x30] sm:$0xff] }
 0x21c   :  { %7259 = vst [vmem:[#allocation222_spill] sm:$0xff] %v5380_v17  ;;  %7260 = vst [vmem:[#allocation223_spill] sm:$0xff] %v5386_v25  ;;  %v5400_v15 = vmul.f32 %v4066_v61, %v280_v36  ;;  %v5402_v24 = vmul.f32 %v4067_v19, %v280_v36  ;;  %v5406_v29 = vmul.f32 %v4068_v20, %v5297_v16  ;;  %v4070_v36 = vld [vmem:[#allocation3 + $0x68] sm:$0xff]  ;;  %v4072_v53 = vld [vmem:[#allocation3 + $0x38] sm:$0xff] }
 0x21d   :  { %7261 = vst [vmem:[#allocation224_spill] sm:$0xff] %v5388_v39  ;;  %7262 = vst [vmem:[#allocation225_spill] sm:$0xff] %v5394_v51  ;;  %v309_v43 = vadd.f32 %v308_v23, %v5386_v25  ;;  %v318_v61 = vadd.f32 %v317_v5, %v5388_v39  ;;  %v5413_v10 = vmul.f32 %v4069_v47, %v285_v59  ;;  %v7271_v5 = vand.u32 4294901760, %v4780_v38 }
 0x21e   :  { %7263 = vst [vmem:[#allocation226_spill] sm:$0xff] %v5398_v35  ;;  %7264 = vst [vmem:[#allocation227_spill] sm:$0xff] %v5400_v15  ;;  %v5415_v19 = vmul.f32 %v4070_v36, %v285_v59  ;;  %v270_v62 = vpop.permute.xlu1 %269  ;;  %v350_v20 = vmax.f32 %v349_v58, %v5386_v25  ;;  %v359_v16 = vmax.f32 %v358_v40, %v5388_v39 }
 0x21f   :  { %7265 = vst [vmem:[#allocation228_spill] sm:$0xff] %v5402_v24  ;;  %7266 = vst [vmem:[#allocation229_spill] sm:$0xff] %v5406_v29  ;;  %v5419_v18 = vmul.f32 %v4071_v50, %v270_v62  ;;  %v5421_v63 = vmul.f32 %v4072_v53, %v270_v62  ;;  %v326_v23 = vadd.f32 %v5400_v15, %v5398_v35 }
 0x220   :  { %7267 = vst [vmem:[#allocation230_spill] sm:$0xff] %v5413_v10  ;;  %7268 = vst [vmem:[#allocation231_spill] sm:$0xff] %v5415_v19  ;;  %v335_v47 = vadd.f32 %v5402_v24, %v5406_v29  ;;  %v5430_v59 = vsub.f32 %v4780_v38, %v7271_v5  ;;  %v367_v36 = vmax.f32 %v5398_v35, %v5400_v15  ;;  %v4074_v15 = vld [vmem:[#allocation3 + $0x78] sm:$0xff] }
 0x221   :  { %7269 = vst [vmem:[#allocation232_spill] sm:$0xff] %v5419_v18  ;;  %7270 = vst [vmem:[#allocation233_spill] sm:$0xff] %v5421_v63  ;;  %v310_v40 = vadd.f32 %v309_v43, %v5419_v18  ;;  %v319_v50 = vadd.f32 %v318_v61, %v5421_v63  ;;  %v351_v62 = vmax.f32 %v350_v20, %v5419_v18 }
 0x222   :  { %v360_v53 = vmax.f32 %v359_v16, %v5421_v63  ;;  %v376_v39 = vmax.f32 %v5406_v29, %v5402_v24  ;;  %v327_v25 = vadd.f32 %v326_v23, %v5413_v10  ;;  %v336_v5 = vadd.f32 %v335_v47, %v5415_v19  ;;  %v290_v38 = vpop.permute.xlu1 %289  ;;  %v4073_v16 = vld [vmem:[#allocation3 + $0x70] sm:$0xff] }
 0x223   :  { %v311_v58 = vrot.slane %v310_v40, 4  ;;  %v320_v44 = vrot.slane %v319_v50, 4  ;;  %v352_v43 = vrot.slane %v351_v62, 4  ;;  %v368_v61 = vmax.f32 %v367_v36, %v5413_v10 }
 0x224   :  { %v361_v51 = vrot.slane %v360_v53, 4  ;;  %v377_v20 = vmax.f32 %v376_v39, %v5415_v19  ;;  %v5445_v63 = vmul.f32 %v4073_v16, %v290_v38  ;;  %v5447_v35 = vmul.f32 %v4074_v15, %v290_v38 }
 0x225   :  { %v312_v24 = vadd.f32 %v311_v58, %v310_v40  ;;  %v321_v29 = vadd.f32 %v320_v44, %v319_v50  ;;  %v353_v23 = vmax.f32 %v351_v62, %v352_v43 }
 0x226   :  { %7272 = vst [vmem:[#allocation234_spill] sm:$0xff] %v5445_v63  ;;  %7273 = vst [vmem:[#allocation235_spill] sm:$0xff] %v5447_v35  ;;  %v362_v18 = vmax.f32 %v360_v53, %v361_v51  ;;  %v328_v47 = vadd.f32 %v327_v25, %v5445_v63  ;;  %v337_v52 = vadd.f32 %v336_v5, %v5447_v35 }
 0x227   :  { %v369_v6 = vmax.f32 %v368_v61, %v5445_v63  ;;  %v378_v36 = vmax.f32 %v377_v20, %v5447_v35  ;;  %v313_v10 = vrot.slane %v312_v24, 2  ;;  %v322_v39 = vrot.slane %v321_v29, 2 }
 0x228   :  { %v354_v19 = vrot.slane %v353_v23, 2  ;;  %v363_v16 = vrot.slane %v362_v18, 2  ;;  %v329_v17 = vrot.slane %v328_v47, 4  ;;  %v338_v8 = vrot.slane %v337_v52, 4 }
 0x229   :  { %v370_v38 = vrot.slane %v369_v6, 4  ;;  %v379_v15 = vrot.slane %v378_v36, 4  ;;  %v314_v58 = vadd.f32 %v313_v10, %v312_v24  ;;  %v323_v44 = vadd.f32 %v322_v39, %v321_v29 }
 0x22a   :  { %v355_v40 = vmax.f32 %v353_v23, %v354_v19  ;;  %v364_v51 = vmax.f32 %v362_v18, %v363_v16  ;;  %v330_v25 = vadd.f32 %v329_v17, %v328_v47  ;;  %v339_v50 = vadd.f32 %v338_v8, %v337_v52 }
 0x22b   :  { %v371_v62 = vmax.f32 %v369_v6, %v370_v38  ;;  %v380_v53 = vmax.f32 %v378_v36, %v379_v15  ;;  %v315_v5 = vrot.slane %v314_v58, 1  ;;  %v324_v43 = vrot.slane %v323_v44, 1 }
 0x22c   :  { %v7274_v61 = vand.u32 4294901760, %v4785_v22  ;;  %v331_v63 = vrot.slane %v330_v25, 2  ;;  %v340_v55 = vrot.slane %v339_v50, 2  ;;  %v356_v18 = vrot.slane %v355_v40, 1 }
 0x22d   :  { %v372_v10 = vrot.slane %v371_v62, 2  ;;  %v381_v29 = vrot.slane %v380_v53, 2  ;;  %v316_v24 = vadd.f32 %v315_v5, %v314_v58  ;;  %v365_v19 = vrot.slane %v364_v51, 1 }
 0x22e   :  { %v5456_v20 = vsub.f32 %v4785_v22, %v7274_v61  ;;  %v7275_v8 = vand.u32 4294901760, %v4791_v48  ;;  %v332_v52 = vadd.f32 %v331_v63, %v330_v25  ;;  %v341_v17 = vadd.f32 %v340_v55, %v339_v50 }
 0x22f   :  { %v373_v23 = vmax.f32 %v371_v62, %v372_v10  ;;  %v382_v47 = vmax.f32 %v380_v53, %v381_v29  ;;  %v325_v36 = vadd.f32 %v324_v43, %v323_v44  ;;  %v345_v35 = vmul.f32 0.03125, %v316_v24 }
 0x230   :  { %v5462_v6 = vsub.f32 %v4791_v48, %v7275_v8  ;;  %v333_v15 = vrot.slane %v332_v52, 1  ;;  %v342_v58 = vrot.slane %v341_v17, 1  ;;  %v357_v22 = vmax.f32 %v355_v40, %v356_v18 }
 0x231   :  { %v374_v5 = vrot.slane %v373_v23, 1  ;;  %v383_v61 = vrot.slane %v382_v47, 1  ;;  %v366_v56 = vmax.f32 %v364_v51, %v365_v19  ;;  %v6778_v8 = vand.u32 4294901760, %v4869_v49 }
 0x232   :  { %v334_v63 = vadd.f32 %v333_v15, %v332_v52  ;;  %v343_v50 = vadd.f32 %v342_v58, %v341_v17  ;;  %v346_v44 = vmul.f32 0.03125, %v325_v36  ;;  %v6777_v53 = vand.u32 4294901760, %v4872_v46 }
 0x233   :  { %v375_v55 = vmax.f32 %v373_v23, %v374_v5  ;;  %v384_v25 = vmax.f32 %v382_v47, %v383_v61  ;;  %v2233_v62 = vsub.f32 %v4869_v49, %v6778_v8  ;;  %v6780_v43 = vand.u32 4294901760, %v4875_v0 }
 0x234   :  { %v347_v10 = vmul.f32 0.03125, %v334_v63  ;;  %v348_v51 = vmul.f32 0.03125, %v343_v50  ;;  %v7278_v19 = vand.u32 4294901760, %v4796_v14 }
 0x235   :  { %v520_v29 = vsel %vm518_vm1, %v384_v25, %v366_v56  ;;  %v519_v40 = vsel %vm518_vm1, %v375_v55, %v357_v22  ;;  %v2234_v17 = vand.u32 4294901760, %v2233_v62  ;;  %v2245_v56 = vsub.f32 %v4872_v46, %v6777_v53 }
 0x236   :  { %v5475_v24 = vand.u32 4294901760, %v520_v29  ;;  %v5477_v18 = vand.u32 4294901760, %v519_v40  ;;  %v5482_v52 = vsub.f32 %v4796_v14, %v7278_v19  ;;  %v1812_v23 = vsel %vm518_vm1, %v348_v51, %v346_v44 }
 0x237   :  { %v1811_v47 = vsel %vm518_vm1, %v347_v10, %v345_v35  ;;  %v959_v22 = vsub.f32 %v4875_v0, %v6780_v43  ;;  %v5498_v58 = vand.u32 4294901760, %v1812_v23  ;;  %v2246_v61 = vand.u32 4294901760, %v2245_v56 }
 0x238   :  { %7276 = vst [vmem:[#allocation236_spill] sm:$0xff] %v5475_v24  ;;  %7277 = vst [vmem:[#allocation237_spill] sm:$0xff] %v5477_v18  ;;  %v5493_v36 = vsub.f32 %v520_v29, %v5475_v24  ;;  %v5496_v15 = vsub.f32 %v519_v40, %v5477_v18  ;;  %v5500_v5 = vand.u32 4294901760, %v1811_v47  ;;  %v6779_v55 = vand.u32 4294901760, %v4878_v32 }
 0x239   :  { %7281 = vst [vmem:[#allocation240_spill] sm:$0xff] %v5498_v58  ;;  %v960_v63 = vand.u32 4294901760, %v959_v22  ;;  %v5507_v44 = vsub.f32 %v1812_v23, %v5498_v58  ;;  %v5512_v10 = vpack.c.bf16 %v2246_v61, %v2234_v17  ;;  %v6783_v40 = vand.u32 4294901760, %v4882_v7 }
 0x23a   :  { %7279 = vst [vmem:[#allocation238_spill] sm:$0xff] %v5493_v36  ;;  %7280 = vst [vmem:[#allocation239_spill] sm:$0xff] %v5496_v15  ;;  %v6782_v25 = vand.u32 4294901760, %v5493_v36  ;;  %v6781_v50 = vand.u32 4294901760, %v5496_v15  ;;  %v5510_v62 = vsub.f32 %v1811_v47, %v5500_v5  ;;  %v971_v29 = vsub.f32 %v4878_v32, %v6779_v55 }
 0x23b   :  { %7282 = vst [vmem:[#allocation241_spill] sm:$0xff] %v5500_v5  ;;  %7283 = vst [vmem:[#allocation242_spill] sm:$0xff] %v5507_v44  ;;  %v6784_v51 = vand.u32 4294901760, %v4884_v21  ;;  %v6785_v47 = vand.u32 4294901760, %v5507_v44  ;;  %v965_v22 = vsub.f32 %v4882_v7, %v6783_v40  ;;  %v6792_v53 = vand.u32 4294901760, %v4889_v37  ;;  %v7308_v5 = vld [vmem:[#allocation175_spill] sm:$0xff] }
 0x23c   :  { %7284 = vst [vmem:[#allocation243_spill] sm:$0xff] %v5510_v62  ;;  %7285 = vst [vmem:[#allocation244_spill] sm:$0xff] %v5512_v10  ;;  %v654_v19 = vsub.f32 %v5493_v36, %v6782_v25  ;;  %v660_v23 = vsub.f32 %v5496_v15, %v6781_v50  ;;  %v6793_v17 = vand.u32 4294901760, %v5510_v62  ;;  %v972_v56 = vand.u32 4294901760, %v971_v29  ;;  %v7309_v36 = vld [vmem:[#allocation198_spill] sm:$0xff] }
 0x23d   :  { %v977_v61 = vsub.f32 %v4884_v21, %v6784_v51  ;;  %v1946_v43 = vsub.f32 %v5507_v44, %v6785_v47  ;;  %v966_v25 = vand.u32 4294901760, %v965_v22  ;;  %v2251_v51 = vsub.f32 %v4889_v37, %v6792_v53  ;;  %v7292_v53 = vld [vmem:[#allocation163_spill] sm:$0xff] }
 0x23e   :  { %v655_v8 = vand.u32 4294901760, %v654_v19  ;;  %v661_v55 = vand.u32 4294901760, %v660_v23  ;;  %v1952_v29 = vsub.f32 %v5510_v62, %v6793_v17  ;;  %v5540_v50 = vpack.c.bf16 %v972_v56, %v960_v63 }
 0x23f   :  { %v978_v40 = vand.u32 4294901760, %v977_v61  ;;  %v1947_v39 = vand.u32 4294901760, %v1946_v43  ;;  %v6790_v23 = vand.u32 4294901760, %v4891_v34  ;;  %v6787_v35 = vand.u32 4294901760, %v4895_v57 }
 0x240   :  { %7286 = vst [vmem:[#allocation245_spill] sm:$0xff] %v5540_v50  ;;  %656 = vmatprep.mubr.f32.mxu1 %v655_v8  ;;  %v1953_v19 = vand.u32 4294901760, %v1952_v29  ;;  %v2252_v38 = vand.u32 4294901760, %v2251_v51  ;;  %v6786_v63 = vand.u32 4294901760, %v4900_v60  ;;  %v6788_v56 = vand.u32 4294901760, %v4904_v12  ;;  %v7332_v50 = vld [vmem:[#allocation205_spill] sm:$0xff] }
 0x241   :  { %662 = vmatmul.mubr.f32.vlgmr.msra.gmra.mrb[0].mxu1 %v661_v55  ;;  %v5547_v47 = vpack.c.bf16 %v978_v40, %v966_v25  ;;  %v2263_v8 = vsub.f32 %v4891_v34, %v6790_v23  ;;  %v2257_v43 = vsub.f32 %v4895_v57, %v6787_v35  ;;  %v6789_v55 = vand.u32 4294901760, %v4908_v31  ;;  %1948 = vmatprep.mubr.f32.mxu0 %v1947_v39 }
 0x242   :  { %3287 = vmatpush1.bf16.msra.mxu1 %v5070_v30  ;;  %1053 = vmatprep.mubr.f32.mxu1 %v5475_v24  ;;  %v6791_v25 = vand.u32 4294901760, %v4911_v28  ;;  %v2269_v30 = vsub.f32 %v4900_v60, %v6786_v63  ;;  %v983_v40 = vsub.f32 %v4904_v12, %v6788_v56  ;;  %v6794_v51 = vand.u32 4294901760, %v4916_v11  ;;  %v7288_v63 = vld [vmem:[#allocation191_spill] sm:$0xff] }
 0x243   :  { %7287 = vst [vmem:[#allocation246_spill] sm:$0xff] %v5547_v47  ;;  %3289 = vmatprep.subr.bf16.mxu1 %v5078_v2  ;;  %v6801_v22 = vand.u32 4294901760, %v4920_v42  ;;  %1954 = vmatmul.mubr.f32.vlgmr.msra.gmra.mrb[0].mxu0 %v1953_v19  ;;  %v2264_v61 = vand.u32 4294901760, %v2263_v8  ;;  %v2258_v29 = vand.u32 4294901760, %v2257_v43  ;;  %v995_v39 = vsub.f32 %v4908_v31, %v6789_v55  ;;  %v7289_v43 = vld [vmem:[#allocation192_spill] sm:$0xff]  ;;  %v7290_v55 = vld [vmem:[#allocation193_spill] sm:$0xff] }
 0x244   :  { %v989_v2 = vsub.f32 %v4911_v28, %v6791_v25  ;;  %3671 = vmatpush1.bf16.msra.mxu0 %v7288_v63  ;;  %2345 = vmatprep.mubr.f32.mxu0 %v5498_v58  ;;  %v2270_v35 = vand.u32 4294901760, %v2269_v30  ;;  %v984_v56 = vand.u32 4294901760, %v983_v40  ;;  %v1001_v19 = vsub.f32 %v4916_v11, %v6794_v51  ;;  %v7293_v30 = vld [vmem:[#allocation195_spill] sm:$0xff]  ;;  %v7295_v58 = vld [vmem:[#allocation165_spill] sm:$0xff] }
 0x245   :  { %v2275_v8 = vsub.f32 %v4920_v42, %v6801_v22  ;;  %3673 = vmatprep.subr.bf16.mxu0 %v7290_v55  ;;  %v5586_v23 = vpack.c.bf16 %v2264_v61, %v2252_v38  ;;  %v996_v25 = vand.u32 4294901760, %v995_v39  ;;  %v6803_v17 = vand.u32 4294901760, %v7292_v53  ;;  %v7297_v38 = vld [vmem:[#allocation166_spill] sm:$0xff]  ;;  %v7298_v39 = vld [vmem:[#allocation167_spill] sm:$0xff] }
 0x246   :  { %3291 = vmatpush1.bf16.msra.mxu1 %v7289_v43  ;;  %v990_v63 = vand.u32 4294901760, %v989_v2  ;;  %v5590_v40 = vpack.c.bf16 %v2270_v35, %v2258_v29  ;;  %v1002_v16 = vand.u32 4294901760, %v1001_v19  ;;  %v6802_v24 = vand.u32 4294901760, %v7295_v58  ;;  %v7299_v43 = vld [vmem:[#allocation194_spill] sm:$0xff]  ;;  %v7301_v29 = vld [vmem:[#allocation169_spill] sm:$0xff] }
 0x247   :  { %7291 = vst [vmem:[#allocation191_spill] sm:$0xff] %v5586_v23  ;;  %3293 = vmatprep.subr.bf16.mxu1 %v7293_v30  ;;  %v2276_v51 = vand.u32 4294901760, %v2275_v8  ;;  %v5593_v62 = vpack.c.bf16 %v996_v25, %v984_v56  ;;  %v2287_v55 = vsub.f32 %v7292_v53, %v6803_v17  ;;  %v6806_v61 = vand.u32 4294901760, %v7297_v38  ;;  %v7302_v56 = vld [vmem:[#allocation171_spill] sm:$0xff] }
 0x248   :  { %7294 = vst [vmem:[#allocation192_spill] sm:$0xff] %v5590_v40  ;;  %v6811_v2 = vand.u32 4294901760, %v7298_v39  ;;  %3675 = vmatpush1.bf16.msra.mxu0 %v7299_v43  ;;  %v5601_v22 = vpack.c.bf16 %v1002_v16, %v990_v63  ;;  %v2281_v35 = vsub.f32 %v7295_v58, %v6802_v24  ;;  %v6814_v19 = vand.u32 4294901760, %v7301_v29  ;;  %v7303_v63 = vld [vmem:[#allocation172_spill] sm:$0xff]  ;;  %v7304_v24 = vld [vmem:[#allocation197_spill] sm:$0xff]  ;;  %v7328_v23 = vld [vmem:[#allocation187_spill] sm:$0xff] }
 0x249   :  { %7296 = vst [vmem:[#allocation193_spill] sm:$0xff] %v5593_v62  ;;  %v6817_v25 = vand.u32 4294901760, %v7302_v56  ;;  %3677 = vmatprep.subr.bf16.mxu0 %v5162_v26  ;;  %v2288_v8 = vand.u32 4294901760, %v2287_v55  ;;  %v2293_v30 = vsub.f32 %v7297_v38, %v6806_v61  ;;  %v6822_v43 = vand.u32 4294901760, %v7303_v63  ;;  %v7305_v55 = vld [vmem:[#allocation173_spill] sm:$0xff] }
 0x24a   :  { %7300 = vst [vmem:[#allocation163_spill] sm:$0xff] %v5601_v22  ;;  %3295 = vmatpush1.bf16.msra.mxu1 %v5160_v4  ;;  %v1007_v16 = vsub.f32 %v7298_v39, %v6811_v2  ;;  %v2282_v17 = vand.u32 4294901760, %v2281_v35  ;;  %v1019_v4 = vsub.f32 %v7301_v29, %v6814_v19  ;;  %v6823_v15 = vand.u32 4294901760, %v7305_v55  ;;  %v7316_v22 = vld [vmem:[#allocation180_spill] sm:$0xff] }
 0x24b   :  { %3297 = vmatprep.subr.bf16.mxu1 %v7304_v24  ;;  %v1013_v26 = vsub.f32 %v7302_v56, %v6817_v25  ;;  %v5625_v61 = vpack.c.bf16 %v2288_v8, %v2276_v51  ;;  %v2294_v14 = vand.u32 4294901760, %v2293_v30  ;;  %v1025_v2 = vsub.f32 %v7303_v63, %v6822_v43  ;;  %v7307_v24 = vld [vmem:[#allocation196_spill] sm:$0xff]  ;;  %v7310_v51 = vld [vmem:[#allocation199_spill] sm:$0xff]  ;;  %v7313_v43 = vld [vmem:[#allocation178_spill] sm:$0xff] }
 0x24c   :  { %v1008_v48 = vand.u32 4294901760, %v1007_v16  ;;  %3679 = vmatpush1.bf16.msra.mxu0 %v7307_v24  ;;  %v1020_v35 = vand.u32 4294901760, %v1019_v4  ;;  %v2299_v19 = vsub.f32 %v7305_v55, %v6823_v15  ;;  %v6824_v25 = vand.u32 4294901760, %v7308_v5  ;;  %v7312_v16 = vld [vmem:[#allocation176_spill] sm:$0xff]  ;;  %v7314_v24 = vld [vmem:[#allocation201_spill] sm:$0xff] }
 0x24d   :  { %7306 = vst [vmem:[#allocation195_spill] sm:$0xff] %v5625_v61  ;;  %v1014_v44 = vand.u32 4294901760, %v1013_v26  ;;  %3681 = vmatprep.subr.bf16.mxu0 %v7310_v51  ;;  %v5637_v8 = vpack.c.bf16 %v2294_v14, %v2282_v17  ;;  %v1026_v30 = vand.u32 4294901760, %v1025_v2  ;;  %v6825_v18 = vand.u32 4294901760, %v7312_v16  ;;  %v7318_v2 = vld [vmem:[#allocation181_spill] sm:$0xff] }
 0x24e   :  { %3299 = vmatpush1.bf16.msra.mxu1 %v7309_v36  ;;  %v6826_v61 = vand.u32 4294901760, %v7313_v43  ;;  %v5642_v4 = vpack.c.bf16 %v1020_v35, %v1008_v48  ;;  %v2300_v26 = vand.u32 4294901760, %v2299_v19  ;;  %v2311_v15 = vsub.f32 %v7308_v5, %v6824_v25  ;;  %v7319_v35 = vld [vmem:[#allocation200_spill] sm:$0xff] }
 0x24f   :  { %7311 = vst [vmem:[#allocation165_spill] sm:$0xff] %v5637_v8  ;;  %3301 = vmatprep.subr.bf16.mxu1 %v7314_v24  ;;  %v6827_v36 = vand.u32 4294901760, %v7316_v22  ;;  %v5648_v40 = vpack.c.bf16 %v1026_v30, %v1014_v44  ;;  %v2305_v14 = vsub.f32 %v7312_v16, %v6825_v18  ;;  %v6828_v48 = vand.u32 4294901760, %v7318_v2  ;;  %v7320_v24 = vld [vmem:[#allocation183_spill] sm:$0xff]  ;;  %v7321_v30 = vld [vmem:[#allocation184_spill] sm:$0xff] }
 0x250   :  { %7315 = vst [vmem:[#allocation166_spill] sm:$0xff] %v5642_v4  ;;  %v2317_v17 = vsub.f32 %v7313_v43, %v6826_v61  ;;  %3683 = vmatpush1.bf16.msra.mxu0 %v7319_v35  ;;  %v2312_v19 = vand.u32 4294901760, %v2311_v15  ;;  %v6829_v44 = vand.u32 4294901760, %v7320_v24  ;;  %v7323_v18 = vld [vmem:[#allocation203_spill] sm:$0xff]  ;;  %v7324_v35 = vld [vmem:[#allocation186_spill] sm:$0xff] }
 0x251   :  { %7317 = vst [vmem:[#allocation167_spill] sm:$0xff] %v5648_v40  ;;  %v1031_v51 = vsub.f32 %v7316_v22, %v6827_v36  ;;  %v7322_v40 = vld [vmem:[#allocation202_spill] sm:$0xff]  ;;  %3685 = vmatprep.subr.bf16.mxu0 %v7323_v18  ;;  %v2306_v8 = vand.u32 4294901760, %v2305_v14  ;;  %v1043_v61 = vsub.f32 %v7318_v2, %v6828_v48  ;;  %v6830_v15 = vand.u32 4294901760, %v7324_v35 }
 0x252   :  { %3303 = vmatpush1.bf16.msra.mxu1 %v7322_v40  ;;  %v2318_v4 = vand.u32 4294901760, %v2317_v17  ;;  %v5670_v62 = vpack.c.bf16 %v2312_v19, %v2300_v26  ;;  %v1037_v25 = vsub.f32 %v7320_v24, %v6829_v44  ;;  %v7326_v40 = vand.u32 4294901760, %v7321_v30  ;;  %v7329_v26 = vld [vmem:[#allocation204_spill] sm:$0xff]  ;;  %v7331_v44 = vld [vmem:[#allocation190_spill] sm:$0xff] }
 0x253   :  { %3305 = vmatprep.subr.bf16.mxu1 %v5254_v9  ;;  %v1032_v36 = vand.u32 4294901760, %v1031_v51  ;;  %v1044_v17 = vand.u32 4294901760, %v1043_v61  ;;  %v2323_v48 = vsub.f32 %v7324_v35, %v6830_v15  ;;  %v6831_v9 = vand.u32 4294901760, %v7328_v23  ;;  %v7342_v61 = vld [vmem:[#allocation151_spill] sm:$0xff] }
 0x254   :  { %7325 = vst [vmem:[#allocation194_spill] sm:$0xff] %v5670_v62  ;;  %v1049_v18 = vsub.f32 %v7321_v30, %v7326_v40  ;;  %v5678_v14 = vpack.c.bf16 %v2318_v4, %v2306_v8  ;;  %3687 = vmatpush1.bf16.msra.mxu0 %v7329_v26  ;;  %v1038_v19 = vand.u32 4294901760, %v1037_v25  ;;  %v7330_v62 = vld [vmem:[#allocation189_spill] sm:$0xff]  ;;  %v7333_v40 = vld [vmem:[#allocation206_spill] sm:$0xff]  ;;  %v7334_v8 = vld [vmem:[#allocation147_spill] sm:$0xff] }
 0x255   :  { %3689 = vmatprep.subr.bf16.mxu0 %v7333_v40  ;;  %v5690_v4 = vpack.c.bf16 %v1044_v17, %v1032_v36  ;;  %v2335_v15 = vsub.f32 %v7328_v23, %v6831_v9  ;;  %v7336_v26 = vld [vmem:[#allocation208_spill] sm:$0xff]  ;;  %v7339_v10 = vand.u32 4294901760, %v7330_v62  ;;  %v7340_v40 = vand.u32 4294901760, %v7331_v44  ;;  %v7378_v30 = vld [vmem:[#allocation221_spill] sm:$0xff] }
 0x256   :  { %7327 = vst [vmem:[#allocation169_spill] sm:$0xff] %v5678_v14  ;;  %v1050_v51 = vand.u32 4294901760, %v1049_v18  ;;  %3307 = vmatpush1.bf16.msra.mxu1 %v7332_v50  ;;  %v2324_v14 = vand.u32 4294901760, %v2323_v48  ;;  %v7337_v25 = vld [vmem:[#allocation148_spill] sm:$0xff]  ;;  %v7341_v48 = vand.u32 4294901760, %v4801_v41  ;;  %v7344_v18 = vld [vmem:[#allocation207_spill] sm:$0xff] }
 0x257   :  { %7335 = vst [vmem:[#allocation171_spill] sm:$0xff] %v5690_v4  ;;  %3309 = vmatprep.subr.bf16.mxu1 %v7336_v26  ;;  %v2329_v50 = vsub.f32 %v7330_v62, %v7339_v10  ;;  %v2341_v36 = vsub.f32 %v7331_v44, %v7340_v40  ;;  %v7343_v4 = vld [vmem:[#allocation152_spill] sm:$0xff]  ;;  %v2336_v23 = vand.u32 4294901760, %v2335_v15  ;;  %v7346_v40 = vld [vmem:[#allocation209_spill] sm:$0xff]  ;;  %v7347_v44 = vld [vmem:[#allocation210_spill] sm:$0xff] }
 0x258   :  { %v5697_v47 = vpack.c.bf16 %v1050_v51, %v1038_v19  ;;  %v911_v17 = vsub.f32 %v4801_v41, %v7341_v48  ;;  %3691 = vmatpush1.bf16.msra.mxu0 %v7344_v18  ;;  %v2192_v19 = vand.u32 4294901760, %v5456_v20  ;;  %v7345_v51 = vand.u32 4294901760, %v4806_v27  ;;  %v7349_v26 = vld [vmem:[#allocation149_spill] sm:$0xff]  ;;  %v7350_v41 = vld [vmem:[#allocation150_spill] sm:$0xff]  ;;  %v7352_v20 = vld [vmem:[#allocation212_spill] sm:$0xff] }
 0x259   :  { %v2342_v62 = vand.u32 4294901760, %v2341_v36  ;;  %3693 = vmatprep.subr.bf16.mxu0 %v7347_v44  ;;  %v7348_v48 = vand.u32 4294901760, %v4812_v1  ;;  %v5722_v35 = vpack.c.bf16 %v2336_v23, %v2324_v14  ;;  %v7354_v36 = vand.u32 4294901760, %v7334_v8  ;;  %v7359_v15 = vld [vmem:[#allocation153_spill] sm:$0xff] }
 0x25a   :  { %7338 = vst [vmem:[#allocation172_spill] sm:$0xff] %v5697_v47  ;;  %v923_v10 = vsub.f32 %v4806_v27, %v7345_v51  ;;  %v2330_v47 = vand.u32 4294901760, %v2329_v50  ;;  %3311 = vmatpush1.bf16.msra.mxu1 %v7346_v40  ;;  %v7353_v51 = vand.u32 4294901760, %v4817_v3  ;;  %v7355_v40 = vand.u32 4294901760, %v7337_v25  ;;  %v7364_v27 = vld [vmem:[#allocation156_spill] sm:$0xff] }
 0x25b   :  { %v917_v9 = vsub.f32 %v4812_v1, %v7348_v48  ;;  %7351 = vst [vmem:[#allocation197_spill] sm:$0xff] %v5722_v35  ;;  %3313 = vmatprep.subr.bf16.mxu1 %v7352_v20  ;;  %v2203_v44 = vsub.f32 %v7334_v8, %v7354_v36  ;;  %v7357_v18 = vand.u32 4294901760, %v7342_v61  ;;  %v7358_v14 = vand.u32 4294901760, %v7343_v4  ;;  %v7361_v35 = vld [vmem:[#allocation211_spill] sm:$0xff] }
 0x25c   :  { %v929_v50 = vsub.f32 %v4817_v3, %v7353_v51  ;;  %v2215_v48 = vsub.f32 %v7337_v25, %v7355_v40  ;;  %v5734_v1 = vpack.c.bf16 %v2342_v62, %v2330_v47  ;;  %v7360_v3 = vld [vmem:[#allocation154_spill] sm:$0xff]  ;;  %3695 = vmatpush1.bf16.msra.mxu0 %v7361_v35  ;;  %v2186_v36 = vand.u32 4294901760, %v5462_v6  ;;  %v7362_v47 = vld [vmem:[#allocation155_spill] sm:$0xff] }
 0x25d   :  { %v935_v23 = vsub.f32 %v7342_v61, %v7357_v18  ;;  %v947_v20 = vsub.f32 %v7343_v4, %v7358_v14  ;;  %v2198_v40 = vand.u32 4294901760, %v5482_v52  ;;  %v912_v62 = vand.u32 4294901760, %v911_v17  ;;  %3697 = vmatprep.subr.bf16.mxu0 %v5365_v13 }
 0x25e   :  { %7356 = vst [vmem:[#allocation173_spill] sm:$0xff] %v5734_v1  ;;  %3315 = vmatpush1.bf16.msra.mxu1 %v5358_v33  ;;  %v924_v18 = vand.u32 4294901760, %v923_v10  ;;  %v918_v61 = vand.u32 4294901760, %v917_v9  ;;  %v7363_v14 = vand.u32 4294901760, %v7349_v26  ;;  %v930_v6 = vand.u32 4294901760, %v929_v50 }
 0x25f   :  { %3317 = vmatprep.subr.bf16.mxu1 %v5369_v45  ;;  %v2204_v35 = vand.u32 4294901760, %v2203_v44  ;;  %v2216_v52 = vand.u32 4294901760, %v2215_v48  ;;  %v7365_v17 = vand.u32 4294901760, %v7350_v41  ;;  %v936_v33 = vand.u32 4294901760, %v935_v23  ;;  %v7368_v45 = vld [vmem:[#allocation213_spill] sm:$0xff]  ;;  %v7370_v44 = vld [vmem:[#allocation214_spill] sm:$0xff] }
 0x260   :  { %v2209_v51 = vsub.f32 %v7349_v26, %v7363_v14  ;;  %v948_v8 = vand.u32 4294901760, %v947_v20  ;;  %v7366_v13 = vand.u32 4294901760, %v7359_v15  ;;  %v7367_v10 = vand.u32 4294901760, %v7360_v3  ;;  %3699 = vmatpush1.bf16.msra.mxu0 %v5367_v54  ;;  %v7372_v26 = vld [vmem:[#allocation219_spill] sm:$0xff] }
 0x261   :  { %v2221_v25 = vsub.f32 %v7350_v41, %v7365_v17  ;;  %v7369_v50 = vand.u32 4294901760, %v7368_v45  ;;  %v7371_v48 = vand.u32 4294901760, %v7370_v44  ;;  %v7373_v1 = vand.u32 4294901760, %v7372_v26  ;;  %v7374_v17 = vld [vmem:[#allocation222_spill] sm:$0xff]  ;;  %3701 = vmatprep.subr.bf16.mxu0 %v7378_v30  ;;  %v7381_v26 = vld [vmem:[#allocation225_spill] sm:$0xff] }
 0x262   :  { %v941_v9 = vsub.f32 %v7359_v15, %v7366_v13  ;;  %v953_v14 = vsub.f32 %v7360_v3, %v7367_v10  ;;  %v7375_v23 = vand.u32 4294901760, %v7374_v17  ;;  %v7376_v41 = vand.u32 4294901760, %v7362_v47  ;;  %v7377_v15 = vld [vmem:[#allocation220_spill] sm:$0xff] }
 0x263   :  { %v3702_v4 = vpack.c.bf16 %v7371_v48, %v7369_v50  ;;  %3319 = vmatpush1.bf16.msra.mxu1 %v7377_v15  ;;  %v7379_v54 = vand.u32 4294901760, %v5430_v59  ;;  %v3706_v45 = vpack.c.bf16 %v2198_v40, %v2186_v36  ;;  %v7380_v44 = vand.u32 4294901760, %v7364_v27  ;;  %v7419_v40 = vld [vmem:[#allocation34_spill] sm:$0xff]  ;;  %v7424_v59 = vld [vmem:[#allocation35_spill] sm:$0xff] }
 0x264   :  { %v3322_v20 = vpack.c.bf16 %v7375_v23, %v7373_v1  ;;  %v2227_v13 = vsub.f32 %v7362_v47, %v7376_v41  ;;  %3321 = vmatprep.subr.bf16.mxu1 %v7381_v26  ;;  %v3324_v48 = vpack.c.bf16 %v924_v18, %v912_v62  ;;  %v3326_v1 = vpack.c.bf16 %v930_v6, %v918_v61  ;;  %v7412_v26 = vld [vmem:[#allocation237_spill] sm:$0xff]  ;;  %v7417_v62 = vld [vmem:[#allocation31_spill] sm:$0xff]  ;;  %v7423_v36 = vld [vmem:[#allocation242_spill] sm:$0xff] }
 0x265   :  { %v3704_v10 = vpack.c.bf16 %v2192_v19, %v7379_v54  ;;  %v2239_v50 = vsub.f32 %v7364_v27, %v7380_v44  ;;  %v3708_v17 = vpack.c.bf16 %v2216_v52, %v2204_v35  ;;  %v2210_v23 = vand.u32 4294901760, %v2209_v51  ;;  %3703 = vmatpush1.bf16.msra.mxu0 %v3702_v4  ;;  %v7384_v54 = vld [vmem:[#allocation187_spill] sm:$0xff]  ;;  %v7385_v44 = vld [vmem:[#allocation189_spill] sm:$0xff]  ;;  %v7421_v4 = vld [vmem:[#allocation40_spill] sm:$0xff] }
 0x266   :  { %v2222_v3 = vand.u32 4294901760, %v2221_v25  ;;  %v3328_v41 = vpack.c.bf16 %v948_v8, %v936_v33  ;;  %v942_v47 = vand.u32 4294901760, %v941_v9  ;;  %v954_v15 = vand.u32 4294901760, %v953_v14  ;;  %v7382_v14 = vld [vmem:[#allocation184_spill] sm:$0xff]  ;;  %v7387_v52 = vld [vmem:[#allocation245_spill] sm:$0xff]  ;;  %v7420_v8 = vld [vmem:[#allocation39_spill] sm:$0xff] }
 0x267   :  { %v2228_v30 = vand.u32 4294901760, %v2227_v13  ;;  %3323 = vmatpush1.bf16.msra.mxu1 %v3322_v20  ;;  %3705 = vmatprep.subr.bf16.mxu0 %v3704_v10  ;;  %v2240_v61 = vand.u32 4294901760, %v2239_v50  ;;  %v7383_v13 = vld [vmem:[#allocation186_spill] sm:$0xff]  ;;  %v7391_v10 = vld [vmem:[#allocation193_spill] sm:$0xff]  ;;  %v7392_v20 = vld [vmem:[#allocation192_spill] sm:$0xff]  ;;  %v3356_v25 = vpack.c.bf16 %v7421_v4, %v7420_v8 }
 0x268   :  { %3325 = vmatprep.subr.bf16.mxu1 %v3324_v48  ;;  %v3710_v9 = vpack.c.bf16 %v2222_v3, %v2210_v23  ;;  %v7386_v50 = vld [vmem:[#allocation190_spill] sm:$0xff]  ;;  %v3330_v48 = vpack.c.bf16 %v954_v15, %v942_v47  ;;  %v7388_v3 = vld [vmem:[#allocation244_spill] sm:$0xff]  ;;  %v7390_v23 = vld [vmem:[#allocation191_spill] sm:$0xff] }
 0x269   :  { %3707 = vmatpush1.bf16.msra.mxu0 %v3706_v45  ;;  %v3712_v35 = vpack.c.bf16 %v2240_v61, %v2228_v30  ;;  %v7389_v45 = vld [vmem:[#allocation246_spill] sm:$0xff]  ;;  %v7394_v47 = vld [vmem:[#allocation195_spill] sm:$0xff]  ;;  %v7413_v33 = vld [vmem:[#allocation24_spill] sm:$0xff] }
 0x26a   :  { %3709 = vmatprep.subr.bf16.mxu0 %v3708_v17  ;;  %v7395_v17 = vld [vmem:[#allocation166_spill] sm:$0xff]  ;;  %v7397_v15 = vld [vmem:[#allocation167_spill] sm:$0xff] }
 0x26b   :  { %3327 = vmatpush1.bf16.msra.mxu1 %v3326_v1  ;;  %v7393_v1 = vld [vmem:[#allocation163_spill] sm:$0xff]  ;;  %v7398_v30 = vld [vmem:[#allocation194_spill] sm:$0xff] }
 0x26c   :  { %3329 = vmatprep.subr.bf16.mxu1 %v3328_v41  ;;  %v7396_v41 = vld [vmem:[#allocation165_spill] sm:$0xff]  ;;  %v7399_v61 = vld [vmem:[#allocation171_spill] sm:$0xff] }
 0x26d   :  { %3711 = vmatpush1.bf16.msra.mxu0 %v3710_v9 }
 0x26e   :  { %3713 = vmatprep.subr.bf16.mxu0 %v3712_v35  ;;  %v7400_v35 = vld [vmem:[#allocation15_spill] sm:$0xff] }
 0x26f   :  { %3331 = vmatpush1.bf16.msra.mxu1 %v3330_v48  ;;  %v7404_v48 = vld [vmem:[#allocation197_spill] sm:$0xff] }
 0x270   :  { %3333 = vmatprep.subr.bf16.mxu1 %v7387_v52  ;;  %v7401_v52 = vld [vmem:[#allocation16_spill] sm:$0xff] }
 0x271   :  { %3715 = vmatpush1.bf16.msra.mxu0 %v7388_v3  ;;  %v3348_v9 = vpack.c.bf16 %v7401_v52, %v7400_v35  ;;  %v7405_v3 = vld [vmem:[#allocation17_spill] sm:$0xff] }
 0x272   :  { %3717 = vmatprep.subr.bf16.mxu0 %v7390_v23 }
 0x273   :  { %3335 = vmatpush1.bf16.msra.mxu1 %v7389_v45  ;;  %v7406_v45 = vld [vmem:[#allocation19_spill] sm:$0xff] }
 0x274   :  { %3337 = vmatprep.subr.bf16.mxu1 %v7391_v10  ;;  %v7402_v10 = vld [vmem:[#allocation169_spill] sm:$0xff]  ;;  %v3350_v23 = vpack.c.bf16 %v7406_v45, %v7405_v3 }
 0x275   :  { %3719 = vmatpush1.bf16.msra.mxu0 %v7392_v20  ;;  %v7403_v20 = vld [vmem:[#allocation172_spill] sm:$0xff] }
 0x276   :  { %3721 = vmatprep.subr.bf16.mxu0 %v7394_v47  ;;  %v7408_v47 = vld [vmem:[#allocation22_spill] sm:$0xff] }
 0x277   :  { %3339 = vmatpush1.bf16.msra.mxu1 %v7393_v1  ;;  %v7407_v1 = vld [vmem:[#allocation21_spill] sm:$0xff] }
 0x278   :  { %3341 = vmatprep.subr.bf16.mxu1 %v7395_v17  ;;  %v3732_v17 = vpack.c.bf16 %v7408_v47, %v7407_v1 }
 0x279   :  { %3723 = vmatpush1.bf16.msra.mxu0 %v7396_v41  ;;  %v7409_v41 = vld [vmem:[#allocation26_spill] sm:$0xff] }
 0x27a   :  { %3725 = vmatprep.subr.bf16.mxu0 %v7398_v30 }
 0x27b   :  { %3343 = vmatpush1.bf16.msra.mxu1 %v7397_v15  ;;  %v7410_v15 = vld [vmem:[#allocation28_spill] sm:$0xff] }
 0x27c   :  { %3345 = vmatprep.subr.bf16.mxu1 %v7399_v61  ;;  %v3352_v30 = vpack.c.bf16 %v7410_v15, %v7409_v41  ;;  %v7411_v61 = vld [vmem:[#allocation173_spill] sm:$0xff] }
 0x27d   :  { %3727 = vmatpush1.bf16.msra.mxu0 %v7402_v10  ;;  %v7414_v10 = vld [vmem:[#allocation25_spill] sm:$0xff] }
 0x27e   :  { %3729 = vmatprep.subr.bf16.mxu0 %v7404_v48  ;;  %v3734_v6 = vpack.c.bf16 %v7414_v10, %v7413_v33  ;;  %v7416_v48 = vld [vmem:[#allocation30_spill] sm:$0xff]  ;;  %v7428_v10 = vld [vmem:[#allocation45_spill] sm:$0xff]  ;;  %v7434_v33 = vld [vmem:[#allocation55_spill] sm:$0xff] }
 0x27f   :  { %3347 = vmatpush1.bf16.msra.mxu1 %v7403_v20  ;;  %v7415_v20 = vld [vmem:[#allocation238_spill] sm:$0xff]  ;;  %v3354_v18 = vpack.c.bf16 %v7417_v62, %v7416_v48  ;;  %v7427_v62 = vld [vmem:[#allocation43_spill] sm:$0xff] }
 0x280   :  { %3349 = vmatprep.subr.bf16.mxu1 %v3348_v9  ;;  %v7418_v9 = vld [vmem:[#allocation32_spill] sm:$0xff] }
 0x281   :  { %3731 = vmatpush1.bf16.msra.mxu0 %v7411_v61  ;;  %v3736_v51 = vpack.c.bf16 %v7419_v40, %v7418_v9  ;;  %v7422_v61 = vld [vmem:[#allocation241_spill] sm:$0xff]  ;;  %v7429_v40 = vld [vmem:[#allocation46_spill] sm:$0xff]  ;;  %v7431_v9 = vld [vmem:[#allocation52_spill] sm:$0xff] }
 0x282   :  { %1055 = vmatmul.mubr.f32.vlgmr.msra.gmra.mrb[0].mxu1 %v7412_v26  ;;  %3733 = vmatprep.subr.bf16.mxu0 %v3732_v17  ;;  %v7426_v26 = vld [vmem:[#allocation42_spill] sm:$0xff]  ;;  %v3740_v17 = vpack.c.bf16 %v7429_v40, %v7428_v10  ;;  %v7441_v10 = vld [vmem:[#allocation61_spill] sm:$0xff] }
 0x283   :  { %3351 = vmatpush1.bf16.msra.mxu1 %v3350_v23  ;;  %1255 = vmatprep.mubr.f32.mxu1 %v7415_v20  ;;  %v7425_v23 = vld [vmem:[#allocation37_spill] sm:$0xff]  ;;  %v3358_v48 = vpack.c.bf16 %v7427_v62, %v7426_v26  ;;  %v7438_v62 = vld [vmem:[#allocation63_spill] sm:$0xff]  ;;  %v7439_v26 = vld [vmem:[#allocation64_spill] sm:$0xff] }
 0x284   :  { %3353 = vmatprep.subr.bf16.mxu1 %v3352_v30  ;;  %2347 = vmatmul.mubr.f32.vlgmr.msra.gmra.mrb[0].mxu0 %v7422_v61  ;;  %v3738_v19 = vpack.c.bf16 %v7425_v23, %v7424_v59  ;;  %v7430_v30 = vld [vmem:[#allocation51_spill] sm:$0xff]  ;;  %v7432_v61 = vld [vmem:[#allocation48_spill] sm:$0xff]  ;;  %v7437_v59 = vld [vmem:[#allocation58_spill] sm:$0xff]  ;;  %v3364_v40 = vpack.c.bf16 %v7439_v26, %v7438_v62 }
 0x285   :  { %3735 = vmatpush1.bf16.msra.mxu0 %v3734_v6  ;;  %2547 = vmatprep.mubr.f32.mxu0 %v7423_v36  ;;  %v3360_v4 = vpack.c.bf16 %v7431_v9, %v7430_v30  ;;  %v7433_v6 = vld [vmem:[#allocation49_spill] sm:$0xff]  ;;  %v7435_v23 = vld [vmem:[#allocation56_spill] sm:$0xff] }
 0x286   :  { %3737 = vmatprep.subr.bf16.mxu0 %v3736_v51  ;;  %v3742_v8 = vpack.c.bf16 %v7433_v6, %v7432_v61  ;;  %v7436_v51 = vld [vmem:[#allocation57_spill] sm:$0xff]  ;;  %v7443_v6 = vld [vmem:[#allocation67_spill] sm:$0xff]  ;;  %v7445_v61 = vld [vmem:[#allocation70_spill] sm:$0xff] }
 0x287   :  { %3355 = vmatpush1.bf16.msra.mxu1 %v3354_v18  ;;  %v3362_v18 = vpack.c.bf16 %v7435_v23, %v7434_v33  ;;  %v3744_v15 = vpack.c.bf16 %v7437_v59, %v7436_v51  ;;  %v7446_v23 = vld [vmem:[#allocation75_spill] sm:$0xff]  ;;  %v7447_v33 = vld [vmem:[#allocation76_spill] sm:$0xff]  ;;  %v7449_v51 = vld [vmem:[#allocation73_spill] sm:$0xff] }
 0x288   :  { %3357 = vmatprep.subr.bf16.mxu1 %v3356_v25  ;;  %v7440_v25 = vld [vmem:[#allocation60_spill] sm:$0xff]  ;;  %v3368_v59 = vpack.c.bf16 %v7447_v33, %v7446_v23 }
 0x289   :  { %3739 = vmatpush1.bf16.msra.mxu0 %v3738_v19  ;;  %v3746_v9 = vpack.c.bf16 %v7441_v10, %v7440_v25  ;;  %v7442_v19 = vld [vmem:[#allocation65_spill] sm:$0xff]  ;;  %v7451_v10 = vld [vmem:[#allocation79_spill] sm:$0xff]  ;;  %v7453_v25 = vld [vmem:[#allocation82_spill] sm:$0xff] }
 0x28a   :  { %3741 = vmatprep.subr.bf16.mxu0 %v3740_v17  ;;  %v7444_v17 = vld [vmem:[#allocation69_spill] sm:$0xff] }
 0x28b   :  { %3359 = vmatpush1.bf16.msra.mxu1 %v3358_v48  ;;  %v3366_v48 = vpack.c.bf16 %v7443_v6, %v7442_v19  ;;  %v3748_v30 = vpack.c.bf16 %v7445_v61, %v7444_v17  ;;  %v7454_v6 = vld [vmem:[#allocation87_spill] sm:$0xff]  ;;  %v7455_v19 = vld [vmem:[#allocation88_spill] sm:$0xff]  ;;  %v7457_v17 = vld [vmem:[#allocation85_spill] sm:$0xff] }
 0x28c   :  { %3361 = vmatprep.subr.bf16.mxu1 %v3360_v4  ;;  %v7448_v4 = vld [vmem:[#allocation72_spill] sm:$0xff]  ;;  %v3372_v61 = vpack.c.bf16 %v7455_v19, %v7454_v6 }
 0x28d   :  { %3743 = vmatpush1.bf16.msra.mxu0 %v3742_v8  ;;  %v3750_v26 = vpack.c.bf16 %v7449_v51, %v7448_v4  ;;  %v7450_v8 = vld [vmem:[#allocation77_spill] sm:$0xff]  ;;  %v7459_v51 = vld [vmem:[#allocation91_spill] sm:$0xff]  ;;  %v7461_v4 = vld [vmem:[#allocation94_spill] sm:$0xff] }
 0x28e   :  { %3745 = vmatprep.subr.bf16.mxu0 %v3744_v15  ;;  %v7452_v15 = vld [vmem:[#allocation81_spill] sm:$0xff] }
 0x28f   :  { %3363 = vmatpush1.bf16.msra.mxu1 %v3362_v18  ;;  %v3370_v18 = vpack.c.bf16 %v7451_v10, %v7450_v8  ;;  %v3752_v62 = vpack.c.bf16 %v7453_v25, %v7452_v15  ;;  %v7462_v10 = vld [vmem:[#allocation99_spill] sm:$0xff]  ;;  %v7463_v8 = vld [vmem:[#allocation100_spill] sm:$0xff]  ;;  %v7465_v15 = vld [vmem:[#allocation97_spill] sm:$0xff] }
 0x290   :  { %3365 = vmatprep.subr.bf16.mxu1 %v3364_v40  ;;  %v7456_v40 = vld [vmem:[#allocation84_spill] sm:$0xff]  ;;  %v3376_v25 = vpack.c.bf16 %v7463_v8, %v7462_v10 }
 0x291   :  { %3747 = vmatpush1.bf16.msra.mxu0 %v3746_v9  ;;  %v3754_v33 = vpack.c.bf16 %v7457_v17, %v7456_v40  ;;  %v7458_v9 = vld [vmem:[#allocation89_spill] sm:$0xff]  ;;  %v7467_v17 = vld [vmem:[#allocation103_spill] sm:$0xff]  ;;  %v7469_v40 = vld [vmem:[#allocation106_spill] sm:$0xff] }
 0x292   :  { %3749 = vmatprep.subr.bf16.mxu0 %v3748_v30  ;;  %v7460_v30 = vld [vmem:[#allocation93_spill] sm:$0xff] }
 0x293   :  { %3367 = vmatpush1.bf16.msra.mxu1 %v3366_v48  ;;  %v3374_v48 = vpack.c.bf16 %v7459_v51, %v7458_v9  ;;  %v3756_v23 = vpack.c.bf16 %v7461_v4, %v7460_v30  ;;  %v7470_v51 = vld [vmem:[#allocation111_spill] sm:$0xff]  ;;  %v7471_v9 = vld [vmem:[#allocation112_spill] sm:$0xff]  ;;  %v7473_v30 = vld [vmem:[#allocation109_spill] sm:$0xff] }
 0x294   :  { %3369 = vmatprep.subr.bf16.mxu1 %v3368_v59  ;;  %v7464_v59 = vld [vmem:[#allocation96_spill] sm:$0xff]  ;;  %v3380_v4 = vpack.c.bf16 %v7471_v9, %v7470_v51 }
 0x295   :  { %3751 = vmatpush1.bf16.msra.mxu0 %v3750_v26  ;;  %v3758_v19 = vpack.c.bf16 %v7465_v15, %v7464_v59  ;;  %v7466_v26 = vld [vmem:[#allocation101_spill] sm:$0xff]  ;;  %v7475_v15 = vld [vmem:[#allocation127_spill] sm:$0xff] }
 0x296   :  { %3753 = vmatprep.subr.bf16.mxu0 %v3752_v62  ;;  %v7468_v62 = vld [vmem:[#allocation105_spill] sm:$0xff] }
 0x297   :  { %3371 = vmatpush1.bf16.msra.mxu1 %v3370_v18  ;;  %v3378_v18 = vpack.c.bf16 %v7467_v17, %v7466_v26  ;;  %v3760_v6 = vpack.c.bf16 %v7469_v40, %v7468_v62  ;;  %v7477_v59 = vld [vmem:[#allocation129_spill] sm:$0xff]  ;;  %v7478_v17 = vld [vmem:[#allocation132_spill] sm:$0xff]  ;;  %v7481_v62 = vld [vmem:[#allocation131_spill] sm:$0xff] }
 0x298   :  { %3373 = vmatprep.subr.bf16.mxu1 %v3372_v61  ;;  %v7472_v61 = vld [vmem:[#allocation108_spill] sm:$0xff]  ;;  %v7479_v26 = vld [vmem:[#allocation133_spill] sm:$0xff] }
 0x299   :  { %3755 = vmatpush1.bf16.msra.mxu0 %v3754_v33  ;;  %v3762_v8 = vpack.c.bf16 %v7473_v30, %v7472_v61  ;;  %v7474_v33 = vld [vmem:[#allocation126_spill] sm:$0xff]  ;;  %v3384_v40 = vpack.c.bf16 %v7479_v26, %v7478_v17  ;;  %v7485_v61 = vld [vmem:[#allocation140_spill] sm:$0xff] }
 0x29a   :  { %3757 = vmatprep.subr.bf16.mxu0 %v3756_v23  ;;  %v7476_v23 = vld [vmem:[#allocation128_spill] sm:$0xff]  ;;  %v7483_v30 = vld [vmem:[#allocation138_spill] sm:$0xff] }
 0x29b   :  { %3375 = vmatpush1.bf16.msra.mxu1 %v3374_v48  ;;  %v3382_v48 = vpack.c.bf16 %v7475_v15, %v7474_v33  ;;  %v3764_v10 = vpack.c.bf16 %v7477_v59, %v7476_v23  ;;  %v7486_v15 = vld [vmem:[#allocation143_spill] sm:$0xff]  ;;  %v7487_v33 = vld [vmem:[#allocation144_spill] sm:$0xff]  ;;  %v7489_v23 = vld [vmem:[#allocation142_spill] sm:$0xff] }
 0x29c   :  { %3377 = vmatprep.subr.bf16.mxu1 %v3376_v25  ;;  %v7480_v25 = vld [vmem:[#allocation130_spill] sm:$0xff]  ;;  %v3388_v59 = vpack.c.bf16 %v7487_v33, %v7486_v15 }
 0x29d   :  { %3759 = vmatpush1.bf16.msra.mxu0 %v3758_v19  ;;  %v3766_v9 = vpack.c.bf16 %v7481_v62, %v7480_v25  ;;  %v7482_v19 = vld [vmem:[#allocation137_spill] sm:$0xff]  ;;  %v7491_v62 = vld [vmem:[#allocation146_spill] sm:$0xff]  ;;  %v7493_v25 = vld [vmem:[#allocation148_spill] sm:$0xff] }
 0x29e   :  { %3761 = vmatprep.subr.bf16.mxu0 %v3760_v6  ;;  %v7484_v6 = vld [vmem:[#allocation139_spill] sm:$0xff] }
 0x29f   :  { %3379 = vmatpush1.bf16.msra.mxu1 %v3378_v18  ;;  %v3386_v18 = vpack.c.bf16 %v7483_v30, %v7482_v19  ;;  %v3768_v51 = vpack.c.bf16 %v7485_v61, %v7484_v6  ;;  %v7494_v30 = vld [vmem:[#allocation151_spill] sm:$0xff]  ;;  %v7495_v19 = vld [vmem:[#allocation152_spill] sm:$0xff]  ;;  %v7497_v6 = vld [vmem:[#allocation150_spill] sm:$0xff] }
 0x2a0   :  { %3381 = vmatprep.subr.bf16.mxu1 %v3380_v4  ;;  %v7488_v4 = vld [vmem:[#allocation141_spill] sm:$0xff]  ;;  %v3392_v61 = vpack.c.bf16 %v7495_v19, %v7494_v30 }
 0x2a1   :  { %3763 = vmatpush1.bf16.msra.mxu0 %v3762_v8  ;;  %v3770_v26 = vpack.c.bf16 %v7489_v23, %v7488_v4  ;;  %v7490_v8 = vld [vmem:[#allocation145_spill] sm:$0xff]  ;;  %v7499_v23 = vld [vmem:[#allocation154_spill] sm:$0xff] }
 0x2a2   :  { %3765 = vmatprep.subr.bf16.mxu0 %v3764_v10  ;;  %v7492_v10 = vld [vmem:[#allocation147_spill] sm:$0xff] }
 0x2a3   :  { %3383 = vmatpush1.bf16.msra.mxu1 %v3382_v48  ;;  %v3390_v48 = vpack.c.bf16 %v7491_v62, %v7490_v8  ;;  %v3772_v17 = vpack.c.bf16 %v7493_v25, %v7492_v10 }
 0x2a4   :  { %3385 = vmatprep.subr.bf16.mxu1 %v3384_v40  ;;  %v7496_v40 = vld [vmem:[#allocation149_spill] sm:$0xff] }
 0x2a5   :  { %3767 = vmatpush1.bf16.msra.mxu0 %v3766_v9  ;;  %v3774_v33 = vpack.c.bf16 %v7497_v6, %v7496_v40  ;;  %v7498_v9 = vld [vmem:[#allocation153_spill] sm:$0xff] }
 0x2a6   :  { %3769 = vmatprep.subr.bf16.mxu0 %v3768_v51  ;;  %v7500_v51 = vld [vmem:[#allocation155_spill] sm:$0xff] }
 0x2a7   :  { %3387 = vmatpush1.bf16.msra.mxu1 %v3386_v18  ;;  %v3394_v18 = vpack.c.bf16 %v7499_v23, %v7498_v9  ;;  %v3776_v4 = vpack.c.bf16 %v7364_v27, %v7500_v51 }
 0x2a8   :  { %3389 = vmatprep.subr.bf16.mxu1 %v3388_v59  ;;  %v7501_v59 = vpack.c.bf16 %v4878_v32, %v4875_v0 }
 0x2a9   :  { %3771 = vmatpush1.bf16.msra.mxu0 %v3770_v26  ;;  %v7502_v26 = vpack.c.bf16 %v4872_v46, %v4869_v49 }
 0x2aa   :  { %3773 = vmatprep.subr.bf16.mxu0 %v3772_v17  ;;  %v7503_v17 = vpack.c.bf16 %v4884_v21, %v4882_v7 }
 0x2ab   :  { %3391 = vmatpush1.bf16.msra.mxu1 %v3390_v48  ;;  %v7504_v48 = vpack.c.bf16 %v4891_v34, %v4889_v37 }
 0x2ac   :  { %3393 = vmatprep.subr.bf16.mxu1 %v3392_v61  ;;  %v7505_v61 = vpack.c.bf16 %v4908_v31, %v4904_v12 }
 0x2ad   :  { %3775 = vmatpush1.bf16.msra.mxu0 %v3774_v33  ;;  %v7506_v33 = vpack.c.bf16 %v4900_v60, %v4895_v57 }
 0x2ae   :  { %3777 = vmatprep.subr.bf16.mxu0 %v3776_v4  ;;  %v7507_v4 = vpack.c.bf16 %v4916_v11, %v4911_v28 }
 0x2af   :  { %3395 = vmatpush1.bf16.msra.mxu1 %v3394_v18  ;;  %v7508_v18 = vpack.c.bf16 %v7292_v53, %v4920_v42 }
 0x2b0   :  { %3397 = vmatprep.subr.bf16.mxu1 %v7501_v59  ;;  %v7509_v59 = vpack.c.bf16 %v7301_v29, %v7298_v39 }
 0x2b1   :  { %3779 = vmatpush1.bf16.msra.mxu0 %v7502_v26  ;;  %v7510_v26 = vpack.c.bf16 %v7297_v38, %v7295_v58 }
 0x2b2   :  { %3781 = vmatprep.subr.bf16.mxu0 %v7504_v48  ;;  %v7512_v48 = vpack.c.bf16 %v7308_v5, %v7305_v55 }
 0x2b3   :  { %3399 = vmatpush1.bf16.msra.mxu1 %v7503_v17  ;;  %v7511_v17 = vpack.c.bf16 %v7303_v63, %v7302_v56 }
 0x2b4   :  { %3401 = vmatprep.subr.bf16.mxu1 %v7505_v61  ;;  %v7513_v61 = vpack.c.bf16 %v7318_v2, %v7316_v22 }
 0x2b5   :  { %3783 = vmatpush1.bf16.msra.mxu0 %v7506_v33  ;;  %v7514_v33 = vpack.c.bf16 %v7313_v43, %v7312_v16 }
 0x2b6   :  { %3785 = vmatprep.subr.bf16.mxu0 %v7508_v18  ;;  %v7516_v18 = vpack.c.bf16 %v7384_v54, %v7383_v13  ;;  %v7594_v54 = vld [vmem:[#allocation188_spill] sm:$0xff] }
 0x2b7   :  { %3403 = vmatpush1.bf16.msra.mxu1 %v7507_v4  ;;  %v7515_v4 = vpack.c.bf16 %v7382_v14, %v7320_v24  ;;  %v7524_v14 = vld [vmem:[#allocation243_spill] sm:$0xff] }
 0x2b8   :  { %3405 = vmatprep.subr.bf16.mxu1 %v7509_v59  ;;  %v7517_v59 = vld [vmem:[#allocation14_spill] sm:$0xff] }
 0x2b9   :  { %3787 = vmatpush1.bf16.msra.mxu0 %v7510_v26  ;;  %v7518_v26 = vpack.c.bf16 %v7386_v50, %v7385_v44  ;;  %v7527_v50 = vld [vmem:[#allocation29_spill] sm:$0xff]  ;;  %v7529_v44 = vld [vmem:[#allocation38_spill] sm:$0xff] }
 0x2ba   :  { %3789 = vmatprep.subr.bf16.mxu0 %v7512_v48  ;;  %v7520_v48 = vld [vmem:[#allocation18_spill] sm:$0xff] }
 0x2bb   :  { %3407 = vmatpush1.bf16.msra.mxu1 %v7511_v17  ;;  %v7519_v17 = vld [vmem:[#allocation239_spill] sm:$0xff] }
 0x2bc   :  { %3409 = vmatprep.subr.bf16.mxu1 %v7513_v61  ;;  %v7521_v61 = vand.u32 4294901760, %v7415_v20  ;;  %v7531_v20 = vld [vmem:[#allocation41_spill] sm:$0xff] }
 0x2bd   :  { %3791 = vmatpush1.bf16.msra.mxu0 %v7514_v33  ;;  %v7522_v33 = vld [vmem:[#allocation20_spill] sm:$0xff] }
 0x2be   :  { %3793 = vmatprep.subr.bf16.mxu0 %v7516_v18  ;;  %v7525_v18 = vld [vmem:[#allocation23_spill] sm:$0xff] }
 0x2bf   :  { %3411 = vmatpush1.bf16.msra.mxu1 %v7515_v4  ;;  %v7523_v4 = vld [vmem:[#allocation27_spill] sm:$0xff] }
 0x2c0   :  { %3413 = vmatprep.subr.bf16.mxu1 %v7517_v59  ;;  %v7526_v59 = vand.u32 4294901760, %v7423_v36  ;;  %v7536_v36 = vld [vmem:[#allocation54_spill] sm:$0xff] }
 0x2c1   :  { %3795 = vmatpush1.bf16.msra.mxu0 %v7518_v26  ;;  %v7528_v26 = vld [vmem:[#allocation33_spill] sm:$0xff] }
 0x2c2   :  { %1258 = vmatmul.mubr.f32.vlgmr.msra.gmra.mrb[0].mxu1 %v7519_v17  ;;  %3797 = vmatprep.subr.bf16.mxu0 %v7522_v33  ;;  %v7534_v33 = vld [vmem:[#allocation47_spill] sm:$0xff] }
 0x2c3   :  { %3415 = vmatpush1.bf16.msra.mxu1 %v7520_v48  ;;  %1395 = vmatprep.mubr.f32.mxu1 %v7521_v61  ;;  %v7530_v48 = vld [vmem:[#allocation36_spill] sm:$0xff] }
 0x2c4   :  { %3417 = vmatprep.subr.bf16.mxu1 %v7523_v4  ;;  %2550 = vmatmul.mubr.f32.vlgmr.msra.gmra.mrb[0].mxu0 %v7524_v14  ;;  %v7532_v61 = vld [vmem:[#allocation44_spill] sm:$0xff]  ;;  %v7533_v4 = vld [vmem:[#allocation50_spill] sm:$0xff] }
 0x2c5   :  { %3799 = vmatpush1.bf16.msra.mxu0 %v7525_v18  ;;  %2687 = vmatprep.mubr.f32.mxu0 %v7526_v59  ;;  %v7535_v18 = vld [vmem:[#allocation53_spill] sm:$0xff]  ;;  %v7537_v59 = vld [vmem:[#allocation62_spill] sm:$0xff] }
 0x2c6   :  { %3801 = vmatprep.subr.bf16.mxu0 %v7528_v26  ;;  %v7539_v26 = vld [vmem:[#allocation66_spill] sm:$0xff] }
 0x2c7   :  { %3419 = vmatpush1.bf16.msra.mxu1 %v7527_v50  ;;  %v7538_v50 = vld [vmem:[#allocation59_spill] sm:$0xff] }
 0x2c8   :  { %3421 = vmatprep.subr.bf16.mxu1 %v7529_v44  ;;  %v7540_v44 = vld [vmem:[#allocation68_spill] sm:$0xff] }
 0x2c9   :  { %3803 = vmatpush1.bf16.msra.mxu0 %v7530_v48  ;;  %v7541_v48 = vld [vmem:[#allocation74_spill] sm:$0xff] }
 0x2ca   :  { %3805 = vmatprep.subr.bf16.mxu0 %v7532_v61  ;;  %v7543_v61 = vld [vmem:[#allocation78_spill] sm:$0xff] }
 0x2cb   :  { %3423 = vmatpush1.bf16.msra.mxu1 %v7531_v20  ;;  %v7542_v20 = vld [vmem:[#allocation71_spill] sm:$0xff] }
 0x2cc   :  { %3425 = vmatprep.subr.bf16.mxu1 %v7533_v4  ;;  %v7544_v4 = vld [vmem:[#allocation80_spill] sm:$0xff] }
 0x2cd   :  { %3807 = vmatpush1.bf16.msra.mxu0 %v7534_v33  ;;  %v7545_v33 = vld [vmem:[#allocation86_spill] sm:$0xff] }
 0x2ce   :  { %3809 = vmatprep.subr.bf16.mxu0 %v7536_v36  ;;  %v7547_v36 = vld [vmem:[#allocation90_spill] sm:$0xff] }
 0x2cf   :  { %3427 = vmatpush1.bf16.msra.mxu1 %v7535_v18  ;;  %v7546_v18 = vld [vmem:[#allocation83_spill] sm:$0xff] }
 0x2d0   :  { %3429 = vmatprep.subr.bf16.mxu1 %v7537_v59  ;;  %v7548_v59 = vld [vmem:[#allocation92_spill] sm:$0xff] }
 0x2d1   :  { %3811 = vmatpush1.bf16.msra.mxu0 %v7538_v50  ;;  %v7549_v50 = vld [vmem:[#allocation98_spill] sm:$0xff] }
 0x2d2   :  { %3813 = vmatprep.subr.bf16.mxu0 %v7540_v44  ;;  %v7551_v44 = vld [vmem:[#allocation102_spill] sm:$0xff] }
 0x2d3   :  { %3431 = vmatpush1.bf16.msra.mxu1 %v7539_v26  ;;  %v7550_v26 = vld [vmem:[#allocation95_spill] sm:$0xff] }
 0x2d4   :  { %3433 = vmatprep.subr.bf16.mxu1 %v7541_v48  ;;  %v7552_v48 = vld [vmem:[#allocation104_spill] sm:$0xff] }
 0x2d5   :  { %3815 = vmatpush1.bf16.msra.mxu0 %v7542_v20  ;;  %v7553_v20 = vld [vmem:[#allocation110_spill] sm:$0xff] }
 0x2d6   :  { %3817 = vmatprep.subr.bf16.mxu0 %v7544_v4  ;;  %v7555_v4 = vld [vmem:[#allocation113_spill] sm:$0xff] }
 0x2d7   :  { %3435 = vmatpush1.bf16.msra.mxu1 %v7543_v61  ;;  %v7554_v61 = vld [vmem:[#allocation107_spill] sm:$0xff] }
 0x2d8   :  { %3437 = vmatprep.subr.bf16.mxu1 %v7545_v33  ;;  %v7556_v33 = vld [vmem:[#allocation114_spill] sm:$0xff] }
 0x2d9   :  { %3819 = vmatpush1.bf16.msra.mxu0 %v7546_v18  ;;  %v7557_v18 = vld [vmem:[#allocation116_spill] sm:$0xff] }
 0x2da   :  { %3821 = vmatprep.subr.bf16.mxu0 %v7548_v59  ;;  %v7559_v59 = vld [vmem:[#allocation117_spill] sm:$0xff] }
 0x2db   :  { %3439 = vmatpush1.bf16.msra.mxu1 %v7547_v36  ;;  %v7558_v36 = vld [vmem:[#allocation115_spill] sm:$0xff] }
 0x2dc   :  { %3441 = vmatprep.subr.bf16.mxu1 %v7549_v50  ;;  %v7560_v50 = vld [vmem:[#allocation118_spill] sm:$0xff] }
 0x2dd   :  { %3823 = vmatpush1.bf16.msra.mxu0 %v7550_v26  ;;  %v7561_v26 = vld [vmem:[#allocation120_spill] sm:$0xff] }
 0x2de   :  { %3825 = vmatprep.subr.bf16.mxu0 %v7552_v48  ;;  %v7563_v48 = vld [vmem:[#allocation121_spill] sm:$0xff] }
 0x2df   :  { %3443 = vmatpush1.bf16.msra.mxu1 %v7551_v44  ;;  %v7562_v44 = vld [vmem:[#allocation119_spill] sm:$0xff] }
 0x2e0   :  { %3445 = vmatprep.subr.bf16.mxu1 %v7553_v20  ;;  %v7564_v20 = vld [vmem:[#allocation122_spill] sm:$0xff] }
 0x2e1   :  { %3827 = vmatpush1.bf16.msra.mxu0 %v7554_v61  ;;  %v7565_v61 = vld [vmem:[#allocation124_spill] sm:$0xff] }
 0x2e2   :  { %3829 = vmatprep.subr.bf16.mxu0 %v7556_v33  ;;  %v7567_v33 = vld [vmem:[#allocation125_spill] sm:$0xff] }
 0x2e3   :  { %3447 = vmatpush1.bf16.msra.mxu1 %v7555_v4  ;;  %v7566_v4 = vld [vmem:[#allocation123_spill] sm:$0xff] }
 0x2e4   :  { %3449 = vmatprep.subr.bf16.mxu1 %v7557_v18  ;;  %v7568_v18 = vld [vmem:[#allocation134_spill] sm:$0xff] }
 0x2e5   :  { %3831 = vmatpush1.bf16.msra.mxu0 %v7558_v36  ;;  %v7569_v36 = vld [vmem:[#allocation136_spill] sm:$0xff] }
 0x2e6   :  { %3833 = vmatprep.subr.bf16.mxu0 %v7560_v50  ;;  %v7571_v50 = vld [vmem:[#allocation157_spill] sm:$0xff] }
 0x2e7   :  { %3451 = vmatpush1.bf16.msra.mxu1 %v7559_v59  ;;  %v7570_v59 = vld [vmem:[#allocation135_spill] sm:$0xff] }
 0x2e8   :  { %3453 = vmatprep.subr.bf16.mxu1 %v7561_v26  ;;  %v7572_v26 = vld [vmem:[#allocation158_spill] sm:$0xff] }
 0x2e9   :  { %3835 = vmatpush1.bf16.msra.mxu0 %v7562_v44  ;;  %v7573_v44 = vld [vmem:[#allocation160_spill] sm:$0xff] }
 0x2ea   :  { %3837 = vmatprep.subr.bf16.mxu0 %v7564_v20  ;;  %v7575_v20 = vld [vmem:[#allocation161_spill] sm:$0xff] }
 0x2eb   :  { %3455 = vmatpush1.bf16.msra.mxu1 %v7563_v48  ;;  %v7574_v48 = vld [vmem:[#allocation159_spill] sm:$0xff] }
 0x2ec   :  { %3457 = vmatprep.subr.bf16.mxu1 %v7565_v61  ;;  %v7576_v61 = vld [vmem:[#allocation162_spill] sm:$0xff] }
 0x2ed   :  { %3839 = vmatpush1.bf16.msra.mxu0 %v7566_v4  ;;  %v7577_v4 = vld [vmem:[#allocation168_spill] sm:$0xff] }
 0x2ee   :  { %3841 = vmatprep.subr.bf16.mxu0 %v7568_v18  ;;  %v7579_v18 = vld [vmem:[#allocation170_spill] sm:$0xff] }
 0x2ef   :  { %3459 = vmatpush1.bf16.msra.mxu1 %v7567_v33  ;;  %v7578_v33 = vld [vmem:[#allocation164_spill] sm:$0xff] }
 0x2f0   :  { %3461 = vmatprep.subr.bf16.mxu1 %v7569_v36  ;;  %v7580_v36 = vld [vmem:[#allocation174_spill] sm:$0xff] }
 0x2f1   :  { %3843 = vmatpush1.bf16.msra.mxu0 %v7570_v59  ;;  %v7581_v59 = vld [vmem:[#allocation179_spill] sm:$0xff] }
 0x2f2   :  { %3845 = vmatprep.subr.bf16.mxu0 %v7572_v26  ;;  %v7582_v26 = vand.u32 4294901760, %v7400_v35 }
 0x2f3   :  { %3463 = vmatpush1.bf16.msra.mxu1 %v7571_v50 }
 0x2f4   :  { %3465 = vmatprep.subr.bf16.mxu1 %v7573_v44  ;;  %v7583_v44 = vand.u32 4294901760, %v7401_v52  ;;  %v7591_v52 = vand.u32 4294901760, %v7409_v41 }
 0x2f5   :  { %3847 = vmatpush1.bf16.msra.mxu0 %v7574_v48  ;;  %v7584_v48 = vld [vmem:[#allocation177_spill] sm:$0xff] }
 0x2f6   :  { %3849 = vmatprep.subr.bf16.mxu0 %v7576_v61  ;;  %v3476_v50 = vpack.c.bf16 %v7583_v44, %v7582_v26  ;;  %v7586_v61 = vld [vmem:[#allocation185_spill] sm:$0xff]  ;;  %v7592_v44 = vld [vmem:[#allocation28_spill] sm:$0xff] }
 0x2f7   :  { %3467 = vmatpush1.bf16.msra.mxu1 %v7575_v20  ;;  %v7585_v20 = vld [vmem:[#allocation182_spill] sm:$0xff]  ;;  %v7593_v26 = vand.u32 4294901760, %v7592_v44  ;;  %v7605_v44 = vld [vmem:[#allocation32_spill] sm:$0xff] }
 0x2f8   :  { %3469 = vmatprep.subr.bf16.mxu1 %v7577_v4  ;;  %v7587_v4 = vand.u32 4294901760, %v7405_v3  ;;  %v7596_v3 = vld [vmem:[#allocation24_spill] sm:$0xff] }
 0x2f9   :  { %3851 = vmatpush1.bf16.msra.mxu0 %v7578_v33  ;;  %v7588_v33 = vand.u32 4294901760, %v7406_v45  ;;  %v7598_v45 = vld [vmem:[#allocation25_spill] sm:$0xff] }
 0x2fa   :  { %3853 = vmatprep.subr.bf16.mxu0 %v7580_v36  ;;  %v7589_v36 = vand.u32 4294901760, %v7407_v1  ;;  %v7600_v1 = vld [vmem:[#allocation236_spill] sm:$0xff] }
 0x2fb   :  { %3471 = vmatpush1.bf16.msra.mxu1 %v7579_v18  ;;  %v3478_v18 = vpack.c.bf16 %v7588_v33, %v7587_v4  ;;  %v7599_v33 = vand.u32 4294901760, %v7598_v45 }
 0x2fc   :  { %3473 = vmatprep.subr.bf16.mxu1 %v7581_v59  ;;  %v7590_v59 = vand.u32 4294901760, %v7408_v47  ;;  %v7601_v47 = vld [vmem:[#allocation30_spill] sm:$0xff] }
 0x2fd   :  { %3855 = vmatpush1.bf16.msra.mxu0 %v7584_v48  ;;  %v3480_v48 = vpack.c.bf16 %v7593_v26, %v7591_v52  ;;  %v7602_v4 = vand.u32 4294901760, %v7601_v47  ;;  %v7606_v52 = vand.u32 4294901760, %v7605_v44  ;;  %v7607_v26 = vld [vmem:[#allocation34_spill] sm:$0xff]  ;;  %v7615_v47 = vld [vmem:[#allocation35_spill] sm:$0xff] }
 0x2fe   :  { %3857 = vmatprep.subr.bf16.mxu0 %v7586_v61  ;;  %v3860_v35 = vpack.c.bf16 %v7590_v59, %v7589_v36  ;;  %v7595_v61 = vand.u32 4294901760, %v7519_v17  ;;  %v7603_v36 = vld [vmem:[#allocation31_spill] sm:$0xff] }
 0x2ff   :  { %3475 = vmatpush1.bf16.msra.mxu1 %v7585_v20  ;;  %v7597_v20 = vand.u32 4294901760, %v7596_v3  ;;  %v7604_v41 = vand.u32 4294901760, %v7603_v36  ;;  %v7609_v17 = vld [vmem:[#allocation39_spill] sm:$0xff]  ;;  %v7611_v3 = vld [vmem:[#allocation40_spill] sm:$0xff]  ;;  %v7617_v36 = vld [vmem:[#allocation37_spill] sm:$0xff] }
 0x300   :  { %3477 = vmatprep.subr.bf16.mxu1 %v3476_v50  ;;  %v7612_v45 = vand.u32 4294901760, %v7611_v3  ;;  %v7625_v3 = vld [vmem:[#allocation46_spill] sm:$0xff] }
 0x301   :  { %3859 = vmatpush1.bf16.msra.mxu0 %v7594_v54  ;;  %v3862_v50 = vpack.c.bf16 %v7599_v33, %v7597_v20  ;;  %v3482_v59 = vpack.c.bf16 %v7604_v41, %v7602_v4  ;;  %v7608_v54 = vand.u32 4294901760, %v7607_v26  ;;  %v7614_v33 = vld [vmem:[#allocation240_spill] sm:$0xff]  ;;  %v7616_v4 = vand.u32 4294901760, %v7615_v47 }
 0x302   :  { %1399 = vmatmul.mubr.f32.vlgmr.msra.gmra.mrb[0].mxu1 %v7595_v61  ;;  %3861 = vmatprep.subr.bf16.mxu0 %v3860_v35  ;;  %v7610_v61 = vand.u32 4294901760, %v7609_v17  ;;  %v7618_v41 = vand.u32 4294901760, %v7617_v36  ;;  %v7621_v35 = vld [vmem:[#allocation43_spill] sm:$0xff]  ;;  %v7623_v17 = vld [vmem:[#allocation45_spill] sm:$0xff] }
 0x303   :  { %3479 = vmatpush1.bf16.msra.mxu1 %v3478_v18  ;;  %1662 = vmatprep.mubr.f32.mxu1 %v7600_v1  ;;  %v3864_v13 = vpack.c.bf16 %v7608_v54, %v7606_v52  ;;  %v7613_v18 = vand.u32 4294901760, %v7524_v14  ;;  %v7619_v54 = vld [vmem:[#allocation42_spill] sm:$0xff]  ;;  %v7622_v52 = vand.u32 4294901760, %v7621_v35  ;;  %v7626_v14 = vand.u32 4294901760, %v7625_v3  ;;  %v7637_v35 = vld [vmem:[#allocation56_spill] sm:$0xff] }
 0x304   :  { %3481 = vmatprep.subr.bf16.mxu1 %v3480_v48  ;;  %v3484_v20 = vpack.c.bf16 %v7612_v45, %v7610_v61  ;;  %v3866_v44 = vpack.c.bf16 %v7618_v41, %v7616_v4  ;;  %v7620_v48 = vand.u32 4294901760, %v7619_v54  ;;  %v7624_v61 = vand.u32 4294901760, %v7623_v17  ;;  %v7631_v4 = vld [vmem:[#allocation48_spill] sm:$0xff]  ;;  %v7635_v54 = vld [vmem:[#allocation55_spill] sm:$0xff]  ;;  %v7641_v3 = vld [vmem:[#allocation58_spill] sm:$0xff] }
 0x305   :  { %2691 = vmatmul.mubr.f32.vlgmr.msra.gmra.mrb[0].mxu0 %v7613_v18 }
 0x306   :  { %3863 = vmatpush1.bf16.msra.mxu0 %v3862_v50  ;;  %2954 = vmatprep.mubr.f32.mxu0 %v7614_v33  ;;  %v3486_v26 = vpack.c.bf16 %v7622_v52, %v7620_v48  ;;  %v3868_v45 = vpack.c.bf16 %v7626_v14, %v7624_v61  ;;  %v7627_v50 = vld [vmem:[#allocation51_spill] sm:$0xff]  ;;  %v7629_v33 = vld [vmem:[#allocation52_spill] sm:$0xff]  ;;  %v7636_v48 = vand.u32 4294901760, %v7635_v54  ;;  %v7638_v52 = vand.u32 4294901760, %v7637_v35  ;;  %v7639_v61 = vld [vmem:[#allocation57_spill] sm:$0xff] }
 0x307   :  { %3483 = vmatpush1.bf16.msra.mxu1 %v3482_v59  ;;  %3865 = vmatprep.subr.bf16.mxu0 %v3864_v13  ;;  %v7628_v18 = vand.u32 4294901760, %v7627_v50  ;;  %v7630_v47 = vand.u32 4294901760, %v7629_v33  ;;  %v7632_v59 = vand.u32 4294901760, %v7631_v4  ;;  %v7633_v13 = vld [vmem:[#allocation49_spill] sm:$0xff]  ;;  %v7642_v14 = vand.u32 4294901760, %v7641_v3  ;;  %v7643_v33 = vld [vmem:[#allocation63_spill] sm:$0xff] }
 0x308   :  { %3485 = vmatprep.subr.bf16.mxu1 %v3484_v20  ;;  %v7634_v36 = vand.u32 4294901760, %v7633_v13  ;;  %v3490_v17 = vpack.c.bf16 %v7638_v52, %v7636_v48  ;;  %v7640_v20 = vand.u32 4294901760, %v7639_v61  ;;  %v7651_v54 = vld [vmem:[#allocation65_spill] sm:$0xff]  ;;  %v7653_v35 = vld [vmem:[#allocation67_spill] sm:$0xff]  ;;  %v7657_v3 = vld [vmem:[#allocation70_spill] sm:$0xff] }
 0x309   :  { %v3488_v1 = vpack.c.bf16 %v7630_v47, %v7628_v18  ;;  %v7645_v18 = vld [vmem:[#allocation64_spill] sm:$0xff]  ;;  %v7652_v48 = vand.u32 4294901760, %v7651_v54  ;;  %v7654_v52 = vand.u32 4294901760, %v7653_v35  ;;  %v7667_v54 = vld [vmem:[#allocation77_spill] sm:$0xff]  ;;  %v7669_v35 = vld [vmem:[#allocation79_spill] sm:$0xff] }
 0x30a   :  { %3867 = vmatpush1.bf16.msra.mxu0 %v3866_v44  ;;  %v3870_v41 = vpack.c.bf16 %v7634_v36, %v7632_v59  ;;  %v3872_v50 = vpack.c.bf16 %v7642_v14, %v7640_v20  ;;  %v7644_v44 = vand.u32 4294901760, %v7643_v33  ;;  %v7646_v47 = vand.u32 4294901760, %v7645_v18  ;;  %v7647_v59 = vld [vmem:[#allocation60_spill] sm:$0xff]  ;;  %v7655_v20 = vld [vmem:[#allocation69_spill] sm:$0xff] }
 0x30b   :  { %3487 = vmatpush1.bf16.msra.mxu1 %v3486_v26  ;;  %3869 = vmatprep.subr.bf16.mxu0 %v3868_v45  ;;  %v7648_v26 = vand.u32 4294901760, %v7647_v59  ;;  %v7649_v45 = vld [vmem:[#allocation61_spill] sm:$0xff]  ;;  %v3494_v61 = vpack.c.bf16 %v7654_v52, %v7652_v48  ;;  %v7658_v14 = vand.u32 4294901760, %v7657_v3  ;;  %v7661_v18 = vld [vmem:[#allocation76_spill] sm:$0xff]  ;;  %v7668_v48 = vand.u32 4294901760, %v7667_v54  ;;  %v7673_v3 = vld [vmem:[#allocation82_spill] sm:$0xff] }
 0x30c   :  { %3489 = vmatprep.subr.bf16.mxu1 %v3488_v1  ;;  %v3492_v4 = vpack.c.bf16 %v7646_v47, %v7644_v44  ;;  %v7650_v13 = vand.u32 4294901760, %v7649_v45  ;;  %v7656_v1 = vand.u32 4294901760, %v7655_v20  ;;  %v7659_v44 = vld [vmem:[#allocation75_spill] sm:$0xff]  ;;  %v7662_v47 = vand.u32 4294901760, %v7661_v18  ;;  %v7677_v18 = vld [vmem:[#allocation88_spill] sm:$0xff]  ;;  %v7683_v54 = vld [vmem:[#allocation89_spill] sm:$0xff] }
 0x30d   :  { %v7670_v52 = vand.u32 4294901760, %v7669_v35  ;;  %v7685_v35 = vld [vmem:[#allocation91_spill] sm:$0xff] }
 0x30e   :  { %3871 = vmatpush1.bf16.msra.mxu0 %v3870_v41  ;;  %v3874_v36 = vpack.c.bf16 %v7650_v13, %v7648_v26  ;;  %v3876_v33 = vpack.c.bf16 %v7658_v14, %v7656_v1  ;;  %v7660_v41 = vand.u32 4294901760, %v7659_v44  ;;  %v7663_v26 = vld [vmem:[#allocation72_spill] sm:$0xff]  ;;  %v7671_v1 = vld [vmem:[#allocation81_spill] sm:$0xff]  ;;  %v7674_v14 = vand.u32 4294901760, %v7673_v3  ;;  %v7689_v3 = vld [vmem:[#allocation94_spill] sm:$0xff] }
 0x30f   :  { %3491 = vmatpush1.bf16.msra.mxu1 %v3490_v17  ;;  %3873 = vmatprep.subr.bf16.mxu0 %v3872_v50  ;;  %v7664_v17 = vand.u32 4294901760, %v7663_v26  ;;  %v7665_v50 = vld [vmem:[#allocation73_spill] sm:$0xff]  ;;  %v3498_v20 = vpack.c.bf16 %v7670_v52, %v7668_v48  ;;  %v7684_v48 = vand.u32 4294901760, %v7683_v54  ;;  %v7686_v52 = vand.u32 4294901760, %v7685_v35  ;;  %v7701_v35 = vld [vmem:[#allocation103_spill] sm:$0xff] }
 0x310   :  { %3493 = vmatprep.subr.bf16.mxu1 %v3492_v4  ;;  %v3496_v59 = vpack.c.bf16 %v7662_v47, %v7660_v41  ;;  %v7666_v45 = vand.u32 4294901760, %v7665_v50  ;;  %v7672_v4 = vand.u32 4294901760, %v7671_v1  ;;  %v7675_v41 = vld [vmem:[#allocation87_spill] sm:$0xff]  ;;  %v7678_v47 = vand.u32 4294901760, %v7677_v18  ;;  %v7693_v18 = vld [vmem:[#allocation100_spill] sm:$0xff]  ;;  %v7699_v54 = vld [vmem:[#allocation101_spill] sm:$0xff] }
 0x311   :  { %v3502_v1 = vpack.c.bf16 %v7686_v52, %v7684_v48  ;;  %v7700_v48 = vand.u32 4294901760, %v7699_v54  ;;  %v7702_v52 = vand.u32 4294901760, %v7701_v35  ;;  %v7715_v54 = vld [vmem:[#allocation126_spill] sm:$0xff]  ;;  %v7717_v35 = vld [vmem:[#allocation127_spill] sm:$0xff] }
 0x312   :  { %3875 = vmatpush1.bf16.msra.mxu0 %v3874_v36  ;;  %v3878_v13 = vpack.c.bf16 %v7666_v45, %v7664_v17  ;;  %v3880_v44 = vpack.c.bf16 %v7674_v14, %v7672_v4  ;;  %v7676_v36 = vand.u32 4294901760, %v7675_v41  ;;  %v7679_v17 = vld [vmem:[#allocation84_spill] sm:$0xff]  ;;  %v7687_v4 = vld [vmem:[#allocation93_spill] sm:$0xff]  ;;  %v7690_v14 = vand.u32 4294901760, %v7689_v3  ;;  %v7705_v3 = vld [vmem:[#allocation106_spill] sm:$0xff] }
 0x313   :  { %3495 = vmatpush1.bf16.msra.mxu1 %v3494_v61  ;;  %3877 = vmatprep.subr.bf16.mxu0 %v3876_v33  ;;  %v7680_v61 = vand.u32 4294901760, %v7679_v17  ;;  %v7681_v33 = vld [vmem:[#allocation85_spill] sm:$0xff] }
 0x314   :  { %3497 = vmatprep.subr.bf16.mxu1 %v3496_v59  ;;  %v3500_v26 = vpack.c.bf16 %v7678_v47, %v7676_v36  ;;  %v7682_v50 = vand.u32 4294901760, %v7681_v33  ;;  %v7688_v59 = vand.u32 4294901760, %v7687_v4  ;;  %v7691_v36 = vld [vmem:[#allocation99_spill] sm:$0xff]  ;;  %v7694_v47 = vand.u32 4294901760, %v7693_v18  ;;  %v7709_v18 = vld [vmem:[#allocation112_spill] sm:$0xff] }
 0x315   :  { %v3506_v4 = vpack.c.bf16 %v7702_v52, %v7700_v48  ;;  %v7716_v48 = vand.u32 4294901760, %v7715_v54  ;;  %v7718_v52 = vand.u32 4294901760, %v7717_v35  ;;  %v7731_v54 = vld [vmem:[#allocation137_spill] sm:$0xff]  ;;  %v7733_v35 = vld [vmem:[#allocation138_spill] sm:$0xff] }
 0x316   :  { %3879 = vmatpush1.bf16.msra.mxu0 %v3878_v13  ;;  %v3882_v45 = vpack.c.bf16 %v7682_v50, %v7680_v61  ;;  %v3884_v41 = vpack.c.bf16 %v7690_v14, %v7688_v59  ;;  %v7692_v13 = vand.u32 4294901760, %v7691_v36  ;;  %v7695_v61 = vld [vmem:[#allocation96_spill] sm:$0xff]  ;;  %v7703_v59 = vld [vmem:[#allocation105_spill] sm:$0xff]  ;;  %v7706_v14 = vand.u32 4294901760, %v7705_v3 }
 0x317   :  { %3499 = vmatpush1.bf16.msra.mxu1 %v3498_v20  ;;  %3881 = vmatprep.subr.bf16.mxu0 %v3880_v44  ;;  %v7696_v20 = vand.u32 4294901760, %v7695_v61  ;;  %v7697_v44 = vld [vmem:[#allocation97_spill] sm:$0xff] }
 0x318   :  { %3501 = vmatprep.subr.bf16.mxu1 %v3500_v26  ;;  %v3504_v17 = vpack.c.bf16 %v7694_v47, %v7692_v13  ;;  %v7698_v33 = vand.u32 4294901760, %v7697_v44  ;;  %v7704_v26 = vand.u32 4294901760, %v7703_v59  ;;  %v7707_v13 = vld [vmem:[#allocation111_spill] sm:$0xff]  ;;  %v7710_v47 = vand.u32 4294901760, %v7709_v18  ;;  %v7721_v3 = vld [vmem:[#allocation129_spill] sm:$0xff] }
 0x319   :  { %v3510_v59 = vpack.c.bf16 %v7718_v52, %v7716_v48  ;;  %v7725_v18 = vld [vmem:[#allocation133_spill] sm:$0xff]  ;;  %v7732_v48 = vand.u32 4294901760, %v7731_v54  ;;  %v7734_v52 = vand.u32 4294901760, %v7733_v35  ;;  %v7747_v54 = vand.u32 4294901760, %v7491_v62 }
 0x31a   :  { %3883 = vmatpush1.bf16.msra.mxu0 %v3882_v45  ;;  %v3886_v50 = vpack.c.bf16 %v7698_v33, %v7696_v20  ;;  %v3888_v36 = vpack.c.bf16 %v7706_v14, %v7704_v26  ;;  %v7708_v45 = vand.u32 4294901760, %v7707_v13  ;;  %v7711_v20 = vld [vmem:[#allocation108_spill] sm:$0xff]  ;;  %v7722_v14 = vand.u32 4294901760, %v7721_v3 }
 0x31b   :  { %3503 = vmatpush1.bf16.msra.mxu1 %v3502_v1  ;;  %3885 = vmatprep.subr.bf16.mxu0 %v3884_v41  ;;  %v7712_v1 = vand.u32 4294901760, %v7711_v20  ;;  %v7713_v41 = vld [vmem:[#allocation109_spill] sm:$0xff]  ;;  %v7719_v26 = vld [vmem:[#allocation128_spill] sm:$0xff]  ;;  %v7754_v62 = vand.u32 4294901760, %v7498_v9 }
 0x31c   :  { %3505 = vmatprep.subr.bf16.mxu1 %v3504_v17  ;;  %v3508_v61 = vpack.c.bf16 %v7710_v47, %v7708_v45  ;;  %v7714_v44 = vand.u32 4294901760, %v7713_v41  ;;  %v7720_v17 = vand.u32 4294901760, %v7719_v26  ;;  %v7723_v45 = vld [vmem:[#allocation132_spill] sm:$0xff]  ;;  %v7726_v47 = vand.u32 4294901760, %v7725_v18 }
 0x31d   :  { %v3514_v26 = vpack.c.bf16 %v7734_v52, %v7732_v48  ;;  %v7737_v3 = vld [vmem:[#allocation140_spill] sm:$0xff]  ;;  %v7751_v52 = vand.u32 4294901760, %v7495_v19  ;;  %v7758_v19 = vand.u32 4294901760, %v4875_v0  ;;  %v7765_v0 = vand.u32 4294901760, %v4891_v34 }
 0x31e   :  { %3887 = vmatpush1.bf16.msra.mxu0 %v3886_v50  ;;  %v3890_v33 = vpack.c.bf16 %v7714_v44, %v7712_v1  ;;  %v3892_v13 = vpack.c.bf16 %v7722_v14, %v7720_v17  ;;  %v7724_v50 = vand.u32 4294901760, %v7723_v45  ;;  %v7727_v1 = vld [vmem:[#allocation130_spill] sm:$0xff]  ;;  %v7735_v17 = vld [vmem:[#allocation139_spill] sm:$0xff]  ;;  %v7738_v14 = vand.u32 4294901760, %v7737_v3 }
 0x31f   :  { %3507 = vmatpush1.bf16.msra.mxu1 %v3506_v4  ;;  %3889 = vmatprep.subr.bf16.mxu0 %v3888_v36  ;;  %v7728_v4 = vand.u32 4294901760, %v7727_v1  ;;  %v7729_v36 = vld [vmem:[#allocation131_spill] sm:$0xff]  ;;  %v7742_v1 = vld [vmem:[#allocation141_spill] sm:$0xff]  ;;  %v7756_v3 = vand.u32 4294901760, %v7500_v51  ;;  %v7763_v51 = vand.u32 4294901760, %v4884_v21  ;;  %v7770_v21 = vand.u32 4294901760, %v4911_v28 }
 0x320   :  { %3509 = vmatprep.subr.bf16.mxu1 %v3508_v61  ;;  %v3512_v20 = vpack.c.bf16 %v7726_v47, %v7724_v50  ;;  %v7730_v41 = vand.u32 4294901760, %v7729_v36  ;;  %v7736_v61 = vand.u32 4294901760, %v7735_v17  ;;  %v7740_v50 = vld [vmem:[#allocation144_spill] sm:$0xff] }
 0x321   :  { %v7741_v18 = vand.u32 4294901760, %v7740_v50  ;;  %v7764_v50 = vand.u32 4294901760, %v4889_v37  ;;  %v7771_v37 = vand.u32 4294901760, %v4916_v11  ;;  %v7778_v11 = vand.u32 4294901760, %v7302_v56 }
 0x322   :  { %3891 = vmatpush1.bf16.msra.mxu0 %v3890_v33  ;;  %v3894_v44 = vpack.c.bf16 %v7730_v41, %v7728_v4  ;;  %v3896_v45 = vpack.c.bf16 %v7738_v14, %v7736_v61  ;;  %v7739_v33 = vand.u32 4294901760, %v7486_v15  ;;  %v7746_v41 = vand.u32 4294901760, %v7490_v8 }
 0x323   :  { %3511 = vmatpush1.bf16.msra.mxu1 %v3510_v59  ;;  %3893 = vmatprep.subr.bf16.mxu0 %v3892_v13  ;;  %v7743_v59 = vand.u32 4294901760, %v7742_v1  ;;  %v7744_v13 = vld [vmem:[#allocation142_spill] sm:$0xff]  ;;  %v7749_v15 = vand.u32 4294901760, %v7493_v25  ;;  %v7753_v61 = vand.u32 4294901760, %v7497_v6  ;;  %v7760_v6 = vand.u32 4294901760, %v4869_v49 }
 0x324   :  { %3513 = vmatprep.subr.bf16.mxu1 %v3512_v20  ;;  %v3516_v47 = vpack.c.bf16 %v7741_v18, %v7739_v33  ;;  %v7745_v4 = vand.u32 4294901760, %v7744_v13  ;;  %v3518_v48 = vpack.c.bf16 %v7747_v54, %v7746_v41  ;;  %v7748_v20 = vand.u32 4294901760, %v7492_v10 }
 0x325   :  { %v7755_v10 = vand.u32 4294901760, %v7499_v23  ;;  %v7761_v33 = vand.u32 4294901760, %v4872_v46  ;;  %v7762_v23 = vand.u32 4294901760, %v4882_v7  ;;  %v3908_v18 = vpack.c.bf16 %v7765_v0, %v7764_v50  ;;  %v7814_v50 = vld [vmem:[#allocation53_spill] sm:$0xff]  ;;  %v7815_v0 = vld [vmem:[#allocation54_spill] sm:$0xff] }
 0x326   :  { %3895 = vmatpush1.bf16.msra.mxu0 %v3894_v44  ;;  %v3898_v36 = vpack.c.bf16 %v7745_v4, %v7743_v59  ;;  %v3900_v35 = vpack.c.bf16 %v7749_v15, %v7748_v20  ;;  %v7750_v44 = vand.u32 4294901760, %v7494_v30  ;;  %v7757_v30 = vand.u32 4294901760, %v7364_v27 }
 0x327   :  { %3515 = vmatpush1.bf16.msra.mxu1 %v3514_v26  ;;  %3897 = vmatprep.subr.bf16.mxu0 %v3896_v45  ;;  %v7752_v26 = vand.u32 4294901760, %v7496_v40  ;;  %v3522_v25 = vpack.c.bf16 %v7755_v10, %v7754_v62  ;;  %v7759_v40 = vand.u32 4294901760, %v4878_v32  ;;  %v3906_v9 = vpack.c.bf16 %v7761_v33, %v7760_v6  ;;  %v7799_v62 = vld [vmem:[#allocation18_spill] sm:$0xff]  ;;  %v7800_v10 = vld [vmem:[#allocation236_spill] sm:$0xff] }
 0x328   :  { %3517 = vmatprep.subr.bf16.mxu1 %v3516_v47  ;;  %v3520_v17 = vpack.c.bf16 %v7751_v52, %v7750_v44  ;;  %v3904_v14 = vpack.c.bf16 %v7757_v30, %v7756_v3  ;;  %v3526_v27 = vpack.c.bf16 %v7763_v51, %v7762_v23  ;;  %v7766_v32 = vand.u32 4294901760, %v4904_v12  ;;  %v7791_v52 = vld [vmem:[#allocation187_spill] sm:$0xff]  ;;  %v7803_v30 = vld [vmem:[#allocation241_spill] sm:$0xff]  ;;  %v7808_v6 = vld [vmem:[#allocation38_spill] sm:$0xff] }
 0x329   :  { %v3902_v8 = vpack.c.bf16 %v7753_v61, %v7752_v26  ;;  %v3524_v45 = vpack.c.bf16 %v7759_v40, %v7758_v19  ;;  %v7767_v49 = vand.u32 4294901760, %v4908_v31  ;;  %v7768_v46 = vand.u32 4294901760, %v4895_v57  ;;  %v7802_v3 = vld [vmem:[#allocation27_spill] sm:$0xff]  ;;  %v7805_v19 = vld [vmem:[#allocation240_spill] sm:$0xff]  ;;  %v7806_v40 = vld [vmem:[#allocation29_spill] sm:$0xff] }
 0x32a   :  { %3899 = vmatpush1.bf16.msra.mxu0 %v3898_v36  ;;  %v7769_v1 = vand.u32 4294901760, %v4900_v60  ;;  %v3530_v34 = vpack.c.bf16 %v7771_v37, %v7770_v21  ;;  %v7772_v59 = vand.u32 4294901760, %v4920_v42  ;;  %v7773_v12 = vand.u32 4294901760, %v7292_v53  ;;  %v7809_v33 = vld [vmem:[#allocation36_spill] sm:$0xff]  ;;  %v7812_v51 = vld [vmem:[#allocation50_spill] sm:$0xff] }
 0x32b   :  { %3519 = vmatpush1.bf16.msra.mxu1 %v3518_v48  ;;  %3901 = vmatprep.subr.bf16.mxu0 %v3900_v35  ;;  %v3528_v47 = vpack.c.bf16 %v7767_v49, %v7766_v32  ;;  %v7774_v31 = vand.u32 4294901760, %v7298_v39  ;;  %v7775_v57 = vand.u32 4294901760, %v7301_v29  ;;  %v7776_v60 = vand.u32 4294901760, %v7295_v58  ;;  %v7789_v35 = vld [vmem:[#allocation186_spill] sm:$0xff]  ;;  %v7811_v23 = vld [vmem:[#allocation44_spill] sm:$0xff]  ;;  %v7817_v32 = vld [vmem:[#allocation59_spill] sm:$0xff] }
 0x32c   :  { %3521 = vmatprep.subr.bf16.mxu1 %v3520_v17  ;;  %v3910_v7 = vpack.c.bf16 %v7769_v1, %v7768_v46  ;;  %v3912_v13 = vpack.c.bf16 %v7773_v12, %v7772_v59  ;;  %v7777_v36 = vand.u32 4294901760, %v7297_v38  ;;  %v7779_v42 = vand.u32 4294901760, %v7303_v63  ;;  %v7818_v49 = vld [vmem:[#allocation66_spill] sm:$0xff]  ;;  %v7821_v1 = vld [vmem:[#allocation71_spill] sm:$0xff]  ;;  %v7823_v21 = vld [vmem:[#allocation80_spill] sm:$0xff] }
 0x32d   :  { %v3532_v4 = vpack.c.bf16 %v7775_v57, %v7774_v31  ;;  %v7780_v41 = vand.u32 4294901760, %v7305_v55  ;;  %v7781_v39 = vand.u32 4294901760, %v7308_v5  ;;  %v7782_v29 = vand.u32 4294901760, %v7316_v22  ;;  %v7787_v55 = vld [vmem:[#allocation184_spill] sm:$0xff]  ;;  %v7820_v46 = vld [vmem:[#allocation74_spill] sm:$0xff]  ;;  %v7829_v31 = vld [vmem:[#allocation95_spill] sm:$0xff] }
 0x32e   :  { %3903 = vmatpush1.bf16.msra.mxu0 %v3902_v8  ;;  %v3914_v28 = vpack.c.bf16 %v7777_v36, %v7776_v60  ;;  %v3534_v53 = vpack.c.bf16 %v7779_v42, %v7778_v11  ;;  %v7783_v58 = vand.u32 4294901760, %v7318_v2  ;;  %v7784_v38 = vand.u32 4294901760, %v7312_v16  ;;  %v7793_v2 = vld [vmem:[#allocation189_spill] sm:$0xff]  ;;  %v7795_v16 = vld [vmem:[#allocation190_spill] sm:$0xff]  ;;  %v7827_v12 = vld [vmem:[#allocation92_spill] sm:$0xff] }
 0x32f   :  { %3523 = vmatpush1.bf16.msra.mxu1 %v3522_v25  ;;  %3905 = vmatprep.subr.bf16.mxu0 %v3904_v14  ;;  %v3916_v54 = vpack.c.bf16 %v7781_v39, %v7780_v41  ;;  %v7785_v20 = vand.u32 4294901760, %v7313_v43  ;;  %v7786_v63 = vand.u32 4294901760, %v7320_v24  ;;  %v7788_v15 = vand.u32 4294901760, %v7787_v55  ;;  %v7797_v8 = vld [vmem:[#allocation14_spill] sm:$0xff]  ;;  %v7798_v24 = vld [vmem:[#allocation237_spill] sm:$0xff]  ;;  %v7801_v25 = vld [vmem:[#allocation20_spill] sm:$0xff] }
 0x330   :  { %3525 = vmatprep.subr.bf16.mxu1 %v3524_v45  ;;  %v3536_v48 = vpack.c.bf16 %v7783_v58, %v7782_v29  ;;  %v7790_v44 = vand.u32 4294901760, %v7789_v35  ;;  %v7792_v22 = vand.u32 4294901760, %v7791_v52  ;;  %v7794_v26 = vand.u32 4294901760, %v7793_v2  ;;  %v7804_v14 = vld [vmem:[#allocation23_spill] sm:$0xff]  ;;  %v7807_v45 = vld [vmem:[#allocation33_spill] sm:$0xff]  ;;  %v7824_v37 = vld [vmem:[#allocation86_spill] sm:$0xff] }
 0x331   :  { %v3918_v56 = vpack.c.bf16 %v7785_v20, %v7784_v38  ;;  %v3538_v5 = vpack.c.bf16 %v7788_v15, %v7786_v63  ;;  %v7796_v61 = vand.u32 4294901760, %v7795_v16  ;;  %v7826_v59 = vld [vmem:[#allocation90_spill] sm:$0xff]  ;;  %v7833_v36 = vld [vmem:[#allocation107_spill] sm:$0xff]  ;;  %v7836_v42 = vld [vmem:[#allocation116_spill] sm:$0xff] }
 0x332   :  { %3907 = vmatpush1.bf16.msra.mxu0 %v3906_v9  ;;  %v3920_v17 = vpack.c.bf16 %v7792_v22, %v7790_v44  ;;  %v7810_v9 = vld [vmem:[#allocation41_spill] sm:$0xff]  ;;  %v7830_v57 = vld [vmem:[#allocation102_spill] sm:$0xff]  ;;  %v7841_v29 = vld [vmem:[#allocation119_spill] sm:$0xff] }
 0x333   :  { %3527 = vmatpush1.bf16.msra.mxu1 %v3526_v27  ;;  %3909 = vmatprep.subr.bf16.mxu0 %v3908_v18  ;;  %v3922_v43 = vpack.c.bf16 %v7796_v61, %v7794_v26  ;;  %v7813_v27 = vld [vmem:[#allocation47_spill] sm:$0xff]  ;;  %v7816_v18 = vld [vmem:[#allocation62_spill] sm:$0xff]  ;;  %v7838_v41 = vld [vmem:[#allocation117_spill] sm:$0xff] }
 0x334   :  { %3529 = vmatprep.subr.bf16.mxu1 %v3528_v47  ;;  %v7819_v47 = vld [vmem:[#allocation68_spill] sm:$0xff]  ;;  %v7832_v60 = vld [vmem:[#allocation110_spill] sm:$0xff]  ;;  %v7842_v58 = vld [vmem:[#allocation121_spill] sm:$0xff] }
 0x335   :  { %v7835_v11 = vld [vmem:[#allocation114_spill] sm:$0xff]  ;;  %v7844_v38 = vld [vmem:[#allocation124_spill] sm:$0xff]  ;;  %v7845_v20 = vld [vmem:[#allocation123_spill] sm:$0xff] }
 0x336   :  { %3911 = vmatpush1.bf16.msra.mxu0 %v3910_v7  ;;  %v7822_v7 = vld [vmem:[#allocation78_spill] sm:$0xff]  ;;  %v7848_v55 = vld [vmem:[#allocation136_spill] sm:$0xff]  ;;  %v7849_v15 = vld [vmem:[#allocation135_spill] sm:$0xff] }
 0x337   :  { %3531 = vmatpush1.bf16.msra.mxu1 %v3530_v34  ;;  %3913 = vmatprep.subr.bf16.mxu0 %v3912_v13  ;;  %v7825_v34 = vld [vmem:[#allocation83_spill] sm:$0xff]  ;;  %v7828_v13 = vld [vmem:[#allocation98_spill] sm:$0xff]  ;;  %v7852_v44 = vld [vmem:[#allocation160_spill] sm:$0xff] }
 0x338   :  { %3533 = vmatprep.subr.bf16.mxu1 %v3532_v4  ;;  %v7831_v4 = vld [vmem:[#allocation104_spill] sm:$0xff]  ;;  %v7839_v39 = vld [vmem:[#allocation118_spill] sm:$0xff]  ;;  %v7853_v52 = vld [vmem:[#allocation159_spill] sm:$0xff] }
 0x339   :  { %v7847_v63 = vld [vmem:[#allocation134_spill] sm:$0xff]  ;;  %v7854_v22 = vld [vmem:[#allocation161_spill] sm:$0xff]  ;;  %v7856_v2 = vld [vmem:[#allocation168_spill] sm:$0xff] }
 0x33a   :  { %3915 = vmatpush1.bf16.msra.mxu0 %v3914_v28  ;;  %v7834_v28 = vld [vmem:[#allocation113_spill] sm:$0xff]  ;;  %v7851_v35 = vld [vmem:[#allocation158_spill] sm:$0xff]  ;;  %v7857_v26 = vld [vmem:[#allocation164_spill] sm:$0xff] }
 0x33b   :  { %3535 = vmatpush1.bf16.msra.mxu1 %v3534_v53  ;;  %3917 = vmatprep.subr.bf16.mxu0 %v3916_v54  ;;  %v7837_v53 = vld [vmem:[#allocation115_spill] sm:$0xff]  ;;  %v7840_v54 = vld [vmem:[#allocation120_spill] sm:$0xff]  ;;  %v7858_v16 = vld [vmem:[#allocation170_spill] sm:$0xff] }
 0x33c   :  { %3537 = vmatprep.subr.bf16.mxu1 %v3536_v48  ;;  %v7843_v48 = vld [vmem:[#allocation122_spill] sm:$0xff] }
 0x33d   :  { %v7859_v61 = vld [vmem:[#allocation174_spill] sm:$0xff] }
 0x33e   :  { %3919 = vmatpush1.bf16.msra.mxu0 %v3918_v56  ;;  %v7846_v56 = vld [vmem:[#allocation125_spill] sm:$0xff] }
 0x33f   :  { %3539 = vmatpush1.bf16.msra.mxu1 %v3538_v5  ;;  %3921 = vmatprep.subr.bf16.mxu0 %v3920_v17  ;;  %v7850_v5 = vld [vmem:[#allocation157_spill] sm:$0xff]  ;;  %v7855_v17 = vld [vmem:[#allocation162_spill] sm:$0xff] }
 0x340   :  { %3541 = vmatprep.subr.bf16.mxu1 %v7797_v8  ;;  %v7861_v8 = vld [vmem:[#allocation177_spill] sm:$0xff] }
 0x342   :  { %3923 = vmatpush1.bf16.msra.mxu0 %v3922_v43  ;;  %1664 = vmatmul.mubr.f32.vlgmr.msra.gmra.mrb[0].mxu1 %v7798_v24  ;;  %v7860_v43 = vld [vmem:[#allocation179_spill] sm:$0xff] }
 0x343   :  { %3543 = vmatpush1.bf16.msra.mxu1 %v7799_v62  ;;  %1799 = vmatprep.mubr.f32.mxu1 %v7800_v10  ;;  %v7862_v62 = vld [vmem:[#allocation182_spill] sm:$0xff]  ;;  %v7863_v10 = vld [vmem:[#allocation185_spill] sm:$0xff] }
 0x344   :  { %3925 = vmatprep.subr.bf16.mxu0 %v7801_v25  ;;  %3545 = vmatprep.subr.bf16.mxu1 %v7802_v3  ;;  %v7864_v25 = vld [vmem:[#allocation188_spill] sm:$0xff] }
 0x345   :  { %2956 = vmatmul.mubr.f32.vlgmr.msra.gmra.mrb[0].mxu0 %v7803_v30 }
 0x346   :  { %3927 = vmatpush1.bf16.msra.mxu0 %v7804_v14  ;;  %3091 = vmatprep.mubr.f32.mxu0 %v7805_v19 }
 0x347   :  { %3547 = vmatpush1.bf16.msra.mxu1 %v7806_v40  ;;  %3929 = vmatprep.subr.bf16.mxu0 %v7807_v45  ;;  %v3100_v40 = vstv %s6430_s6  ;;  %s4153_s6 = smov [#allocation8]  }
 0x348   :  { %3549 = vmatprep.subr.bf16.mxu1 %v7808_v6  ;;  %s3197_s26 = sshll.u32 %s4153_s6, 4  ;;  %s3198_s26 = int_to_ptr.vmem [resolvable:$true] %s3197_s26 }
 0x349   :  { %s4119_s27 = scalar_lea.vmem %s3198_s26, 2048  ;;  %p4124_p3 = scmp.lt.s32.totalorder %s3198_s26, %s3198_s26 }
 0x34a   :  { %3931 = vmatpush1.bf16.msra.mxu0 %v7809_v33  ;;  %p4120_p2 = scmp.ne.s32.totalorder %s3198_s26, %s4119_s27  ;;  %p4125_p4 = scmp.lt.s32.totalorder %s4119_s27, %s4119_s27 }
 0x34b   :  { %3551 = vmatpush1.bf16.msra.mxu1 %v7810_v9  ;;  %3933 = vmatprep.subr.bf16.mxu0 %v7811_v23 }
 0x34c   :  { %3553 = vmatprep.subr.bf16.mxu1 %v7812_v51  ;;  %p4126_p5 = por %p4125_p4, %p4124_p3 }
 0x34e   :  { %3935 = vmatpush1.bf16.msra.mxu0 %v7813_v27  ;;  %p4127_p6 = pnand %p4126_p5, %p4120_p2 }
 0x34f   :  { %3555 = vmatpush1.bf16.msra.mxu1 %v7814_v50  ;;  %3937 = vmatprep.subr.bf16.mxu0 %v7815_v0 }
 0x350   :  { %3557 = vmatprep.subr.bf16.mxu1 %v7816_v18  ;;  %v4152_v18 = vmov 1966171168  }
 0x352   :  { %3939 = vmatpush1.bf16.msra.mxu0 %v7817_v32  ;;  %v3119_v32 = vunpack.c.l.s4 %v4152_v18 }
 0x353   :  { %3559 = vmatpush1.bf16.msra.mxu1 %v7818_v49  ;;  %3941 = vmatprep.subr.bf16.mxu0 %v7819_v47 }
 0x354   :  { %3561 = vmatprep.subr.bf16.mxu1 %v7820_v46  ;;  %v3120_v49 = vunpack.c.0.s8 %v3119_v32  ;;  %v7865_v46 = vld [vmem:[#allocation12_spill] sm:$0xff] }
 0x356   :  { %3943 = vmatpush1.bf16.msra.mxu0 %v7821_v1  ;;  %v3123_v1 = vsub.s32 %v3120_v49, %v7865_v46 }
 0x357   :  { %3563 = vmatpush1.bf16.msra.mxu1 %v7822_v7  ;;  %3945 = vmatprep.subr.bf16.mxu0 %v7823_v21 }
 0x358   :  { %3565 = vmatprep.subr.bf16.mxu1 %v7824_v37 }
 0x35a   :  { %3947 = vmatpush1.bf16.msra.mxu0 %v7825_v34  ;;  %v3146_v34 = vsub.s32 1, %v7865_v46 }
 0x35b   :  { %3567 = vmatpush1.bf16.msra.mxu1 %v7826_v59  ;;  %3949 = vmatprep.subr.bf16.mxu0 %v7827_v12 }
 0x35c   :  { %3569 = vmatprep.subr.bf16.mxu1 %v7828_v13 }
 0x35e   :  { %3951 = vmatpush1.bf16.msra.mxu0 %v7829_v31  ;;  %v7866_v31 = vld [vmem:[#allocation13_spill] sm:$0xff] }
 0x35f   :  { %3571 = vmatpush1.bf16.msra.mxu1 %v7830_v57  ;;  %3953 = vmatprep.subr.bf16.mxu0 %v7831_v4 }
 0x360   :  { %3573 = vmatprep.subr.bf16.mxu1 %v7832_v60 }
 0x362   :  { %3955 = vmatpush1.bf16.msra.mxu0 %v7833_v36 }
 0x363   :  { %3575 = vmatpush1.bf16.msra.mxu1 %v7834_v28  ;;  %3957 = vmatprep.subr.bf16.mxu0 %v7835_v11  ;;  %v7867_v28 = vld [vmem:[#allocation217_spill] sm:$0xff] }
 0x364   :  { %3577 = vmatprep.subr.bf16.mxu1 %v7836_v42  ;;  %v7868_v42 = vld [vmem:[#allocation218_spill] sm:$0xff] }
 0x366   :  { %3959 = vmatpush1.bf16.msra.mxu0 %v7837_v53 }
 0x367   :  { %3579 = vmatpush1.bf16.msra.mxu1 %v7838_v41  ;;  %3961 = vmatprep.subr.bf16.mxu0 %v7839_v39  ;;  %v7869_v41 = vld [vmem:[#allocation215_spill] sm:$0xff] }
 0x368   :  { %3581 = vmatprep.subr.bf16.mxu1 %v7840_v54  ;;  %v7870_v54 = vld [vmem:[#allocation216_spill] sm:$0xff] }
 0x36a   :  { %3963 = vmatpush1.bf16.msra.mxu0 %v7841_v29 }
 0x36b   :  { %3583 = vmatpush1.bf16.msra.mxu1 %v7842_v58  ;;  %3965 = vmatprep.subr.bf16.mxu0 %v7843_v48  ;;  %v7871_v58 = vld [vmem:[#allocation223_spill] sm:$0xff] }
 0x36c   :  { %3585 = vmatprep.subr.bf16.mxu1 %v7844_v38  ;;  %v7872_v38 = vld [vmem:[#allocation224_spill] sm:$0xff] }
 0x36e   :  { %3967 = vmatpush1.bf16.msra.mxu0 %v7845_v20 }
 0x36f   :  { %3587 = vmatpush1.bf16.msra.mxu1 %v7846_v56  ;;  %3969 = vmatprep.subr.bf16.mxu0 %v7847_v63  ;;  %v7873_v56 = vld [vmem:[#allocation232_spill] sm:$0xff] }
 0x370   :  { %3589 = vmatprep.subr.bf16.mxu1 %v7848_v55  ;;  %v7874_v55 = vld [vmem:[#allocation233_spill] sm:$0xff] }
 0x372   :  { %3971 = vmatpush1.bf16.msra.mxu0 %v7849_v15 }
 0x373   :  { %3591 = vmatpush1.bf16.msra.mxu1 %v7850_v5  ;;  %3973 = vmatprep.subr.bf16.mxu0 %v7851_v35  ;;  %v7875_v5 = vld [vmem:[#allocation226_spill] sm:$0xff] }
 0x374   :  { %3593 = vmatprep.subr.bf16.mxu1 %v7852_v44  ;;  %v7876_v44 = vld [vmem:[#allocation229_spill] sm:$0xff] }
 0x376   :  { %3975 = vmatpush1.bf16.msra.mxu0 %v7853_v52 }
 0x377   :  { %3595 = vmatpush1.bf16.msra.mxu1 %v7854_v22  ;;  %3977 = vmatprep.subr.bf16.mxu0 %v7855_v17  ;;  %v7877_v22 = vld [vmem:[#allocation227_spill] sm:$0xff] }
 0x378   :  { %3597 = vmatprep.subr.bf16.mxu1 %v7856_v2  ;;  %v7878_v2 = vld [vmem:[#allocation228_spill] sm:$0xff] }
 0x37a   :  { %3979 = vmatpush1.bf16.msra.mxu0 %v7857_v26 }
 0x37b   :  { %3599 = vmatpush1.bf16.msra.mxu1 %v7858_v16  ;;  %3981 = vmatprep.subr.bf16.mxu0 %v7859_v61  ;;  %v7879_v16 = vld [vmem:[#allocation230_spill] sm:$0xff] }
 0x37c   :  { %3601 = vmatprep.subr.bf16.mxu1 %v7860_v43  ;;  %v7880_v43 = vld [vmem:[#allocation231_spill] sm:$0xff] }
 0x37e   :  { %3983 = vmatpush1.bf16.msra.mxu0 %v7861_v8 }
 0x37f   :  { %3603 = vmatpush1.bf16.msra.mxu1 %v7862_v62  ;;  %3985 = vmatprep.subr.bf16.mxu0 %v7863_v10  ;;  %v7881_v62 = vld [vmem:[#allocation234_spill] sm:$0xff] }
 0x382   :  { %3987 = vmatpush1.bf16.msra.mxu0 %v7864_v25  ;;  %1801 = vmatmul.mubr.f32.vlgmr.msra.gmra.mrb[0].mxu1 %v7798_v24  ;;  %v7882_v25 = vld [vmem:[#allocation235_spill] sm:$0xff] }
 0x385   :  { %3093 = vmatmul.mubr.f32.vlgmr.msra.gmra.mrb[0].mxu0 %v7803_v30 }
 0x455   :  { %v1802_v3 = vpop.f32.mrb[0].mxu1 }
 0x456   :  { %v1804_v14 = vpop.f32.mrb[1].mxu1 }
 0x458   :  { %v3094_v19 = vpop.f32.mrb[0].mxu0 }
 0x459   :  { %v3988_v45 = vadd.f32 %v3094_v19, %v1802_v3  ;;  %v3096_v6 = vpop.f32.mrb[1].mxu0 }
 0x45a   :  { %v3989_v33 = vadd.f32 %v3096_v6, %v1804_v14 }
 0x45b   :  { %v3101_v9 = vadd.f32 %v3988_v45, %v3100_v40 }
 0x45c   :  { %v3102_v23 = vadd.f32 %v3989_v33, %v3100_v40 }
 0x45d   :  { %v3218_v51 = vmul.f32 -1.442695, %v3101_v9 }
 0x45e   :  { %v3219_v27 = vmul.f32 -1.442695, %v3102_v23 }
 0x45f   :  { %4051 = vpow2.f32 %v3218_v51 }
 0x460   :  { %4053 = vpow2.f32 %v3219_v27 }
 0x469   :  { %v4052_v50 = vpop.eup %4051 }
 0x46a   :  { %v4054_v24 = vpop.eup %4053  ;;  %v3109_v0 = vadd.f32 1.0, %v4052_v50 }
 0x46b   :  { %v3110_v30 = vadd.f32 1.0, %v4054_v24 }
 0x46c   :  { %4055 = vrcp.f32 %v3109_v0 }
 0x46d   :  { %4057 = vrcp.f32 %v3110_v30 }
 0x476   :  { %v4056_v47 = vpop.eup %4055 }
 0x477   :  { %v4058_v7 = vpop.eup %4057 }
 0x478   :  { %v3117_v21 = vcombine.low %v4056_v47, %v4058_v7 }
 0x47a   :  { %v3124_v37 = vrot.slane %v3117_v21, %v3123_v1 }
 0x47c   :  { %v3125_v59 = vcombine.high %v3124_v37, %v3124_v37  ;;  %v3132_v12 = vrot.slane %v3124_v37, %v3123_v1 }
 0x47e   :  { %v3139_v13 = vrot.slane %v3125_v59, %v3123_v1  ;;  %v3143_v57 = vrot.slane %v3132_v12, %v7866_v31  ;;  %v3147_v4 = vrot.slane %v3132_v12, %v3146_v34 }
 0x480   :  { %v3151_v60 = vrot.slane %v3139_v13, %v7866_v31  ;;  %v3155_v36 = vrot.slane %v3139_v13, %v3146_v34  ;;  %v3160_v11 = vmul.f32 %v3143_v57, %v7867_v28  ;;  %v3161_v53 = vmul.f32 %v3147_v4, %v7868_v42 }
 0x481   :  { %v3162_v39 = vmul.f32 %v3143_v57, %v7869_v41  ;;  %v3163_v29 = vmul.f32 %v3147_v4, %v7870_v54  ;;  %v3164_v48 = vmul.f32 %v3143_v57, %v7871_v58  ;;  %v3165_v20 = vmul.f32 %v3147_v4, %v7872_v38 }
 0x482   :  { %v3166_v63 = vmul.f32 %v3143_v57, %v7873_v56  ;;  %v3167_v15 = vmul.f32 %v3147_v4, %v7874_v55  ;;  %v3168_v35 = vmul.f32 %v3151_v60, %v7875_v5  ;;  %v3169_v52 = vmul.f32 %v3155_v36, %v7876_v44  ;;  %3176 = vst [vmem:[#allocation8] sm:$0xff] %v3160_v11 }
 0x483   :  { %3177 = vst [vmem:[#allocation8 + $0x8] sm:$0xff] %v3161_v53  ;;  %v3170_v17 = vmul.f32 %v3151_v60, %v7877_v22  ;;  %v3171_v26 = vmul.f32 %v3155_v36, %v7878_v2  ;;  %v3172_v61 = vmul.f32 %v3151_v60, %v7879_v16  ;;  %v3173_v8 = vmul.f32 %v3155_v36, %v7880_v43 }
 0x484   :  { %3178 = vst [vmem:[#allocation8 + $0x10] sm:$0xff] %v3162_v39  ;;  %3179 = vst [vmem:[#allocation8 + $0x18] sm:$0xff] %v3163_v29  ;;  %v3174_v10 = vmul.f32 %v3151_v60, %v7881_v62  ;;  %v3175_v3 = vmul.f32 %v3155_v36, %v7882_v25 }
 0x485   :  { %3180 = vst [vmem:[#allocation8 + $0x20] sm:$0xff] %v3164_v48  ;;  %3181 = vst [vmem:[#allocation8 + $0x28] sm:$0xff] %v3165_v20 }
 0x486   :  { %3182 = vst [vmem:[#allocation8 + $0x30] sm:$0xff] %v3166_v63  ;;  %3183 = vst [vmem:[#allocation8 + $0x38] sm:$0xff] %v3167_v15 }
 0x487   :  { %3184 = vst [vmem:[#allocation8 + $0x40] sm:$0xff] %v3168_v35  ;;  %3185 = vst [vmem:[#allocation8 + $0x48] sm:$0xff] %v3169_v52 }
 0x488   :  { %3186 = vst [vmem:[#allocation8 + $0x50] sm:$0xff] %v3170_v17  ;;  %3187 = vst [vmem:[#allocation8 + $0x58] sm:$0xff] %v3171_v26 }
 0x489   :  { %3188 = vst [vmem:[#allocation8 + $0x60] sm:$0xff] %v3172_v61  ;;  %3189 = vst [vmem:[#allocation8 + $0x68] sm:$0xff] %v3173_v8 }
 0x48a   :  { %3190 = vst [vmem:[#allocation8 + $0x70] sm:$0xff] %v3174_v10  ;;  %3191 = vst [vmem:[#allocation8 + $0x78] sm:$0xff] %v3175_v3 }
 0x48b   :  { %4130 = shalt.err (!%p4127_p6)
}
 0x48c   :  { %s4131_s30 = scalar_lea.hbm %s6431_s7, 2048 }
 0x48d   :  { %p4132_p7 = scmp.ne.s32.totalorder %s6431_s7, %s4131_s30  ;;  %p4135_p8 = scmp.lt.u32.totalorder %s4131_s30, %s6431_s7 }
 0x48f   :  { %p4137_p9 = pnand %p4135_p8, %p4132_p7 }
 0x491   :  { %4140 = shalt.err (!%p4137_p9)
}
 0x492   :  { %3203 = dma.vmem_to_hbm [thread:$0]  %s3198_s26, 2048, %s6431_s7, [#allocation5], %s4148_s11, %s4148_s11, %s4149_s12  }
 0x493   :  { %4145 = dma.done.wait [#allocation5], 2048  }
 0x494   :  { %4146 = vsyncadd [#allocation5], 4294965248 }
 0x495   :  { %3207 = vsyncpa [#allocation4], 1 }
 0x496   :  { %3208 = vsyncpa [#allocation7], 1 }
 0x497   :  { %3209 = vsyncpa [#allocation5], 1 }

</bundles_post_ra>
